<compile_context>
chip_gen: v7x
topology: tpu7x:2x2x1
jax: 0.10.0
libtpu: 0.0.40
codegen_flags: <defaults>
</compile_context>

<pallas_src>
import math
import jax
import jax.numpy as jnp
from jax import lax
from jax.experimental import pallas as pl
from jax.experimental.pallas import tpu as pltpu


# ----------------------------------------------------------------------------- helpers

_TILE_CACHE = None


def _round_up(x, m):
    return ((x + m - 1) // m) * m


def _tile_prefs():
    """Generation-aware (tm_pref, tn_pref, vmem_limit_bytes)."""
    global _TILE_CACHE
    if _TILE_CACHE is None:
        try:
            vmem = int(pltpu.get_tpu_info().vmem_capacity_bytes)
        except Exception:
            vmem = None
        if vmem is None:
            _TILE_CACHE = (256, 256, None)            # conservative fallback
        elif vmem >= (100 << 20):                     # v5e / v6e: 128 MiB VMEM
            _TILE_CACHE = (512, 256, 96 << 20)
        else:                                         # v7x: 64 MiB VMEM
            _TILE_CACHE = (256, 512, 40 << 20)
    return _TILE_CACHE


# ----------------------------------------------------------------------------- kernels

def _make_linear_kernel(has_ln, has_bias, gelu, has_residual):
    """Fused [LayerNorm] -> bf16 matmul (fp32 acc) -> [+bias] -> [QuickGELU] -> [+residual]."""

    def kernel(*refs):
        it = iter(refs)
        x_ref = next(it)
        ln_g_ref = next(it) if has_ln else None
        ln_b_ref = next(it) if has_ln else None
        w_ref = next(it)
        b_ref = next(it) if has_bias else None
        r_ref = next(it) if has_residual else None
        o_ref = next(it)
        xb_ref = next(it)                               # (tm, K) bf16 scratch, persists over j

        # LN (fp32) / cast computed once per M-tile and reused across all N-tiles.
        @pl.when(pl.program_id(1) == 0)
        def _():
            if has_ln:
                x = x_ref[...].astype(jnp.float32)
                mu = jnp.mean(x, axis=-1, keepdims=True)
                var = jnp.mean((x - mu) * (x - mu), axis=-1, keepdims=True)
                x = (x - mu) * lax.rsqrt(var + 1e-5) * ln_g_ref[...] + ln_b_ref[...]
                xb_ref[...] = x.astype(jnp.bfloat16)
            else:
                xb_ref[...] = x_ref[...].astype(jnp.bfloat16)

        y = jnp.dot(xb_ref[...], w_ref[...].astype(jnp.bfloat16),
                    preferred_element_type=jnp.float32)
        if has_bias:
            y = y + b_ref[...].astype(jnp.float32)
        if gelu:                                        # QuickGELU fused with c_fc
            y = y * jax.nn.sigmoid(1.702 * y)
        if has_residual:
            y = y + r_ref[...].astype(jnp.float32)
        o_ref[...] = y.astype(o_ref.dtype)

    return kernel


def _vision_pre_kernel(xp_ref, cls_ref, pos_ref, g_ref, b_ref, o_ref):
    """[class token | patches] + pos_embedding -> LayerNorm (ln_pre), all in one pass."""
    xp = xp_ref[0].astype(jnp.float32)                  # (S-1, D)
    cls = cls_ref[...].astype(jnp.float32)              # (1, D)
    pos = pos_ref[...].astype(jnp.float32)              # (S, D)
    x = jnp.concatenate([cls, xp], axis=0) + pos        # (S, D)
    mu = jnp.mean(x, axis=-1, keepdims=True)
    var = jnp.mean((x - mu) * (x - mu), axis=-1, keepdims=True)
    y = (x - mu) * lax.rsqrt(var + 1e-5) * g_ref[...] + b_ref[...]
    o_ref[0] = y.astype(o_ref.dtype)


def _make_attention_kernel(n_head, head_dim, seq_len, causal):
    d_model = n_head * head_dim
    # Group heads so output writes span 128 lanes when head_dim allows.
    hpc = max(1, min(n_head, 128 // max(head_dim, 1)))
    while n_head % hpc:
        hpc -= 1

    def kernel(qkv_ref, o_ref):
        qkv = qkv_ref[0]                                 # (S, 3D) bf16
        if causal:
            row = lax.broadcasted_iota(jnp.int32, (seq_len, seq_len), 0)
            col = lax.broadcasted_iota(jnp.int32, (seq_len, seq_len), 1)
            neg = jnp.where(col > row, -jnp.inf, 0.0).astype(jnp.float32)
        for c in range(n_head // hpc):
            outs = []
            for hh in range(hpc):
                h = c * hpc + hh
                q = qkv[:, h * head_dim:(h + 1) * head_dim]          # already scaled (folded)
                k = qkv[:, d_model + h * head_dim:d_model + (h + 1) * head_dim]
                v = qkv[:, 2 * d_model + h * head_dim:2 * d_model + (h + 1) * head_dim]
                s = lax.dot_general(q, k, (((1,), (1,)), ((), ())),
                                    preferred_element_type=jnp.float32)
                if causal:
                    s = s + neg
                s = s - jnp.max(s, axis=-1, keepdims=True)
                p = jnp.exp(s)
                p = p * pl.reciprocal(jnp.sum(p, axis=-1, keepdims=True), approx=True)
                o = lax.dot_general(p.astype(jnp.bfloat16), v, (((1,), (0,)), ((), ())),
                                    preferred_element_type=jnp.float32)
                outs.append(o.astype(o_ref.dtype))
            chunk = outs[0] if len(outs) == 1 else jnp.concatenate(outs, axis=-1)
            lo = c * hpc * head_dim
            hi = (c + 1) * hpc * head_dim
            o_ref[0, :, lo:hi] = chunk                   # lane-dense direct store per chunk

    return kernel


def _logits_kernel(scale_ref, img_ref, txt_ref, o_ref):
    # Fused epilogue: l2-normalize both feature sets (fp32), bf16 similarity matmul, scale.
    img = img_ref[...].astype(jnp.float32)
    txt = txt_ref[...].astype(jnp.float32)
    img = img * lax.rsqrt(jnp.sum(img * img, axis=-1, keepdims=True))
    txt = txt * lax.rsqrt(jnp.sum(txt * txt, axis=-1, keepdims=True))
    logits = lax.dot_general(img.astype(jnp.bfloat16), txt.astype(jnp.bfloat16),
                             (((1,), (1,)), ((), ())),
                             preferred_element_type=jnp.float32)
    o_ref[...] = scale_ref[0] * logits


# ----------------------------------------------------------------------------- wrappers

def fused_linear(x, w_t, b=None, *, ln_g=None, ln_b=None, residual=None,
                 gelu=False, out_dtype=jnp.bfloat16):
    """y = [+residual] act( LN?(x) @ w_t + b ).  x:(M,K), w_t:(K,N) bf16 (pre-transposed)."""
    M, K = x.shape
    Kw, N = w_t.shape
    assert K == Kw
    has_ln = ln_g is not None
    has_bias = b is not None
    has_res = residual is not None

    tm_pref, tn_pref, vmem_limit = _tile_prefs()
    tm = min(tm_pref, _round_up(M, 8))
    tn = N if N <= tn_pref else tn_pref                  # full-dim tile or 128-multiple pref
    grid = (pl.cdiv(M, tm), pl.cdiv(N, tn))              # ragged edges -> partial blocks, no pads

    args = [x]
    in_specs = [pl.BlockSpec((tm, K), lambda i, j: (i, 0))]
    if has_ln:
        args += [ln_g.reshape(1, K), ln_b.reshape(1, K)]
        in_specs += [pl.BlockSpec((1, K), lambda i, j: (0, 0)),
                     pl.BlockSpec((1, K), lambda i, j: (0, 0))]
    args.append(w_t)
    in_specs.append(pl.BlockSpec((K, tn), lambda i, j: (0, j)))
    if has_bias:
        args.append(b.reshape(1, N))
        in_specs.append(pl.BlockSpec((1, tn), lambda i, j: (0, j)))
    if has_res:
        args.append(residual)
        in_specs.append(pl.BlockSpec((tm, tn), lambda i, j: (i, j)))

    return pl.pallas_call(
        _make_linear_kernel(has_ln, has_bias, gelu, has_res),
        grid=grid,
        in_specs=in_specs,
        out_specs=pl.BlockSpec((tm, tn), lambda i, j: (i, j)),
        out_shape=jax.ShapeDtypeStruct((M, N), out_dtype),
        scratch_shapes=[pltpu.VMEM((tm, K), jnp.bfloat16)],
        compiler_params=pltpu.CompilerParams(
            dimension_semantics=("parallel", "arbitrary"),
            vmem_limit_bytes=vmem_limit),
    )(*args)


def vision_pre(x_patches, cls_emb, pos_emb, g, b):
    """Fused class-token concat + positional add + ln_pre.  x_patches: (B, S-1, D) bf16."""
    B, Sm1, D = x_patches.shape
    S = Sm1 + 1
    return pl.pallas_call(
        _vision_pre_kernel,
        grid=(B,),
        in_specs=[pl.BlockSpec((1, Sm1, D), lambda i: (i, 0, 0)),
                  pl.BlockSpec((1, D), lambda i: (0, 0)),
                  pl.BlockSpec((S, D), lambda i: (0, 0)),
                  pl.BlockSpec((1, D), lambda i: (0, 0)),
                  pl.BlockSpec((1, D), lambda i: (0, 0))],
        out_specs=pl.BlockSpec((1, S, D), lambda i: (i, 0, 0)),
        out_shape=jax.ShapeDtypeStruct((B, S, D), jnp.bfloat16),
        compiler_params=pltpu.CompilerParams(dimension_semantics=("parallel",)),
    )(x_patches, cls_emb.reshape(1, D), pos_emb, g.reshape(1, D), b.reshape(1, D))


def pallas_attention(qkv, n_head, causal):
    """qkv: (B, S, 3*D) bf16 slab straight from the fused in_proj; returns (B, S, D) bf16."""
    B, S, threeD = qkv.shape
    D = threeD // 3
    assert D % n_head == 0
    head_dim = D // n_head
    return pl.pallas_call(
        _make_attention_kernel(n_head, head_dim, S, causal),
        grid=(B,),
        in_specs=[pl.BlockSpec((1, S, threeD), lambda b: (b, 0, 0))],
        out_specs=pl.BlockSpec((1, S, D), lambda b: (b, 0, 0)),
        out_shape=jax.ShapeDtypeStruct((B, S, D), qkv.dtype),
        compiler_params=pltpu.CompilerParams(dimension_semantics=("parallel",)),
    )(qkv)


def pallas_logits(image_features, text_features, logit_scale):
    Bi, E = image_features.shape
    Bt = text_features.shape[0]
    # TODO(synk): add M/N tiling for very large contrastive batches; untiled is fine here.
    return pl.pallas_call(
        _logits_kernel,
        in_specs=[pl.BlockSpec(memory_space=pltpu.MemorySpace.SMEM),
                  pl.BlockSpec(memory_space=pltpu.MemorySpace.VMEM),
                  pl.BlockSpec(memory_space=pltpu.MemorySpace.VMEM)],
        out_specs=pl.BlockSpec(memory_space=pltpu.MemorySpace.VMEM),
        out_shape=jax.ShapeDtypeStruct((Bi, Bt), jnp.float32),
    )(logit_scale.reshape(1).astype(jnp.float32), image_features, text_features)


# ----------------------------------------------------------------------------- model pieces

def residual_attention_block(x, p, n_head, causal):
    # x: (B, S, D) bf16
    B, S, D = x.shape
    x2 = x.reshape(B * S, D)

    # attention branch: ln_1 fused into in_proj, residual fused into out_proj
    qkv = fused_linear(x2, p["in_proj_w_t"], p["in_proj_b"],
                       ln_g=p["ln1_g"], ln_b=p["ln1_b"])                 # (B*S, 3D) bf16
    a = pallas_attention(qkv.reshape(B, S, 3 * D), n_head, causal)       # (B, S, D) bf16
    x2 = fused_linear(a.reshape(B * S, D), p["out_proj_w_t"], p["out_proj_b"],
                      residual=x2)                                       # (B*S, D) bf16

    # MLP branch: ln_2 + QuickGELU fused into c_fc, residual fused into c_proj
    h = fused_linear(x2, p["c_fc_w_t"], p["c_fc_b"],
                     ln_g=p["ln2_g"], ln_b=p["ln2_b"], gelu=True)        # (B*S, 4D) bf16
    x2 = fused_linear(h, p["c_proj_w_t"], p["c_proj_b"], residual=x2)    # (B*S, D) bf16
    return x2.reshape(B, S, D)


def encode_image(image, params, cfg):
    vp = params["visual"]
    P = cfg["vision_patch_size"]
    width = cfg["vision_width"]
    n_head = cfg["vision_heads"]
    B, C, H, W = image.shape
    gh, gw = H // P, W // P

    # patch-embedding conv (kernel == stride, no bias) as patchify + bf16 matmul
    # TODO(synk): patchify reshape/transpose stays in plain JAX (cheap layout shuffle).
    patches = image.reshape(B, C, gh, P, gw, P).transpose(0, 2, 4, 1, 3, 5)
    patches = patches.reshape(B * gh * gw, C * P * P)
    x = fused_linear(patches, vp["conv1_w_t"]).reshape(B, gh * gw, width)   # bf16

    # class-token concat + positional add + ln_pre fused in one kernel
    x = vision_pre(x, vp["class_embedding"], vp["pos_embedding"],
                   vp["ln_pre_g"], vp["ln_pre_b"])                       # (B, S, width) bf16

    for blk in vp["blocks"]:
        x = residual_attention_block(x, blk, n_head, causal=False)      # no mask in vision tower

    # ln_post on the class token fused with the output projection
    x = fused_linear(x[:, 0, :], vp["proj"],
                     ln_g=vp["ln_post_g"], ln_b=vp["ln_post_b"],
                     out_dtype=jnp.float32)                              # (B, embed_dim) fp32
    return x


def encode_text(text, params, cfg):
    tp = params["text"]
    n_head = cfg["transformer_heads"]
    B, S = text.shape

    # TODO(synk): embedding gather + argmax EOT-token selection stay in plain JAX
    # (data-dependent gathers at this size have no clean single-tile Pallas equivalent).
    x = (tp["token_embedding"][text] + tp["pos_embedding"]).astype(jnp.bfloat16)   # (B, S, D)

    for blk in tp["blocks"]:
        x = residual_attention_block(x, blk, n_head, causal=True)

    # LayerNorm is row-wise, so selecting the EOT row first and then applying ln_final is
    # mathematically identical to the reference ordering — lets us fuse ln_final + projection.
    eot = jnp.argmax(text, axis=-1)
    x_eot = x[jnp.arange(B), eot]                                        # (B, D)
    x = fused_linear(x_eot, tp["text_projection"],
                     ln_g=tp["ln_final_g"], ln_b=tp["ln_final_b"],
                     out_dtype=jnp.float32)                              # (B, embed_dim) fp32
    return x


def clip_forward(image, text, params, cfg):
    image_features = encode_image(image, params, cfg)
    text_features = encode_text(text, params, cfg)
    logit_scale = jnp.exp(params["logit_scale"])
    logits_per_image = pallas_logits(image_features, text_features, logit_scale)
    logits_per_text = logits_per_image.T
    return logits_per_image, logits_per_text


# ----------------------------------------------------------------------------- params

def init_block(key, d):
    ks = jax.random.split(key, 4)
    return {
        "in_proj_w": jax.random.normal(ks[0], (3 * d, d), jnp.float32) * 0.02,
        "in_proj_b": jnp.zeros((3 * d,), jnp.float32),
        "out_proj_w": jax.random.normal(ks[1], (d, d), jnp.float32) * 0.02,
        "out_proj_b": jnp.zeros((d,), jnp.float32),
        "ln1_g": jnp.ones((d,), jnp.float32),
        "ln1_b": jnp.zeros((d,), jnp.float32),
        "c_fc_w": jax.random.normal(ks[2], (4 * d, d), jnp.float32) * 0.02,
        "c_fc_b": jnp.zeros((4 * d,), jnp.float32),
        "c_proj_w": jax.random.normal(ks[3], (d, 4 * d), jnp.float32) * 0.02,
        "c_proj_b": jnp.zeros((d,), jnp.float32),
        "ln2_g": jnp.ones((d,), jnp.float32),
        "ln2_b": jnp.zeros((d,), jnp.float32),
    }


def init_clip_params(key, cfg):
    vw = cfg["vision_width"]
    P = cfg["vision_patch_size"]
    res = cfg["image_resolution"]
    tw = cfg["transformer_width"]
    ed = cfg["embed_dim"]
    n_patches = (res // P) ** 2
    vscale = vw ** (-0.5)

    keys = iter(jax.random.split(key, 16))
    visual = {
        "conv1_w": jax.random.normal(next(keys), (vw, 3, P, P), jnp.float32) * 0.02,
        "class_embedding": vscale * jax.random.normal(next(keys), (vw,), jnp.float32),
        "pos_embedding": vscale * jax.random.normal(next(keys), (n_patches + 1, vw), jnp.float32),
        "ln_pre_g": jnp.ones((vw,), jnp.float32),
        "ln_pre_b": jnp.zeros((vw,), jnp.float32),
        "blocks": [init_block(k, vw) for k in
                   jax.random.split(next(keys), cfg["vision_layers"])],
        "ln_post_g": jnp.ones((vw,), jnp.float32),
        "ln_post_b": jnp.zeros((vw,), jnp.float32),
        "proj": vscale * jax.random.normal(next(keys), (vw, ed), jnp.float32),
    }
    text = {
        "token_embedding": jax.random.normal(next(keys), (cfg["vocab_size"], ed), jnp.float32) * 0.02,
        "pos_embedding": jax.random.normal(next(keys), (cfg["context_length"], tw), jnp.float32) * 0.01,
        "blocks": [init_block(k, tw) for k in
                   jax.random.split(next(keys), cfg["transformer_layers"])],
        "ln_final_g": jnp.ones((tw,), jnp.float32),
        "ln_final_b": jnp.zeros((tw,), jnp.float32),
        "text_projection": tw ** (-0.5) * jax.random.normal(next(keys), (tw, ed), jnp.float32),
    }
    return {
        "visual": visual,
        "text": text,
        "logit_scale": jnp.array(math.log(1.0 / 0.07), jnp.float32),
    }


def _prep_block(p, n_head):
    """Pre-transpose weights to (K, N), pre-cast to bf16, fold 1/sqrt(head_dim) into q proj."""
    d = p["ln1_g"].shape[0]
    head_dim = d // n_head
    q_scale = 1.0 / math.sqrt(head_dim)
    in_w_t = p["in_proj_w"].T                    # (D, 3D) with columns [q | k | v]
    in_w_t = in_w_t.at[:, :d].multiply(q_scale)
    in_b = p["in_proj_b"].at[:d].multiply(q_scale)
    return {
        "ln1_g": p["ln1_g"], "ln1_b": p["ln1_b"],
        "in_proj_w_t": in_w_t.astype(jnp.bfloat16),
        "in_proj_b": in_b,
        "out_proj_w_t": p["out_proj_w"].T.astype(jnp.bfloat16),
        "out_proj_b": p["out_proj_b"],
        "ln2_g": p["ln2_g"], "ln2_b": p["ln2_b"],
        "c_fc_w_t": p["c_fc_w"].T.astype(jnp.bfloat16),
        "c_fc_b": p["c_fc_b"],
        "c_proj_w_t": p["c_proj_w"].T.astype(jnp.bfloat16),
        "c_proj_b": p["c_proj_b"],
    }


def prepare_params(params, cfg):
    vw = cfg["vision_width"]
    P = cfg["vision_patch_size"]
    vp, tp = params["visual"], params["text"]
    visual = {
        # conv weight flattened in (C, kh, kw) order to match the patchify layout, then (K, N) bf16
        "conv1_w_t": vp["conv1_w"].reshape(vw, 3 * P * P).T.astype(jnp.bfloat16),
        "class_embedding": vp["class_embedding"],
        "pos_embedding": vp["pos_embedding"],
        "ln_pre_g": vp["ln_pre_g"], "ln_pre_b": vp["ln_pre_b"],
        "blocks": [_prep_block(b, cfg["vision_heads"]) for b in vp["blocks"]],
        "ln_post_g": vp["ln_post_g"], "ln_post_b": vp["ln_post_b"],
        "proj": vp["proj"].astype(jnp.bfloat16),
    }
    text = {
        "token_embedding": tp["token_embedding"],
        "pos_embedding": tp["pos_embedding"],
        "blocks": [_prep_block(b, cfg["transformer_heads"]) for b in tp["blocks"]],
        "ln_final_g": tp["ln_final_g"], "ln_final_b": tp["ln_final_b"],
        "text_projection": tp["text_projection"].astype(jnp.bfloat16),
    }
    return {"visual": visual, "text": text, "logit_scale": params["logit_scale"]}


# ----------------------------------------------------------------------------- main

if __name__ == "__main__":
    cfg = dict(
        embed_dim=32,
        image_resolution=16,
        vision_layers=2,
        vision_width=64,
        vision_patch_size=8,
        context_length=8,
        vocab_size=64,
        transformer_width=32,
        transformer_heads=4,
        transformer_layers=2,
    )
    cfg["vision_heads"] = cfg["vision_width"] // 64  # matches CLIP.__init__

    root = jax.random.PRNGKey(0)
    k_params, k_img, k_txt = jax.random.split(root, 3)

    params = prepare_params(init_clip_params(k_params, cfg), cfg)
    image = jax.random.normal(k_img, (2, 3, cfg["image_resolution"], cfg["image_resolution"]),
                              jnp.float32)
    text = jax.random.randint(k_txt, (2, cfg["context_length"]), 0, cfg["vocab_size"],
                              dtype=jnp.int32)

    fwd = jax.jit(lambda img, txt: clip_forward(img, txt, params, cfg))
    logits_per_image, logits_per_text = fwd(image, text)
    jax.block_until_ready((logits_per_image, logits_per_text))

    assert logits_per_image.shape == (2, 2) and logits_per_text.shape == (2, 2)
    assert bool(jnp.all(jnp.isfinite(logits_per_image)))
    print("KERNEL_OK")
</pallas_src>

<mosaic_0001>
module attributes {stable_mosaic.version = 11 : i64} {
  func.func @kernel(%arg0: i32, %arg1: i32, %arg2: memref<8x192xf32, #tpu.memory_space<vmem>>, %arg3: memref<192x64xbf16, #tpu.memory_space<vmem>>, %arg4: memref<8x64xbf16, #tpu.memory_space<vmem>>, %arg5: memref<8x192xbf16, #tpu.memory_space<vmem>>) attributes {dimension_semantics = [#tpu.dimension_semantics<parallel>, #tpu.dimension_semantics<arbitrary>], iteration_bounds = array<i64: 1, 1>, scalar_prefetch = 0 : i64, scratch_operands = 1 : i64, tpu.core_type = #tpu.core_type<tc>, window_params = [{transform_indices = @transform_0, window_bounds = array<i64: 8, 192>}, {transform_indices = @transform_1, window_bounds = array<i64: 192, 64>}, {transform_indices = @transform_2, window_bounds = array<i64: 8, 64>}]} {
    %c0_i32 = arith.constant 0 : i32
    %0 = arith.cmpi eq, %arg1, %c0_i32 : i32
    %1 = arith.extui %0 : i1 to i32
    %c0_i32_0 = arith.constant 0 : i32
    %2 = arith.cmpi ne, %1, %c0_i32_0 : i32
    scf.if %2 {
      %c0_6 = arith.constant 0 : index
      %c0_7 = arith.constant 0 : index
      %8 = vector.load %arg2[%c0_6, %c0_7] : memref<8x192xf32, #tpu.memory_space<vmem>>, vector<8x192xf32>
      %9 = arith.truncf %8 : vector<8x192xf32> to vector<8x192xbf16>
      %c0_8 = arith.constant 0 : index
      %c0_9 = arith.constant 0 : index
      %10 = vector.load %arg5[%c0_8, %c0_9] : memref<8x192xbf16, #tpu.memory_space<vmem>>, vector<8x192xbf16>
      tpu.vector_store %arg5[%c0_8, %c0_9], %9 {strides = array<i32>} : memref<8x192xbf16, #tpu.memory_space<vmem>>, vector<8x192xbf16>,
    } else {
    }
    %c0 = arith.constant 0 : index
    %c0_1 = arith.constant 0 : index
    %3 = vector.load %arg5[%c0, %c0_1] : memref<8x192xbf16, #tpu.memory_space<vmem>>, vector<8x192xbf16>
    %c0_2 = arith.constant 0 : index
    %c0_3 = arith.constant 0 : index
    %4 = vector.load %arg3[%c0_2, %c0_3] : memref<192x64xbf16, #tpu.memory_space<vmem>>, vector<192x64xbf16>
    %cst = arith.constant dense<0.000000e+00> : vector<8x64xf32>
    %5 = tpu.matmul %3, %4, %cst {dimension_numbers = #tpu.dot_dimension_numbers<[1], [0], [0], [1], [0, 0, 1, 1], [], []>} : vector<8x192xbf16>, vector<192x64xbf16>, vector<8x64xf32> -> vector<8x64xf32>
    %6 = arith.truncf %5 : vector<8x64xf32> to vector<8x64xbf16>
    %c0_4 = arith.constant 0 : index
    %c0_5 = arith.constant 0 : index
    %7 = vector.load %arg4[%c0_4, %c0_5] : memref<8x64xbf16, #tpu.memory_space<vmem>>, vector<8x64xbf16>
    tpu.vector_store %arg4[%c0_4, %c0_5], %6 {strides = array<i32>} : memref<8x64xbf16, #tpu.memory_space<vmem>>, vector<8x64xbf16>,
    return
  }
  func.func @transform_0(%arg0: i32, %arg1: i32) -> (i32, i32) {
    %c0_i32 = arith.constant 0 : i32
    %c0_i32_0 = arith.constant 0 : i32
    return %arg0, %c0_i32 : i32, i32
  }
  func.func @transform_1(%arg0: i32, %arg1: i32) -> (i32, i32) {
    %c0_i32 = arith.constant 0 : i32
    %c0_i32_0 = arith.constant 0 : i32
    return %c0_i32, %arg1 : i32, i32
  }
  func.func @transform_2(%arg0: i32, %arg1: i32) -> (i32, i32) {
    %c0_i32 = arith.constant 0 : i32
    return %arg0, %arg1 : i32, i32
  }
}

module attributes {stable_mosaic.version = 11 : i64} {
  func.func @_vision_pre_kernel(%arg0: i32, %arg1: memref<1x4x64xbf16, #tpu.memory_space<vmem>>, %arg2: memref<1x64xf32, #tpu.memory_space<vmem>>, %arg3: memref<5x64xf32, #tpu.memory_space<vmem>>, %arg4: memref<1x64xf32, #tpu.memory_space<vmem>>, %arg5: memref<1x64xf32, #tpu.memory_space<vmem>>, %arg6: memref<1x5x64xbf16, #tpu.memory_space<vmem>>) attributes {dimension_semantics = [#tpu.dimension_semantics<parallel>], iteration_bounds = array<i64: 2>, scalar_prefetch = 0 : i64, scratch_operands = 0 : i64, tpu.core_type = #tpu.core_type<tc>, window_params = [{transform_indices = @transform_0, window_bounds = array<i64: 1, 4, 64>}, {pipeline_mode = #tpu.pipeline_mode<synchronous>, transform_indices = @transform_1, window_bounds = array<i64: 1, 64>}, {pipeline_mode = #tpu.pipeline_mode<synchronous>, transform_indices = @transform_2, window_bounds = array<i64: 5, 64>}, {pipeline_mode = #tpu.pipeline_mode<synchronous>, transform_indices = @transform_3, window_bounds = array<i64: 1, 64>}, {pipeline_mode = #tpu.pipeline_mode<synchronous>, transform_indices = @transform_4, window_bounds = array<i64: 1, 64>}, {transform_indices = @transform_5, window_bounds = array<i64: 1, 5, 64>}]} {
    %c0 = arith.constant 0 : index
    %c0_0 = arith.constant 0 : index
    %c0_1 = arith.constant 0 : index
    %0 = vector.load %arg1[%c0, %c0_0, %c0_1] : memref<1x4x64xbf16, #tpu.memory_space<vmem>>, vector<1x4x64xbf16>
    %1 = vector.shape_cast %0 : vector<1x4x64xbf16> to vector<4x64xbf16>
    %2 = arith.extf %1 : vector<4x64xbf16> to vector<4x64xf32>
    %c0_2 = arith.constant 0 : index
    %c0_3 = arith.constant 0 : index
    %3 = vector.load %arg2[%c0_2, %c0_3] : memref<1x64xf32, #tpu.memory_space<vmem>>, vector<1x64xf32>
    %c0_4 = arith.constant 0 : index
    %c0_5 = arith.constant 0 : index
    %4 = vector.load %arg3[%c0_4, %c0_5] : memref<5x64xf32, #tpu.memory_space<vmem>>, vector<5x64xf32>
    %5 = tpu.concatenate %3, %2 in 0 : vector<1x64xf32>, vector<4x64xf32> -> vector<5x64xf32>
    %6 = arith.addf %5, %4 : vector<5x64xf32>
    %cst = arith.constant dense<0.000000e+00> : vector<5xf32>
    %7 = vector.multi_reduction <add>, %6, %cst [1] : vector<5x64xf32> to vector<5xf32>
    %8 = vector.shape_cast %7 : vector<5xf32> to vector<5x1xf32>
    %cst_6 = arith.constant 6.400000e+01 : f32
    %9 = vector.broadcast %cst_6 : f32 to vector<5x1xf32>
    %10 = arith.divf %8, %9 : vector<5x1xf32>
    %11 = vector.broadcast %10 : vector<5x1xf32> to vector<5x64xf32>
    %12 = arith.subf %6, %11 : vector<5x64xf32>
    %13 = vector.broadcast %10 : vector<5x1xf32> to vector<5x64xf32>
    %14 = arith.subf %6, %13 : vector<5x64xf32>
    %15 = arith.mulf %12, %14 : vector<5x64xf32>
    %cst_7 = arith.constant dense<0.000000e+00> : vector<5xf32>
    %16 = vector.multi_reduction <add>, %15, %cst_7 [1] : vector<5x64xf32> to vector<5xf32>
    %17 = vector.shape_cast %16 : vector<5xf32> to vector<5x1xf32>
    %cst_8 = arith.constant 6.400000e+01 : f32
    %18 = vector.broadcast %cst_8 : f32 to vector<5x1xf32>
    %19 = arith.divf %17, %18 : vector<5x1xf32>
    %20 = vector.broadcast %10 : vector<5x1xf32> to vector<5x64xf32>
    %21 = arith.subf %6, %20 : vector<5x64xf32>
    %cst_9 = arith.constant 9.99999974E-6 : f32
    %22 = vector.broadcast %cst_9 : f32 to vector<5x1xf32>
    %23 = arith.addf %19, %22 : vector<5x1xf32>
    %24 = math.rsqrt %23 : vector<5x1xf32>
    %25 = vector.broadcast %24 : vector<5x1xf32> to vector<5x64xf32>
    %26 = arith.mulf %21, %25 : vector<5x64xf32>
    %c0_10 = arith.constant 0 : index
    %c0_11 = arith.constant 0 : index
    %27 = vector.load %arg4[%c0_10, %c0_11] : memref<1x64xf32, #tpu.memory_space<vmem>>, vector<1x64xf32>
    %28 = vector.broadcast %27 : vector<1x64xf32> to vector<5x64xf32>
    %29 = arith.mulf %26, %28 : vector<5x64xf32>
    %c0_12 = arith.constant 0 : index
    %c0_13 = arith.constant 0 : index
    %30 = vector.load %arg5[%c0_12, %c0_13] : memref<1x64xf32, #tpu.memory_space<vmem>>, vector<1x64xf32>
    %31 = vector.broadcast %30 : vector<1x64xf32> to vector<5x64xf32>
    %32 = arith.addf %29, %31 : vector<5x64xf32>
    %33 = arith.truncf %32 : vector<5x64xf32> to vector<5x64xbf16>
    %c0_14 = arith.constant 0 : index
    %c0_15 = arith.constant 0 : index
    %c0_16 = arith.constant 0 : index
    %34 = vector.load %arg6[%c0_14, %c0_15, %c0_16] : memref<1x5x64xbf16, #tpu.memory_space<vmem>>, vector<1x5x64xbf16>
    %35 = vector.shape_cast %34 : vector<1x5x64xbf16> to vector<5x64xbf16>
    %36 = vector.shape_cast %33 : vector<5x64xbf16> to vector<1x5x64xbf16>
    tpu.vector_store %arg6[%c0_14, %c0_15, %c0_16], %36 {strides = array<i32>} : memref<1x5x64xbf16, #tpu.memory_space<vmem>>, vector<1x5x64xbf16>,
    return
  }
  func.func @transform_0(%arg0: i32) -> (i32, i32, i32) {
    %c0_i32 = arith.constant 0 : i32
    %c0_i32_0 = arith.constant 0 : i32
    %c0_i32_1 = arith.constant 0 : i32
    return %arg0, %c0_i32, %c0_i32_0 : i32, i32, i32
  }
  func.func @transform_1(%arg0: i32) -> (i32, i32) {
    %c0_i32 = arith.constant 0 : i32
    %c0_i32_0 = arith.constant 0 : i32
    %c0_i32_1 = arith.constant 0 : i32
    return %c0_i32, %c0_i32_0 : i32, i32
  }
  func.func @transform_2(%arg0: i32) -> (i32, i32) {
    %c0_i32 = arith.constant 0 : i32
    %c0_i32_0 = arith.constant 0 : i32
    %c0_i32_1 = arith.constant 0 : i32
    return %c0_i32, %c0_i32_0 : i32, i32
  }
  func.func @transform_3(%arg0: i32) -> (i32, i32) {
    %c0_i32 = arith.constant 0 : i32
    %c0_i32_0 = arith.constant 0 : i32
    %c0_i32_1 = arith.constant 0 : i32
    return %c0_i32, %c0_i32_0 : i32, i32
  }
  func.func @transform_4(%arg0: i32) -> (i32, i32) {
    %c0_i32 = arith.constant 0 : i32
    %c0_i32_0 = arith.constant 0 : i32
    %c0_i32_1 = arith.constant 0 : i32
    return %c0_i32, %c0_i32_0 : i32, i32
  }
  func.func @transform_5(%arg0: i32) -> (i32, i32, i32) {
    %c0_i32 = arith.constant 0 : i32
    %c0_i32_0 = arith.constant 0 : i32
    %c0_i32_1 = arith.constant 0 : i32
    return %arg0, %c0_i32, %c0_i32_0 : i32, i32, i32
  }
}

module attributes {stable_mosaic.version = 11 : i64} {
  func.func @kernel(%arg0: i32, %arg1: i32, %arg2: memref<16x64xbf16, #tpu.memory_space<vmem>>, %arg3: memref<1x64xf32, #tpu.memory_space<vmem>>, %arg4: memref<1x64xf32, #tpu.memory_space<vmem>>, %arg5: memref<64x192xbf16, #tpu.memory_space<vmem>>, %arg6: memref<1x192xf32, #tpu.memory_space<vmem>>, %arg7: memref<16x192xbf16, #tpu.memory_space<vmem>>, %arg8: memref<16x64xbf16, #tpu.memory_space<vmem>>) attributes {dimension_semantics = [#tpu.dimension_semantics<parallel>, #tpu.dimension_semantics<arbitrary>], iteration_bounds = array<i64: 1, 1>, scalar_prefetch = 0 : i64, scratch_operands = 1 : i64, tpu.core_type = #tpu.core_type<tc>, window_params = [{transform_indices = @transform_0, window_bounds = array<i64: 16, 64>}, {pipeline_mode = #tpu.pipeline_mode<synchronous>, transform_indices = @transform_1, window_bounds = array<i64: 1, 64>}, {pipeline_mode = #tpu.pipeline_mode<synchronous>, transform_indices = @transform_2, window_bounds = array<i64: 1, 64>}, {transform_indices = @transform_3, window_bounds = array<i64: 64, 192>}, {transform_indices = @transform_4, window_bounds = array<i64: 1, 192>}, {transform_indices = @transform_5, window_bounds = array<i64: 16, 192>}]} {
    %c0_i32 = arith.constant 0 : i32
    %0 = arith.cmpi eq, %arg1, %c0_i32 : i32
    %1 = arith.extui %0 : i1 to i32
    %c0_i32_0 = arith.constant 0 : i32
    %2 = arith.cmpi ne, %1, %c0_i32_0 : i32
    scf.if %2 {
      %c0_8 = arith.constant 0 : index
      %c0_9 = arith.constant 0 : index
      %11 = vector.load %arg2[%c0_8, %c0_9] : memref<16x64xbf16, #tpu.memory_space<vmem>>, vector<16x64xbf16>
      %12 = arith.extf %11 : vector<16x64xbf16> to vector<16x64xf32>
      %cst_10 = arith.constant dense<0.000000e+00> : vector<16xf32>
      %13 = vector.multi_reduction <add>, %12, %cst_10 [1] : vector<16x64xf32> to vector<16xf32>
      %14 = vector.shape_cast %13 : vector<16xf32> to vector<16x1xf32>
      %cst_11 = arith.constant 6.400000e+01 : f32
      %15 = vector.broadcast %cst_11 : f32 to vector<16x1xf32>
      %16 = arith.divf %14, %15 : vector<16x1xf32>
      %17 = vector.broadcast %16 : vector<16x1xf32> to vector<16x64xf32>
      %18 = arith.subf %12, %17 : vector<16x64xf32>
      %19 = vector.broadcast %16 : vector<16x1xf32> to vector<16x64xf32>
      %20 = arith.subf %12, %19 : vector<16x64xf32>
      %21 = arith.mulf %18, %20 : vector<16x64xf32>
      %cst_12 = arith.constant dense<0.000000e+00> : vector<16xf32>
      %22 = vector.multi_reduction <add>, %21, %cst_12 [1] : vector<16x64xf32> to vector<16xf32>
      %23 = vector.shape_cast %22 : vector<16xf32> to vector<16x1xf32>
      %cst_13 = arith.constant 6.400000e+01 : f32
      %24 = vector.broadcast %cst_13 : f32 to vector<16x1xf32>
      %25 = arith.divf %23, %24 : vector<16x1xf32>
      %26 = vector.broadcast %16 : vector<16x1xf32> to vector<16x64xf32>
      %27 = arith.subf %12, %26 : vector<16x64xf32>
      %cst_14 = arith.constant 9.99999974E-6 : f32
      %28 = vector.broadcast %cst_14 : f32 to vector<16x1xf32>
      %29 = arith.addf %25, %28 : vector<16x1xf32>
      %30 = math.rsqrt %29 : vector<16x1xf32>
      %31 = vector.broadcast %30 : vector<16x1xf32> to vector<16x64xf32>
      %32 = arith.mulf %27, %31 : vector<16x64xf32>
      %c0_15 = arith.constant 0 : index
      %c0_16 = arith.constant 0 : index
      %33 = vector.load %arg3[%c0_15, %c0_16] : memref<1x64xf32, #tpu.memory_space<vmem>>, vector<1x64xf32>
      %34 = vector.broadcast %33 : vector<1x64xf32> to vector<16x64xf32>
      %35 = arith.mulf %32, %34 : vector<16x64xf32>
      %c0_17 = arith.constant 0 : index
      %c0_18 = arith.constant 0 : index
      %36 = vector.load %arg4[%c0_17, %c0_18] : memref<1x64xf32, #tpu.memory_space<vmem>>, vector<1x64xf32>
      %37 = vector.broadcast %36 : vector<1x64xf32> to vector<16x64xf32>
      %38 = arith.addf %35, %37 : vector<16x64xf32>
      %39 = arith.truncf %38 : vector<16x64xf32> to vector<16x64xbf16>
      %c0_19 = arith.constant 0 : index
      %c0_20 = arith.constant 0 : index
      %40 = vector.load %arg8[%c0_19, %c0_20] : memref<16x64xbf16, #tpu.memory_space<vmem>>, vector<16x64xbf16>
      tpu.vector_store %arg8[%c0_19, %c0_20], %39 {strides = array<i32>} : memref<16x64xbf16, #tpu.memory_space<vmem>>, vector<16x64xbf16>,
    } else {
    }
    %c0 = arith.constant 0 : index
    %c0_1 = arith.constant 0 : index
    %3 = vector.load %arg8[%c0, %c0_1] : memref<16x64xbf16, #tpu.memory_space<vmem>>, vector<16x64xbf16>
    %c0_2 = arith.constant 0 : index
    %c0_3 = arith.constant 0 : index
    %4 = vector.load %arg5[%c0_2, %c0_3] : memref<64x192xbf16, #tpu.memory_space<vmem>>, vector<64x192xbf16>
    %cst = arith.constant dense<0.000000e+00> : vector<16x192xf32>
    %5 = tpu.matmul %3, %4, %cst {dimension_numbers = #tpu.dot_dimension_numbers<[1], [0], [0], [1], [0, 0, 1, 1], [], []>} : vector<16x64xbf16>, vector<64x192xbf16>, vector<16x192xf32> -> vector<16x192xf32>
    %c0_4 = arith.constant 0 : index
    %c0_5 = arith.constant 0 : index
    %6 = vector.load %arg6[%c0_4, %c0_5] : memref<1x192xf32, #tpu.memory_space<vmem>>, vector<1x192xf32>
    %7 = vector.broadcast %6 : vector<1x192xf32> to vector<16x192xf32>
    %8 = arith.addf %5, %7 : vector<16x192xf32>
    %9 = arith.truncf %8 : vector<16x192xf32> to vector<16x192xbf16>
    %c0_6 = arith.constant 0 : index
    %c0_7 = arith.constant 0 : index
    %10 = vector.load %arg7[%c0_6, %c0_7] : memref<16x192xbf16, #tpu.memory_space<vmem>>, vector<16x192xbf16>
    tpu.vector_store %arg7[%c0_6, %c0_7], %9 {strides = array<i32>} : memref<16x192xbf16, #tpu.memory_space<vmem>>, vector<16x192xbf16>,
    return
  }
  func.func @transform_0(%arg0: i32, %arg1: i32) -> (i32, i32) {
    %c0_i32 = arith.constant 0 : i32
    %c0_i32_0 = arith.constant 0 : i32
    return %arg0, %c0_i32 : i32, i32
  }
  func.func @transform_1(%arg0: i32, %arg1: i32) -> (i32, i32) {
    %c0_i32 = arith.constant 0 : i32
    %c0_i32_0 = arith.constant 0 : i32
    %c0_i32_1 = arith.constant 0 : i32
    return %c0_i32, %c0_i32_0 : i32, i32
  }
  func.func @transform_2(%arg0: i32, %arg1: i32) -> (i32, i32) {
    %c0_i32 = arith.constant 0 : i32
    %c0_i32_0 = arith.constant 0 : i32
    %c0_i32_1 = arith.constant 0 : i32
    return %c0_i32, %c0_i32_0 : i32, i32
  }
  func.func @transform_3(%arg0: i32, %arg1: i32) -> (i32, i32) {
    %c0_i32 = arith.constant 0 : i32
    %c0_i32_0 = arith.constant 0 : i32
    return %c0_i32, %arg1 : i32, i32
  }
  func.func @transform_4(%arg0: i32, %arg1: i32) -> (i32, i32) {
    %c0_i32 = arith.constant 0 : i32
    %c0_i32_0 = arith.constant 0 : i32
    return %c0_i32, %arg1 : i32, i32
  }
  func.func @transform_5(%arg0: i32, %arg1: i32) -> (i32, i32) {
    %c0_i32 = arith.constant 0 : i32
    return %arg0, %arg1 : i32, i32
  }
}

module attributes {stable_mosaic.version = 11 : i64} {
  func.func @kernel(%arg0: i32, %arg1: memref<1x5x192xbf16, #tpu.memory_space<vmem>>, %arg2: memref<1x5x64xbf16, #tpu.memory_space<vmem>>) attributes {dimension_semantics = [#tpu.dimension_semantics<parallel>], iteration_bounds = array<i64: 2>, scalar_prefetch = 0 : i64, scratch_operands = 0 : i64, tpu.core_type = #tpu.core_type<tc>, window_params = [{transform_indices = @transform_0, window_bounds = array<i64: 1, 5, 192>}, {transform_indices = @transform_1, window_bounds = array<i64: 1, 5, 64>}]} {
    %c0 = arith.constant 0 : index
    %c0_0 = arith.constant 0 : index
    %c0_1 = arith.constant 0 : index
    %0 = vector.load %arg1[%c0, %c0_0, %c0_1] : memref<1x5x192xbf16, #tpu.memory_space<vmem>>, vector<1x5x192xbf16>
    %1 = vector.shape_cast %0 : vector<1x5x192xbf16> to vector<5x192xbf16>
    %2 = vector.extract_strided_slice %1 {offsets = [0, 0], sizes = [5, 64], strides = [1, 1]} : vector<5x192xbf16> to vector<5x64xbf16>
    %3 = vector.extract_strided_slice %1 {offsets = [0, 64], sizes = [5, 64], strides = [1, 1]} : vector<5x192xbf16> to vector<5x64xbf16>
    %4 = vector.extract_strided_slice %1 {offsets = [0, 128], sizes = [5, 64], strides = [1, 1]} : vector<5x192xbf16> to vector<5x64xbf16>
    %cst = arith.constant dense<0.000000e+00> : vector<5x5xf32>
    %5 = tpu.matmul %2, %3, %cst {dimension_numbers = #tpu.dot_dimension_numbers<[1], [1], [0], [0], [0, 0, 1, 0], [], []>} : vector<5x64xbf16>, vector<5x64xbf16>, vector<5x5xf32> -> vector<5x5xf32>
    %cst_2 = arith.constant dense<0xFF800000> : vector<5xf32>
    %6 = vector.multi_reduction <maximumf>, %5, %cst_2 [1] : vector<5x5xf32> to vector<5xf32>
    %7 = vector.shape_cast %6 : vector<5xf32> to vector<5x1xf32>
    %8 = vector.broadcast %7 : vector<5x1xf32> to vector<5x5xf32>
    %9 = arith.subf %5, %8 : vector<5x5xf32>
    %10 = math.exp %9 : vector<5x5xf32>
    %cst_3 = arith.constant dense<0.000000e+00> : vector<5xf32>
    %11 = vector.multi_reduction <add>, %10, %cst_3 [1] : vector<5x5xf32> to vector<5xf32>
    %12 = vector.shape_cast %11 : vector<5xf32> to vector<5x1xf32>
    %13 = tpu.reciprocal %12 {approx = true} : vector<5x1xf32> -> vector<5x1xf32>
    %14 = vector.broadcast %13 : vector<5x1xf32> to vector<5x5xf32>
    %15 = arith.mulf %10, %14 : vector<5x5xf32>
    %16 = arith.truncf %15 : vector<5x5xf32> to vector<5x5xbf16>
    %cst_4 = arith.constant dense<0.000000e+00> : vector<5x64xf32>
    %17 = tpu.matmul %16, %4, %cst_4 {dimension_numbers = #tpu.dot_dimension_numbers<[1], [0], [0], [1], [0, 0, 1, 1], [], []>} : vector<5x5xbf16>, vector<5x64xbf16>, vector<5x64xf32> -> vector<5x64xf32>
    %18 = arith.truncf %17 : vector<5x64xf32> to vector<5x64xbf16>
    %c0_5 = arith.constant 0 : index
    %c0_6 = arith.constant 0 : index
    %c0_7 = arith.constant 0 : index
    %19 = vector.load %arg2[%c0_5, %c0_6, %c0_7] : memref<1x5x64xbf16, #tpu.memory_space<vmem>>, vector<1x5x64xbf16>
    %20 = vector.shape_cast %19 : vector<1x5x64xbf16> to vector<5x64xbf16>
    %21 = vector.shape_cast %18 : vector<5x64xbf16> to vector<1x5x64xbf16>
    tpu.vector_store %arg2[%c0_5, %c0_6, %c0_7], %21 {strides = array<i32>} : memref<1x5x64xbf16, #tpu.memory_space<vmem>>, vector<1x5x64xbf16>,
    return
  }
  func.func @transform_0(%arg0: i32) -> (i32, i32, i32) {
    %c0_i32 = arith.constant 0 : i32
    %c0_i32_0 = arith.constant 0 : i32
    %c0_i32_1 = arith.constant 0 : i32
    return %arg0, %c0_i32, %c0_i32_0 : i32, i32, i32
  }
  func.func @transform_1(%arg0: i32) -> (i32, i32, i32) {
    %c0_i32 = arith.constant 0 : i32
    %c0_i32_0 = arith.constant 0 : i32
    %c0_i32_1 = arith.constant 0 : i32
    return %arg0, %c0_i32, %c0_i32_0 : i32, i32, i32
  }
}

module attributes {stable_mosaic.version = 11 : i64} {
  func.func @kernel(%arg0: i32, %arg1: i32, %arg2: memref<16x64xbf16, #tpu.memory_space<vmem>>, %arg3: memref<64x64xbf16, #tpu.memory_space<vmem>>, %arg4: memref<1x64xf32, #tpu.memory_space<vmem>>, %arg5: memref<16x64xbf16, #tpu.memory_space<vmem>>, %arg6: memref<16x64xbf16, #tpu.memory_space<vmem>>, %arg7: memref<16x64xbf16, #tpu.memory_space<vmem>>) attributes {dimension_semantics = [#tpu.dimension_semantics<parallel>, #tpu.dimension_semantics<arbitrary>], iteration_bounds = array<i64: 1, 1>, scalar_prefetch = 0 : i64, scratch_operands = 1 : i64, tpu.core_type = #tpu.core_type<tc>, window_params = [{transform_indices = @transform_0, window_bounds = array<i64: 16, 64>}, {transform_indices = @transform_1, window_bounds = array<i64: 64, 64>}, {transform_indices = @transform_2, window_bounds = array<i64: 1, 64>}, {transform_indices = @transform_3, window_bounds = array<i64: 16, 64>}, {transform_indices = @transform_4, window_bounds = array<i64: 16, 64>}]} {
    %c0_i32 = arith.constant 0 : i32
    %0 = arith.cmpi eq, %arg1, %c0_i32 : i32
    %1 = arith.extui %0 : i1 to i32
    %c0_i32_0 = arith.constant 0 : i32
    %2 = arith.cmpi ne, %1, %c0_i32_0 : i32
    scf.if %2 {
      %c0_10 = arith.constant 0 : index
      %c0_11 = arith.constant 0 : index
      %14 = vector.load %arg2[%c0_10, %c0_11] : memref<16x64xbf16, #tpu.memory_space<vmem>>, vector<16x64xbf16>
      %c0_12 = arith.constant 0 : index
      %c0_13 = arith.constant 0 : index
      %15 = vector.load %arg7[%c0_12, %c0_13] : memref<16x64xbf16, #tpu.memory_space<vmem>>, vector<16x64xbf16>
      tpu.vector_store %arg7[%c0_12, %c0_13], %14 {strides = array<i32>} : memref<16x64xbf16, #tpu.memory_space<vmem>>, vector<16x64xbf16>,
    } else {
    }
    %c0 = arith.constant 0 : index
    %c0_1 = arith.constant 0 : index
    %3 = vector.load %arg7[%c0, %c0_1] : memref<16x64xbf16, #tpu.memory_space<vmem>>, vector<16x64xbf16>
    %c0_2 = arith.constant 0 : index
    %c0_3 = arith.constant 0 : index
    %4 = vector.load %arg3[%c0_2, %c0_3] : memref<64x64xbf16, #tpu.memory_space<vmem>>, vector<64x64xbf16>
    %cst = arith.constant dense<0.000000e+00> : vector<16x64xf32>
    %5 = tpu.matmul %3, %4, %cst {dimension_numbers = #tpu.dot_dimension_numbers<[1], [0], [0], [1], [0, 0, 1, 1], [], []>} : vector<16x64xbf16>, vector<64x64xbf16>, vector<16x64xf32> -> vector<16x64xf32>
    %c0_4 = arith.constant 0 : index
    %c0_5 = arith.constant 0 : index
    %6 = vector.load %arg4[%c0_4, %c0_5] : memref<1x64xf32, #tpu.memory_space<vmem>>, vector<1x64xf32>
    %7 = vector.broadcast %6 : vector<1x64xf32> to vector<16x64xf32>
    %8 = arith.addf %5, %7 : vector<16x64xf32>
    %c0_6 = arith.constant 0 : index
    %c0_7 = arith.constant 0 : index
    %9 = vector.load %arg5[%c0_6, %c0_7] : memref<16x64xbf16, #tpu.memory_space<vmem>>, vector<16x64xbf16>
    %10 = arith.extf %9 : vector<16x64xbf16> to vector<16x64xf32>
    %11 = arith.addf %8, %10 : vector<16x64xf32>
    %12 = arith.truncf %11 : vector<16x64xf32> to vector<16x64xbf16>
    %c0_8 = arith.constant 0 : index
    %c0_9 = arith.constant 0 : index
    %13 = vector.load %arg6[%c0_8, %c0_9] : memref<16x64xbf16, #tpu.memory_space<vmem>>, vector<16x64xbf16>
    tpu.vector_store %arg6[%c0_8, %c0_9], %12 {strides = array<i32>} : memref<16x64xbf16, #tpu.memory_space<vmem>>, vector<16x64xbf16>,
    return
  }
  func.func @transform_0(%arg0: i32, %arg1: i32) -> (i32, i32) {
    %c0_i32 = arith.constant 0 : i32
    %c0_i32_0 = arith.constant 0 : i32
    return %arg0, %c0_i32 : i32, i32
  }
  func.func @transform_1(%arg0: i32, %arg1: i32) -> (i32, i32) {
    %c0_i32 = arith.constant 0 : i32
    %c0_i32_0 = arith.constant 0 : i32
    return %c0_i32, %arg1 : i32, i32
  }
  func.func @transform_2(%arg0: i32, %arg1: i32) -> (i32, i32) {
    %c0_i32 = arith.constant 0 : i32
    %c0_i32_0 = arith.constant 0 : i32
    return %c0_i32, %arg1 : i32, i32
  }
  func.func @transform_3(%arg0: i32, %arg1: i32) -> (i32, i32) {
    %c0_i32 = arith.constant 0 : i32
    return %arg0, %arg1 : i32, i32
  }
  func.func @transform_4(%arg0: i32, %arg1: i32) -> (i32, i32) {
    %c0_i32 = arith.constant 0 : i32
    return %arg0, %arg1 : i32, i32
  }
}

module attributes {stable_mosaic.version = 11 : i64} {
  func.func @kernel(%arg0: i32, %arg1: i32, %arg2: memref<16x64xbf16, #tpu.memory_space<vmem>>, %arg3: memref<1x64xf32, #tpu.memory_space<vmem>>, %arg4: memref<1x64xf32, #tpu.memory_space<vmem>>, %arg5: memref<64x256xbf16, #tpu.memory_space<vmem>>, %arg6: memref<1x256xf32, #tpu.memory_space<vmem>>, %arg7: memref<16x256xbf16, #tpu.memory_space<vmem>>, %arg8: memref<16x64xbf16, #tpu.memory_space<vmem>>) attributes {dimension_semantics = [#tpu.dimension_semantics<parallel>, #tpu.dimension_semantics<arbitrary>], iteration_bounds = array<i64: 1, 1>, scalar_prefetch = 0 : i64, scratch_operands = 1 : i64, tpu.core_type = #tpu.core_type<tc>, window_params = [{transform_indices = @transform_0, window_bounds = array<i64: 16, 64>}, {pipeline_mode = #tpu.pipeline_mode<synchronous>, transform_indices = @transform_1, window_bounds = array<i64: 1, 64>}, {pipeline_mode = #tpu.pipeline_mode<synchronous>, transform_indices = @transform_2, window_bounds = array<i64: 1, 64>}, {transform_indices = @transform_3, window_bounds = array<i64: 64, 256>}, {transform_indices = @transform_4, window_bounds = array<i64: 1, 256>}, {transform_indices = @transform_5, window_bounds = array<i64: 16, 256>}]} {
    %c0_i32 = arith.constant 0 : i32
    %0 = arith.cmpi eq, %arg1, %c0_i32 : i32
    %1 = arith.extui %0 : i1 to i32
    %c0_i32_0 = arith.constant 0 : i32
    %2 = arith.cmpi ne, %1, %c0_i32_0 : i32
    scf.if %2 {
      %c0_10 = arith.constant 0 : index
      %c0_11 = arith.constant 0 : index
      %19 = vector.load %arg2[%c0_10, %c0_11] : memref<16x64xbf16, #tpu.memory_space<vmem>>, vector<16x64xbf16>
      %20 = arith.extf %19 : vector<16x64xbf16> to vector<16x64xf32>
      %cst_12 = arith.constant dense<0.000000e+00> : vector<16xf32>
      %21 = vector.multi_reduction <add>, %20, %cst_12 [1] : vector<16x64xf32> to vector<16xf32>
      %22 = vector.shape_cast %21 : vector<16xf32> to vector<16x1xf32>
      %cst_13 = arith.constant 6.400000e+01 : f32
      %23 = vector.broadcast %cst_13 : f32 to vector<16x1xf32>
      %24 = arith.divf %22, %23 : vector<16x1xf32>
      %25 = vector.broadcast %24 : vector<16x1xf32> to vector<16x64xf32>
      %26 = arith.subf %20, %25 : vector<16x64xf32>
      %27 = vector.broadcast %24 : vector<16x1xf32> to vector<16x64xf32>
      %28 = arith.subf %20, %27 : vector<16x64xf32>
      %29 = arith.mulf %26, %28 : vector<16x64xf32>
      %cst_14 = arith.constant dense<0.000000e+00> : vector<16xf32>
      %30 = vector.multi_reduction <add>, %29, %cst_14 [1] : vector<16x64xf32> to vector<16xf32>
      %31 = vector.shape_cast %30 : vector<16xf32> to vector<16x1xf32>
      %cst_15 = arith.constant 6.400000e+01 : f32
      %32 = vector.broadcast %cst_15 : f32 to vector<16x1xf32>
      %33 = arith.divf %31, %32 : vector<16x1xf32>
      %34 = vector.broadcast %24 : vector<16x1xf32> to vector<16x64xf32>
      %35 = arith.subf %20, %34 : vector<16x64xf32>
      %cst_16 = arith.constant 9.99999974E-6 : f32
      %36 = vector.broadcast %cst_16 : f32 to vector<16x1xf32>
      %37 = arith.addf %33, %36 : vector<16x1xf32>
      %38 = math.rsqrt %37 : vector<16x1xf32>
      %39 = vector.broadcast %38 : vector<16x1xf32> to vector<16x64xf32>
      %40 = arith.mulf %35, %39 : vector<16x64xf32>
      %c0_17 = arith.constant 0 : index
      %c0_18 = arith.constant 0 : index
      %41 = vector.load %arg3[%c0_17, %c0_18] : memref<1x64xf32, #tpu.memory_space<vmem>>, vector<1x64xf32>
      %42 = vector.broadcast %41 : vector<1x64xf32> to vector<16x64xf32>
      %43 = arith.mulf %40, %42 : vector<16x64xf32>
      %c0_19 = arith.constant 0 : index
      %c0_20 = arith.constant 0 : index
      %44 = vector.load %arg4[%c0_19, %c0_20] : memref<1x64xf32, #tpu.memory_space<vmem>>, vector<1x64xf32>
      %45 = vector.broadcast %44 : vector<1x64xf32> to vector<16x64xf32>
      %46 = arith.addf %43, %45 : vector<16x64xf32>
      %47 = arith.truncf %46 : vector<16x64xf32> to vector<16x64xbf16>
      %c0_21 = arith.constant 0 : index
      %c0_22 = arith.constant 0 : index
      %48 = vector.load %arg8[%c0_21, %c0_22] : memref<16x64xbf16, #tpu.memory_space<vmem>>, vector<16x64xbf16>
      tpu.vector_store %arg8[%c0_21, %c0_22], %47 {strides = array<i32>} : memref<16x64xbf16, #tpu.memory_space<vmem>>, vector<16x64xbf16>,
    } else {
    }
    %c0 = arith.constant 0 : index
    %c0_1 = arith.constant 0 : index
    %3 = vector.load %arg8[%c0, %c0_1] : memref<16x64xbf16, #tpu.memory_space<vmem>>, vector<16x64xbf16>
    %c0_2 = arith.constant 0 : index
    %c0_3 = arith.constant 0 : index
    %4 = vector.load %arg5[%c0_2, %c0_3] : memref<64x256xbf16, #tpu.memory_space<vmem>>, vector<64x256xbf16>
    %cst = arith.constant dense<0.000000e+00> : vector<16x256xf32>
    %5 = tpu.matmul %3, %4, %cst {dimension_numbers = #tpu.dot_dimension_numbers<[1], [0], [0], [1], [0, 0, 1, 1], [], []>} : vector<16x64xbf16>, vector<64x256xbf16>, vector<16x256xf32> -> vector<16x256xf32>
    %c0_4 = arith.constant 0 : index
    %c0_5 = arith.constant 0 : index
    %6 = vector.load %arg6[%c0_4, %c0_5] : memref<1x256xf32, #tpu.memory_space<vmem>>, vector<1x256xf32>
    %7 = vector.broadcast %6 : vector<1x256xf32> to vector<16x256xf32>
    %8 = arith.addf %5, %7 : vector<16x256xf32>
    %cst_6 = arith.constant 1.702000e+00 : f32
    %9 = vector.broadcast %cst_6 : f32 to vector<16x256xf32>
    %10 = arith.mulf %9, %8 : vector<16x256xf32>
    %11 = arith.negf %10 : vector<16x256xf32>
    %12 = math.exp %11 : vector<16x256xf32>
    %cst_7 = arith.constant 1.000000e+00 : f32
    %13 = vector.broadcast %cst_7 : f32 to vector<16x256xf32>
    %14 = arith.addf %13, %12 : vector<16x256xf32>
    %15 = arith.divf %13, %14 : vector<16x256xf32>
    %16 = arith.mulf %8, %15 : vector<16x256xf32>
    %17 = arith.truncf %16 : vector<16x256xf32> to vector<16x256xbf16>
    %c0_8 = arith.constant 0 : index
    %c0_9 = arith.constant 0 : index
    %18 = vector.load %arg7[%c0_8, %c0_9] : memref<16x256xbf16, #tpu.memory_space<vmem>>, vector<16x256xbf16>
    tpu.vector_store %arg7[%c0_8, %c0_9], %17 {strides = array<i32>} : memref<16x256xbf16, #tpu.memory_space<vmem>>, vector<16x256xbf16>,
    return
  }
  func.func @transform_0(%arg0: i32, %arg1: i32) -> (i32, i32) {
    %c0_i32 = arith.constant 0 : i32
    %c0_i32_0 = arith.constant 0 : i32
    return %arg0, %c0_i32 : i32, i32
  }
  func.func @transform_1(%arg0: i32, %arg1: i32) -> (i32, i32) {
    %c0_i32 = arith.constant 0 : i32
    %c0_i32_0 = arith.constant 0 : i32
    %c0_i32_1 = arith.constant 0 : i32
    return %c0_i32, %c0_i32_0 : i32, i32
  }
  func.func @transform_2(%arg0: i32, %arg1: i32) -> (i32, i32) {
    %c0_i32 = arith.constant 0 : i32
    %c0_i32_0 = arith.constant 0 : i32
    %c0_i32_1 = arith.constant 0 : i32
    return %c0_i32, %c0_i32_0 : i32, i32
  }
  func.func @transform_3(%arg0: i32, %arg1: i32) -> (i32, i32) {
    %c0_i32 = arith.constant 0 : i32
    %c0_i32_0 = arith.constant 0 : i32
    return %c0_i32, %arg1 : i32, i32
  }
  func.func @transform_4(%arg0: i32, %arg1: i32) -> (i32, i32) {
    %c0_i32 = arith.constant 0 : i32
    %c0_i32_0 = arith.constant 0 : i32
    return %c0_i32, %arg1 : i32, i32
  }
  func.func @transform_5(%arg0: i32, %arg1: i32) -> (i32, i32) {
    %c0_i32 = arith.constant 0 : i32
    return %arg0, %arg1 : i32, i32
  }
}

module attributes {stable_mosaic.version = 11 : i64} {
  func.func @kernel(%arg0: i32, %arg1: i32, %arg2: memref<16x256xbf16, #tpu.memory_space<vmem>>, %arg3: memref<256x64xbf16, #tpu.memory_space<vmem>>, %arg4: memref<1x64xf32, #tpu.memory_space<vmem>>, %arg5: memref<16x64xbf16, #tpu.memory_space<vmem>>, %arg6: memref<16x64xbf16, #tpu.memory_space<vmem>>, %arg7: memref<16x256xbf16, #tpu.memory_space<vmem>>) attributes {dimension_semantics = [#tpu.dimension_semantics<parallel>, #tpu.dimension_semantics<arbitrary>], iteration_bounds = array<i64: 1, 1>, scalar_prefetch = 0 : i64, scratch_operands = 1 : i64, tpu.core_type = #tpu.core_type<tc>, window_params = [{transform_indices = @transform_0, window_bounds = array<i64: 16, 256>}, {transform_indices = @transform_1, window_bounds = array<i64: 256, 64>}, {transform_indices = @transform_2, window_bounds = array<i64: 1, 64>}, {transform_indices = @transform_3, window_bounds = array<i64: 16, 64>}, {transform_indices = @transform_4, window_bounds = array<i64: 16, 64>}]} {
    %c0_i32 = arith.constant 0 : i32
    %0 = arith.cmpi eq, %arg1, %c0_i32 : i32
    %1 = arith.extui %0 : i1 to i32
    %c0_i32_0 = arith.constant 0 : i32
    %2 = arith.cmpi ne, %1, %c0_i32_0 : i32
    scf.if %2 {
      %c0_10 = arith.constant 0 : index
      %c0_11 = arith.constant 0 : index
      %14 = vector.load %arg2[%c0_10, %c0_11] : memref<16x256xbf16, #tpu.memory_space<vmem>>, vector<16x256xbf16>
      %c0_12 = arith.constant 0 : index
      %c0_13 = arith.constant 0 : index
      %15 = vector.load %arg7[%c0_12, %c0_13] : memref<16x256xbf16, #tpu.memory_space<vmem>>, vector<16x256xbf16>
      tpu.vector_store %arg7[%c0_12, %c0_13], %14 {strides = array<i32>} : memref<16x256xbf16, #tpu.memory_space<vmem>>, vector<16x256xbf16>,
    } else {
    }
    %c0 = arith.constant 0 : index
    %c0_1 = arith.constant 0 : index
    %3 = vector.load %arg7[%c0, %c0_1] : memref<16x256xbf16, #tpu.memory_space<vmem>>, vector<16x256xbf16>
    %c0_2 = arith.constant 0 : index
    %c0_3 = arith.constant 0 : index
    %4 = vector.load %arg3[%c0_2, %c0_3] : memref<256x64xbf16, #tpu.memory_space<vmem>>, vector<256x64xbf16>
    %cst = arith.constant dense<0.000000e+00> : vector<16x64xf32>
    %5 = tpu.matmul %3, %4, %cst {dimension_numbers = #tpu.dot_dimension_numbers<[1], [0], [0], [1], [0, 0, 1, 1], [], []>} : vector<16x256xbf16>, vector<256x64xbf16>, vector<16x64xf32> -> vector<16x64xf32>
    %c0_4 = arith.constant 0 : index
    %c0_5 = arith.constant 0 : index
    %6 = vector.load %arg4[%c0_4, %c0_5] : memref<1x64xf32, #tpu.memory_space<vmem>>, vector<1x64xf32>
    %7 = vector.broadcast %6 : vector<1x64xf32> to vector<16x64xf32>
    %8 = arith.addf %5, %7 : vector<16x64xf32>
    %c0_6 = arith.constant 0 : index
    %c0_7 = arith.constant 0 : index
    %9 = vector.load %arg5[%c0_6, %c0_7] : memref<16x64xbf16, #tpu.memory_space<vmem>>, vector<16x64xbf16>
    %10 = arith.extf %9 : vector<16x64xbf16> to vector<16x64xf32>
    %11 = arith.addf %8, %10 : vector<16x64xf32>
    %12 = arith.truncf %11 : vector<16x64xf32> to vector<16x64xbf16>
    %c0_8 = arith.constant 0 : index
    %c0_9 = arith.constant 0 : index
    %13 = vector.load %arg6[%c0_8, %c0_9] : memref<16x64xbf16, #tpu.memory_space<vmem>>, vector<16x64xbf16>
    tpu.vector_store %arg6[%c0_8, %c0_9], %12 {strides = array<i32>} : memref<16x64xbf16, #tpu.memory_space<vmem>>, vector<16x64xbf16>,
    return
  }
  func.func @transform_0(%arg0: i32, %arg1: i32) -> (i32, i32) {
    %c0_i32 = arith.constant 0 : i32
    %c0_i32_0 = arith.constant 0 : i32
    return %arg0, %c0_i32 : i32, i32
  }
  func.func @transform_1(%arg0: i32, %arg1: i32) -> (i32, i32) {
    %c0_i32 = arith.constant 0 : i32
    %c0_i32_0 = arith.constant 0 : i32
    return %c0_i32, %arg1 : i32, i32
  }
  func.func @transform_2(%arg0: i32, %arg1: i32) -> (i32, i32) {
    %c0_i32 = arith.constant 0 : i32
    %c0_i32_0 = arith.constant 0 : i32
    return %c0_i32, %arg1 : i32, i32
  }
  func.func @transform_3(%arg0: i32, %arg1: i32) -> (i32, i32) {
    %c0_i32 = arith.constant 0 : i32
    return %arg0, %arg1 : i32, i32
  }
  func.func @transform_4(%arg0: i32, %arg1: i32) -> (i32, i32) {
    %c0_i32 = arith.constant 0 : i32
    return %arg0, %arg1 : i32, i32
  }
}

module attributes {stable_mosaic.version = 11 : i64} {
  func.func @kernel(%arg0: i32, %arg1: i32, %arg2: memref<8x64xbf16, #tpu.memory_space<vmem>>, %arg3: memref<1x64xf32, #tpu.memory_space<vmem>>, %arg4: memref<1x64xf32, #tpu.memory_space<vmem>>, %arg5: memref<64x32xbf16, #tpu.memory_space<vmem>>, %arg6: memref<8x32xf32, #tpu.memory_space<vmem>>, %arg7: memref<8x64xbf16, #tpu.memory_space<vmem>>) attributes {dimension_semantics = [#tpu.dimension_semantics<parallel>, #tpu.dimension_semantics<arbitrary>], iteration_bounds = array<i64: 1, 1>, scalar_prefetch = 0 : i64, scratch_operands = 1 : i64, tpu.core_type = #tpu.core_type<tc>, window_params = [{transform_indices = @transform_0, window_bounds = array<i64: 8, 64>}, {pipeline_mode = #tpu.pipeline_mode<synchronous>, transform_indices = @transform_1, window_bounds = array<i64: 1, 64>}, {pipeline_mode = #tpu.pipeline_mode<synchronous>, transform_indices = @transform_2, window_bounds = array<i64: 1, 64>}, {transform_indices = @transform_3, window_bounds = array<i64: 64, 32>}, {transform_indices = @transform_4, window_bounds = array<i64: 8, 32>}]} {
    %c0_i32 = arith.constant 0 : i32
    %0 = arith.cmpi eq, %arg1, %c0_i32 : i32
    %1 = arith.extui %0 : i1 to i32
    %c0_i32_0 = arith.constant 0 : i32
    %2 = arith.cmpi ne, %1, %c0_i32_0 : i32
    scf.if %2 {
      %c0_6 = arith.constant 0 : index
      %c0_7 = arith.constant 0 : index
      %7 = vector.load %arg2[%c0_6, %c0_7] : memref<8x64xbf16, #tpu.memory_space<vmem>>, vector<8x64xbf16>
      %8 = arith.extf %7 : vector<8x64xbf16> to vector<8x64xf32>
      %cst_8 = arith.constant dense<0.000000e+00> : vector<8xf32>
      %9 = vector.multi_reduction <add>, %8, %cst_8 [1] : vector<8x64xf32> to vector<8xf32>
      %10 = vector.shape_cast %9 : vector<8xf32> to vector<8x1xf32>
      %cst_9 = arith.constant 6.400000e+01 : f32
      %11 = vector.broadcast %cst_9 : f32 to vector<8x1xf32>
      %12 = arith.divf %10, %11 : vector<8x1xf32>
      %13 = vector.broadcast %12 : vector<8x1xf32> to vector<8x64xf32>
      %14 = arith.subf %8, %13 : vector<8x64xf32>
      %15 = vector.broadcast %12 : vector<8x1xf32> to vector<8x64xf32>
      %16 = arith.subf %8, %15 : vector<8x64xf32>
      %17 = arith.mulf %14, %16 : vector<8x64xf32>
      %cst_10 = arith.constant dense<0.000000e+00> : vector<8xf32>
      %18 = vector.multi_reduction <add>, %17, %cst_10 [1] : vector<8x64xf32> to vector<8xf32>
      %19 = vector.shape_cast %18 : vector<8xf32> to vector<8x1xf32>
      %cst_11 = arith.constant 6.400000e+01 : f32
      %20 = vector.broadcast %cst_11 : f32 to vector<8x1xf32>
      %21 = arith.divf %19, %20 : vector<8x1xf32>
      %22 = vector.broadcast %12 : vector<8x1xf32> to vector<8x64xf32>
      %23 = arith.subf %8, %22 : vector<8x64xf32>
      %cst_12 = arith.constant 9.99999974E-6 : f32
      %24 = vector.broadcast %cst_12 : f32 to vector<8x1xf32>
      %25 = arith.addf %21, %24 : vector<8x1xf32>
      %26 = math.rsqrt %25 : vector<8x1xf32>
      %27 = vector.broadcast %26 : vector<8x1xf32> to vector<8x64xf32>
      %28 = arith.mulf %23, %27 : vector<8x64xf32>
      %c0_13 = arith.constant 0 : index
      %c0_14 = arith.constant 0 : index
      %29 = vector.load %arg3[%c0_13, %c0_14] : memref<1x64xf32, #tpu.memory_space<vmem>>, vector<1x64xf32>
      %30 = vector.broadcast %29 : vector<1x64xf32> to vector<8x64xf32>
      %31 = arith.mulf %28, %30 : vector<8x64xf32>
      %c0_15 = arith.constant 0 : index
      %c0_16 = arith.constant 0 : index
      %32 = vector.load %arg4[%c0_15, %c0_16] : memref<1x64xf32, #tpu.memory_space<vmem>>, vector<1x64xf32>
      %33 = vector.broadcast %32 : vector<1x64xf32> to vector<8x64xf32>
      %34 = arith.addf %31, %33 : vector<8x64xf32>
      %35 = arith.truncf %34 : vector<8x64xf32> to vector<8x64xbf16>
      %c0_17 = arith.constant 0 : index
      %c0_18 = arith.constant 0 : index
      %36 = vector.load %arg7[%c0_17, %c0_18] : memref<8x64xbf16, #tpu.memory_space<vmem>>, vector<8x64xbf16>
      tpu.vector_store %arg7[%c0_17, %c0_18], %35 {strides = array<i32>} : memref<8x64xbf16, #tpu.memory_space<vmem>>, vector<8x64xbf16>,
    } else {
    }
    %c0 = arith.constant 0 : index
    %c0_1 = arith.constant 0 : index
    %3 = vector.load %arg7[%c0, %c0_1] : memref<8x64xbf16, #tpu.memory_space<vmem>>, vector<8x64xbf16>
    %c0_2 = arith.constant 0 : index
    %c0_3 = arith.constant 0 : index
    %4 = vector.load %arg5[%c0_2, %c0_3] : memref<64x32xbf16, #tpu.memory_space<vmem>>, vector<64x32xbf16>
    %cst = arith.constant dense<0.000000e+00> : vector<8x32xf32>
    %5 = tpu.matmul %3, %4, %cst {dimension_numbers = #tpu.dot_dimension_numbers<[1], [0], [0], [1], [0, 0, 1, 1], [], []>} : vector<8x64xbf16>, vector<64x32xbf16>, vector<8x32xf32> -> vector<8x32xf32>
    %c0_4 = arith.constant 0 : index
    %c0_5 = arith.constant 0 : index
    %6 = vector.load %arg6[%c0_4, %c0_5] : memref<8x32xf32, #tpu.memory_space<vmem>>, vector<8x32xf32>
    tpu.vector_store %arg6[%c0_4, %c0_5], %5 {strides = array<i32>} : memref<8x32xf32, #tpu.memory_space<vmem>>, vector<8x32xf32>,
    return
  }
  func.func @transform_0(%arg0: i32, %arg1: i32) -> (i32, i32) {
    %c0_i32 = arith.constant 0 : i32
    %c0_i32_0 = arith.constant 0 : i32
    return %arg0, %c0_i32 : i32, i32
  }
  func.func @transform_1(%arg0: i32, %arg1: i32) -> (i32, i32) {
    %c0_i32 = arith.constant 0 : i32
    %c0_i32_0 = arith.constant 0 : i32
    %c0_i32_1 = arith.constant 0 : i32
    return %c0_i32, %c0_i32_0 : i32, i32
  }
  func.func @transform_2(%arg0: i32, %arg1: i32) -> (i32, i32) {
    %c0_i32 = arith.constant 0 : i32
    %c0_i32_0 = arith.constant 0 : i32
    %c0_i32_1 = arith.constant 0 : i32
    return %c0_i32, %c0_i32_0 : i32, i32
  }
  func.func @transform_3(%arg0: i32, %arg1: i32) -> (i32, i32) {
    %c0_i32 = arith.constant 0 : i32
    %c0_i32_0 = arith.constant 0 : i32
    return %c0_i32, %arg1 : i32, i32
  }
  func.func @transform_4(%arg0: i32, %arg1: i32) -> (i32, i32) {
    %c0_i32 = arith.constant 0 : i32
    return %arg0, %arg1 : i32, i32
  }
}

module attributes {stable_mosaic.version = 11 : i64} {
  func.func @kernel(%arg0: i32, %arg1: memref<1x8x96xbf16, #tpu.memory_space<vmem>>, %arg2: memref<1x8x32xbf16, #tpu.memory_space<vmem>>) attributes {dimension_semantics = [#tpu.dimension_semantics<parallel>], iteration_bounds = array<i64: 2>, scalar_prefetch = 0 : i64, scratch_operands = 0 : i64, tpu.core_type = #tpu.core_type<tc>, window_params = [{transform_indices = @transform_0, window_bounds = array<i64: 1, 8, 96>}, {transform_indices = @transform_1, window_bounds = array<i64: 1, 8, 32>}]} {
    %c0 = arith.constant 0 : index
    %c0_0 = arith.constant 0 : index
    %c0_1 = arith.constant 0 : index
    %0 = vector.load %arg1[%c0, %c0_0, %c0_1] : memref<1x8x96xbf16, #tpu.memory_space<vmem>>, vector<1x8x96xbf16>
    %1 = vector.shape_cast %0 : vector<1x8x96xbf16> to vector<8x96xbf16>
    %2 = tpu.iota {dimensions = array<i32: 0>} : vector<8x8xi32>
    %3 = tpu.iota {dimensions = array<i32: 1>} : vector<8x8xi32>
    %4 = arith.cmpi sgt, %3, %2 : vector<8x8xi32>
    %cst = arith.constant 0xFF800000 : f32
    %cst_2 = arith.constant 0.000000e+00 : f32
    %5 = vector.broadcast %cst : f32 to vector<8x8xf32>
    %6 = vector.broadcast %cst_2 : f32 to vector<8x8xf32>
    %7 = arith.select %4, %5, %6 : vector<8x8xi1>, vector<8x8xf32>
    %8 = vector.extract_strided_slice %1 {offsets = [0, 0], sizes = [8, 8], strides = [1, 1]} : vector<8x96xbf16> to vector<8x8xbf16>
    %9 = vector.extract_strided_slice %1 {offsets = [0, 32], sizes = [8, 8], strides = [1, 1]} : vector<8x96xbf16> to vector<8x8xbf16>
    %10 = vector.extract_strided_slice %1 {offsets = [0, 64], sizes = [8, 8], strides = [1, 1]} : vector<8x96xbf16> to vector<8x8xbf16>
    %cst_3 = arith.constant dense<0.000000e+00> : vector<8x8xf32>
    %11 = tpu.matmul %8, %9, %cst_3 {dimension_numbers = #tpu.dot_dimension_numbers<[1], [1], [0], [0], [0, 0, 1, 0], [], []>} : vector<8x8xbf16>, vector<8x8xbf16>, vector<8x8xf32> -> vector<8x8xf32>
    %12 = arith.addf %11, %7 : vector<8x8xf32>
    %cst_4 = arith.constant dense<0xFF800000> : vector<8xf32>
    %13 = vector.multi_reduction <maximumf>, %12, %cst_4 [1] : vector<8x8xf32> to vector<8xf32>
    %14 = vector.shape_cast %13 : vector<8xf32> to vector<8x1xf32>
    %15 = vector.broadcast %14 : vector<8x1xf32> to vector<8x8xf32>
    %16 = arith.subf %12, %15 : vector<8x8xf32>
    %17 = math.exp %16 : vector<8x8xf32>
    %cst_5 = arith.constant dense<0.000000e+00> : vector<8xf32>
    %18 = vector.multi_reduction <add>, %17, %cst_5 [1] : vector<8x8xf32> to vector<8xf32>
    %19 = vector.shape_cast %18 : vector<8xf32> to vector<8x1xf32>
    %20 = tpu.reciprocal %19 {approx = true} : vector<8x1xf32> -> vector<8x1xf32>
    %21 = vector.broadcast %20 : vector<8x1xf32> to vector<8x8xf32>
    %22 = arith.mulf %17, %21 : vector<8x8xf32>
    %23 = arith.truncf %22 : vector<8x8xf32> to vector<8x8xbf16>
    %cst_6 = arith.constant dense<0.000000e+00> : vector<8x8xf32>
    %24 = tpu.matmul %23, %10, %cst_6 {dimension_numbers = #tpu.dot_dimension_numbers<[1], [0], [0], [1], [0, 0, 1, 1], [], []>} : vector<8x8xbf16>, vector<8x8xbf16>, vector<8x8xf32> -> vector<8x8xf32>
    %25 = arith.truncf %24 : vector<8x8xf32> to vector<8x8xbf16>
    %26 = vector.extract_strided_slice %1 {offsets = [0, 8], sizes = [8, 8], strides = [1, 1]} : vector<8x96xbf16> to vector<8x8xbf16>
    %27 = vector.extract_strided_slice %1 {offsets = [0, 40], sizes = [8, 8], strides = [1, 1]} : vector<8x96xbf16> to vector<8x8xbf16>
    %28 = vector.extract_strided_slice %1 {offsets = [0, 72], sizes = [8, 8], strides = [1, 1]} : vector<8x96xbf16> to vector<8x8xbf16>
    %cst_7 = arith.constant dense<0.000000e+00> : vector<8x8xf32>
    %29 = tpu.matmul %26, %27, %cst_7 {dimension_numbers = #tpu.dot_dimension_numbers<[1], [1], [0], [0], [0, 0, 1, 0], [], []>} : vector<8x8xbf16>, vector<8x8xbf16>, vector<8x8xf32> -> vector<8x8xf32>
    %30 = arith.addf %29, %7 : vector<8x8xf32>
    %cst_8 = arith.constant dense<0xFF800000> : vector<8xf32>
    %31 = vector.multi_reduction <maximumf>, %30, %cst_8 [1] : vector<8x8xf32> to vector<8xf32>
    %32 = vector.shape_cast %31 : vector<8xf32> to vector<8x1xf32>
    %33 = vector.broadcast %32 : vector<8x1xf32> to vector<8x8xf32>
    %34 = arith.subf %30, %33 : vector<8x8xf32>
    %35 = math.exp %34 : vector<8x8xf32>
    %cst_9 = arith.constant dense<0.000000e+00> : vector<8xf32>
    %36 = vector.multi_reduction <add>, %35, %cst_9 [1] : vector<8x8xf32> to vector<8xf32>
    %37 = vector.shape_cast %36 : vector<8xf32> to vector<8x1xf32>
    %38 = tpu.reciprocal %37 {approx = true} : vector<8x1xf32> -> vector<8x1xf32>
    %39 = vector.broadcast %38 : vector<8x1xf32> to vector<8x8xf32>
    %40 = arith.mulf %35, %39 : vector<8x8xf32>
    %41 = arith.truncf %40 : vector<8x8xf32> to vector<8x8xbf16>
    %cst_10 = arith.constant dense<0.000000e+00> : vector<8x8xf32>
    %42 = tpu.matmul %41, %28, %cst_10 {dimension_numbers = #tpu.dot_dimension_numbers<[1], [0], [0], [1], [0, 0, 1, 1], [], []>} : vector<8x8xbf16>, vector<8x8xbf16>, vector<8x8xf32> -> vector<8x8xf32>
    %43 = arith.truncf %42 : vector<8x8xf32> to vector<8x8xbf16>
    %44 = vector.extract_strided_slice %1 {offsets = [0, 16], sizes = [8, 8], strides = [1, 1]} : vector<8x96xbf16> to vector<8x8xbf16>
    %45 = vector.extract_strided_slice %1 {offsets = [0, 48], sizes = [8, 8], strides = [1, 1]} : vector<8x96xbf16> to vector<8x8xbf16>
    %46 = vector.extract_strided_slice %1 {offsets = [0, 80], sizes = [8, 8], strides = [1, 1]} : vector<8x96xbf16> to vector<8x8xbf16>
    %cst_11 = arith.constant dense<0.000000e+00> : vector<8x8xf32>
    %47 = tpu.matmul %44, %45, %cst_11 {dimension_numbers = #tpu.dot_dimension_numbers<[1], [1], [0], [0], [0, 0, 1, 0], [], []>} : vector<8x8xbf16>, vector<8x8xbf16>, vector<8x8xf32> -> vector<8x8xf32>
    %48 = arith.addf %47, %7 : vector<8x8xf32>
    %cst_12 = arith.constant dense<0xFF800000> : vector<8xf32>
    %49 = vector.multi_reduction <maximumf>, %48, %cst_12 [1] : vector<8x8xf32> to vector<8xf32>
    %50 = vector.shape_cast %49 : vector<8xf32> to vector<8x1xf32>
    %51 = vector.broadcast %50 : vector<8x1xf32> to vector<8x8xf32>
    %52 = arith.subf %48, %51 : vector<8x8xf32>
    %53 = math.exp %52 : vector<8x8xf32>
    %cst_13 = arith.constant dense<0.000000e+00> : vector<8xf32>
    %54 = vector.multi_reduction <add>, %53, %cst_13 [1] : vector<8x8xf32> to vector<8xf32>
    %55 = vector.shape_cast %54 : vector<8xf32> to vector<8x1xf32>
    %56 = tpu.reciprocal %55 {approx = true} : vector<8x1xf32> -> vector<8x1xf32>
    %57 = vector.broadcast %56 : vector<8x1xf32> to vector<8x8xf32>
    %58 = arith.mulf %53, %57 : vector<8x8xf32>
    %59 = arith.truncf %58 : vector<8x8xf32> to vector<8x8xbf16>
    %cst_14 = arith.constant dense<0.000000e+00> : vector<8x8xf32>
    %60 = tpu.matmul %59, %46, %cst_14 {dimension_numbers = #tpu.dot_dimension_numbers<[1], [0], [0], [1], [0, 0, 1, 1], [], []>} : vector<8x8xbf16>, vector<8x8xbf16>, vector<8x8xf32> -> vector<8x8xf32>
    %61 = arith.truncf %60 : vector<8x8xf32> to vector<8x8xbf16>
    %62 = vector.extract_strided_slice %1 {offsets = [0, 24], sizes = [8, 8], strides = [1, 1]} : vector<8x96xbf16> to vector<8x8xbf16>
    %63 = vector.extract_strided_slice %1 {offsets = [0, 56], sizes = [8, 8], strides = [1, 1]} : vector<8x96xbf16> to vector<8x8xbf16>
    %64 = vector.extract_strided_slice %1 {offsets = [0, 88], sizes = [8, 8], strides = [1, 1]} : vector<8x96xbf16> to vector<8x8xbf16>
    %cst_15 = arith.constant dense<0.000000e+00> : vector<8x8xf32>
    %65 = tpu.matmul %62, %63, %cst_15 {dimension_numbers = #tpu.dot_dimension_numbers<[1], [1], [0], [0], [0, 0, 1, 0], [], []>} : vector<8x8xbf16>, vector<8x8xbf16>, vector<8x8xf32> -> vector<8x8xf32>
    %66 = arith.addf %65, %7 : vector<8x8xf32>
    %cst_16 = arith.constant dense<0xFF800000> : vector<8xf32>
    %67 = vector.multi_reduction <maximumf>, %66, %cst_16 [1] : vector<8x8xf32> to vector<8xf32>
    %68 = vector.shape_cast %67 : vector<8xf32> to vector<8x1xf32>
    %69 = vector.broadcast %68 : vector<8x1xf32> to vector<8x8xf32>
    %70 = arith.subf %66, %69 : vector<8x8xf32>
    %71 = math.exp %70 : vector<8x8xf32>
    %cst_17 = arith.constant dense<0.000000e+00> : vector<8xf32>
    %72 = vector.multi_reduction <add>, %71, %cst_17 [1] : vector<8x8xf32> to vector<8xf32>
    %73 = vector.shape_cast %72 : vector<8xf32> to vector<8x1xf32>
    %74 = tpu.reciprocal %73 {approx = true} : vector<8x1xf32> -> vector<8x1xf32>
    %75 = vector.broadcast %74 : vector<8x1xf32> to vector<8x8xf32>
    %76 = arith.mulf %71, %75 : vector<8x8xf32>
    %77 = arith.truncf %76 : vector<8x8xf32> to vector<8x8xbf16>
    %cst_18 = arith.constant dense<0.000000e+00> : vector<8x8xf32>
    %78 = tpu.matmul %77, %64, %cst_18 {dimension_numbers = #tpu.dot_dimension_numbers<[1], [0], [0], [1], [0, 0, 1, 1], [], []>} : vector<8x8xbf16>, vector<8x8xbf16>, vector<8x8xf32> -> vector<8x8xf32>
    %79 = arith.truncf %78 : vector<8x8xf32> to vector<8x8xbf16>
    %80 = tpu.concatenate %25, %43, %61, %79 in 1 : vector<8x8xbf16>, vector<8x8xbf16>, vector<8x8xbf16>, vector<8x8xbf16> -> vector<8x32xbf16>
    %c0_19 = arith.constant 0 : index
    %c0_20 = arith.constant 0 : index
    %c0_21 = arith.constant 0 : index
    %81 = vector.load %arg2[%c0_19, %c0_20, %c0_21] : memref<1x8x32xbf16, #tpu.memory_space<vmem>>, vector<1x8x32xbf16>
    %82 = vector.shape_cast %81 : vector<1x8x32xbf16> to vector<8x32xbf16>
    %83 = vector.shape_cast %80 : vector<8x32xbf16> to vector<1x8x32xbf16>
    tpu.vector_store %arg2[%c0_19, %c0_20, %c0_21], %83 {strides = array<i32>} : memref<1x8x32xbf16, #tpu.memory_space<vmem>>, vector<1x8x32xbf16>,
    return
  }
  func.func @transform_0(%arg0: i32) -> (i32, i32, i32) {
    %c0_i32 = arith.constant 0 : i32
    %c0_i32_0 = arith.constant 0 : i32
    %c0_i32_1 = arith.constant 0 : i32
    return %arg0, %c0_i32, %c0_i32_0 : i32, i32, i32
  }
  func.func @transform_1(%arg0: i32) -> (i32, i32, i32) {
    %c0_i32 = arith.constant 0 : i32
    %c0_i32_0 = arith.constant 0 : i32
    %c0_i32_1 = arith.constant 0 : i32
    return %arg0, %c0_i32, %c0_i32_0 : i32, i32, i32
  }
}

module attributes {stable_mosaic.version = 11 : i64} {
  func.func @kernel(%arg0: i32, %arg1: i32, %arg2: memref<16x32xbf16, #tpu.memory_space<vmem>>, %arg3: memref<32x32xbf16, #tpu.memory_space<vmem>>, %arg4: memref<1x32xf32, #tpu.memory_space<vmem>>, %arg5: memref<16x32xbf16, #tpu.memory_space<vmem>>, %arg6: memref<16x32xbf16, #tpu.memory_space<vmem>>, %arg7: memref<16x32xbf16, #tpu.memory_space<vmem>>) attributes {dimension_semantics = [#tpu.dimension_semantics<parallel>, #tpu.dimension_semantics<arbitrary>], iteration_bounds = array<i64: 1, 1>, scalar_prefetch = 0 : i64, scratch_operands = 1 : i64, tpu.core_type = #tpu.core_type<tc>, window_params = [{transform_indices = @transform_0, window_bounds = array<i64: 16, 32>}, {transform_indices = @transform_1, window_bounds = array<i64: 32, 32>}, {transform_indices = @transform_2, window_bounds = array<i64: 1, 32>}, {transform_indices = @transform_3, window_bounds = array<i64: 16, 32>}, {transform_indices = @transform_4, window_bounds = array<i64: 16, 32>}]} {
    %c0_i32 = arith.constant 0 : i32
    %0 = arith.cmpi eq, %arg1, %c0_i32 : i32
    %1 = arith.extui %0 : i1 to i32
    %c0_i32_0 = arith.constant 0 : i32
    %2 = arith.cmpi ne, %1, %c0_i32_0 : i32
    scf.if %2 {
      %c0_10 = arith.constant 0 : index
      %c0_11 = arith.constant 0 : index
      %14 = vector.load %arg2[%c0_10, %c0_11] : memref<16x32xbf16, #tpu.memory_space<vmem>>, vector<16x32xbf16>
      %c0_12 = arith.constant 0 : index
      %c0_13 = arith.constant 0 : index
      %15 = vector.load %arg7[%c0_12, %c0_13] : memref<16x32xbf16, #tpu.memory_space<vmem>>, vector<16x32xbf16>
      tpu.vector_store %arg7[%c0_12, %c0_13], %14 {strides = array<i32>} : memref<16x32xbf16, #tpu.memory_space<vmem>>, vector<16x32xbf16>,
    } else {
    }
    %c0 = arith.constant 0 : index
    %c0_1 = arith.constant 0 : index
    %3 = vector.load %arg7[%c0, %c0_1] : memref<16x32xbf16, #tpu.memory_space<vmem>>, vector<16x32xbf16>
    %c0_2 = arith.constant 0 : index
    %c0_3 = arith.constant 0 : index
    %4 = vector.load %arg3[%c0_2, %c0_3] : memref<32x32xbf16, #tpu.memory_space<vmem>>, vector<32x32xbf16>
    %cst = arith.constant dense<0.000000e+00> : vector<16x32xf32>
    %5 = tpu.matmul %3, %4, %cst {dimension_numbers = #tpu.dot_dimension_numbers<[1], [0], [0], [1], [0, 0, 1, 1], [], []>} : vector<16x32xbf16>, vector<32x32xbf16>, vector<16x32xf32> -> vector<16x32xf32>
    %c0_4 = arith.constant 0 : index
    %c0_5 = arith.constant 0 : index
    %6 = vector.load %arg4[%c0_4, %c0_5] : memref<1x32xf32, #tpu.memory_space<vmem>>, vector<1x32xf32>
    %7 = vector.broadcast %6 : vector<1x32xf32> to vector<16x32xf32>
    %8 = arith.addf %5, %7 : vector<16x32xf32>
    %c0_6 = arith.constant 0 : index
    %c0_7 = arith.constant 0 : index
    %9 = vector.load %arg5[%c0_6, %c0_7] : memref<16x32xbf16, #tpu.memory_space<vmem>>, vector<16x32xbf16>
    %10 = arith.extf %9 : vector<16x32xbf16> to vector<16x32xf32>
    %11 = arith.addf %8, %10 : vector<16x32xf32>
    %12 = arith.truncf %11 : vector<16x32xf32> to vector<16x32xbf16>
    %c0_8 = arith.constant 0 : index
    %c0_9 = arith.constant 0 : index
    %13 = vector.load %arg6[%c0_8, %c0_9] : memref<16x32xbf16, #tpu.memory_space<vmem>>, vector<16x32xbf16>
    tpu.vector_store %arg6[%c0_8, %c0_9], %12 {strides = array<i32>} : memref<16x32xbf16, #tpu.memory_space<vmem>>, vector<16x32xbf16>,
    return
  }
  func.func @transform_0(%arg0: i32, %arg1: i32) -> (i32, i32) {
    %c0_i32 = arith.constant 0 : i32
    %c0_i32_0 = arith.constant 0 : i32
    return %arg0, %c0_i32 : i32, i32
  }
  func.func @transform_1(%arg0: i32, %arg1: i32) -> (i32, i32) {
    %c0_i32 = arith.constant 0 : i32
    %c0_i32_0 = arith.constant 0 : i32
    return %c0_i32, %arg1 : i32, i32
  }
  func.func @transform_2(%arg0: i32, %arg1: i32) -> (i32, i32) {
    %c0_i32 = arith.constant 0 : i32
    %c0_i32_0 = arith.constant 0 : i32
    return %c0_i32, %arg1 : i32, i32
  }
  func.func @transform_3(%arg0: i32, %arg1: i32) -> (i32, i32) {
    %c0_i32 = arith.constant 0 : i32
    return %arg0, %arg1 : i32, i32
  }
  func.func @transform_4(%arg0: i32, %arg1: i32) -> (i32, i32) {
    %c0_i32 = arith.constant 0 : i32
    return %arg0, %arg1 : i32, i32
  }
}

module attributes {stable_mosaic.version = 11 : i64} {
  func.func @kernel(%arg0: i32, %arg1: i32, %arg2: memref<16x32xbf16, #tpu.memory_space<vmem>>, %arg3: memref<1x32xf32, #tpu.memory_space<vmem>>, %arg4: memref<1x32xf32, #tpu.memory_space<vmem>>, %arg5: memref<32x96xbf16, #tpu.memory_space<vmem>>, %arg6: memref<1x96xf32, #tpu.memory_space<vmem>>, %arg7: memref<16x96xbf16, #tpu.memory_space<vmem>>, %arg8: memref<16x32xbf16, #tpu.memory_space<vmem>>) attributes {dimension_semantics = [#tpu.dimension_semantics<parallel>, #tpu.dimension_semantics<arbitrary>], iteration_bounds = array<i64: 1, 1>, scalar_prefetch = 0 : i64, scratch_operands = 1 : i64, tpu.core_type = #tpu.core_type<tc>, window_params = [{transform_indices = @transform_0, window_bounds = array<i64: 16, 32>}, {pipeline_mode = #tpu.pipeline_mode<synchronous>, transform_indices = @transform_1, window_bounds = array<i64: 1, 32>}, {pipeline_mode = #tpu.pipeline_mode<synchronous>, transform_indices = @transform_2, window_bounds = array<i64: 1, 32>}, {transform_indices = @transform_3, window_bounds = array<i64: 32, 96>}, {transform_indices = @transform_4, window_bounds = array<i64: 1, 96>}, {transform_indices = @transform_5, window_bounds = array<i64: 16, 96>}]} {
    %c0_i32 = arith.constant 0 : i32
    %0 = arith.cmpi eq, %arg1, %c0_i32 : i32
    %1 = arith.extui %0 : i1 to i32
    %c0_i32_0 = arith.constant 0 : i32
    %2 = arith.cmpi ne, %1, %c0_i32_0 : i32
    scf.if %2 {
      %c0_8 = arith.constant 0 : index
      %c0_9 = arith.constant 0 : index
      %11 = vector.load %arg2[%c0_8, %c0_9] : memref<16x32xbf16, #tpu.memory_space<vmem>>, vector<16x32xbf16>
      %12 = arith.extf %11 : vector<16x32xbf16> to vector<16x32xf32>
      %cst_10 = arith.constant dense<0.000000e+00> : vector<16xf32>
      %13 = vector.multi_reduction <add>, %12, %cst_10 [1] : vector<16x32xf32> to vector<16xf32>
      %14 = vector.shape_cast %13 : vector<16xf32> to vector<16x1xf32>
      %cst_11 = arith.constant 3.200000e+01 : f32
      %15 = vector.broadcast %cst_11 : f32 to vector<16x1xf32>
      %16 = arith.divf %14, %15 : vector<16x1xf32>
      %17 = vector.broadcast %16 : vector<16x1xf32> to vector<16x32xf32>
      %18 = arith.subf %12, %17 : vector<16x32xf32>
      %19 = vector.broadcast %16 : vector<16x1xf32> to vector<16x32xf32>
      %20 = arith.subf %12, %19 : vector<16x32xf32>
      %21 = arith.mulf %18, %20 : vector<16x32xf32>
      %cst_12 = arith.constant dense<0.000000e+00> : vector<16xf32>
      %22 = vector.multi_reduction <add>, %21, %cst_12 [1] : vector<16x32xf32> to vector<16xf32>
      %23 = vector.shape_cast %22 : vector<16xf32> to vector<16x1xf32>
      %cst_13 = arith.constant 3.200000e+01 : f32
      %24 = vector.broadcast %cst_13 : f32 to vector<16x1xf32>
      %25 = arith.divf %23, %24 : vector<16x1xf32>
      %26 = vector.broadcast %16 : vector<16x1xf32> to vector<16x32xf32>
      %27 = arith.subf %12, %26 : vector<16x32xf32>
      %cst_14 = arith.constant 9.99999974E-6 : f32
      %28 = vector.broadcast %cst_14 : f32 to vector<16x1xf32>
      %29 = arith.addf %25, %28 : vector<16x1xf32>
      %30 = math.rsqrt %29 : vector<16x1xf32>
      %31 = vector.broadcast %30 : vector<16x1xf32> to vector<16x32xf32>
      %32 = arith.mulf %27, %31 : vector<16x32xf32>
      %c0_15 = arith.constant 0 : index
      %c0_16 = arith.constant 0 : index
      %33 = vector.load %arg3[%c0_15, %c0_16] : memref<1x32xf32, #tpu.memory_space<vmem>>, vector<1x32xf32>
      %34 = vector.broadcast %33 : vector<1x32xf32> to vector<16x32xf32>
      %35 = arith.mulf %32, %34 : vector<16x32xf32>
      %c0_17 = arith.constant 0 : index
      %c0_18 = arith.constant 0 : index
      %36 = vector.load %arg4[%c0_17, %c0_18] : memref<1x32xf32, #tpu.memory_space<vmem>>, vector<1x32xf32>
      %37 = vector.broadcast %36 : vector<1x32xf32> to vector<16x32xf32>
      %38 = arith.addf %35, %37 : vector<16x32xf32>
      %39 = arith.truncf %38 : vector<16x32xf32> to vector<16x32xbf16>
      %c0_19 = arith.constant 0 : index
      %c0_20 = arith.constant 0 : index
      %40 = vector.load %arg8[%c0_19, %c0_20] : memref<16x32xbf16, #tpu.memory_space<vmem>>, vector<16x32xbf16>
      tpu.vector_store %arg8[%c0_19, %c0_20], %39 {strides = array<i32>} : memref<16x32xbf16, #tpu.memory_space<vmem>>, vector<16x32xbf16>,
    } else {
    }
    %c0 = arith.constant 0 : index
    %c0_1 = arith.constant 0 : index
    %3 = vector.load %arg8[%c0, %c0_1] : memref<16x32xbf16, #tpu.memory_space<vmem>>, vector<16x32xbf16>
    %c0_2 = arith.constant 0 : index
    %c0_3 = arith.constant 0 : index
    %4 = vector.load %arg5[%c0_2, %c0_3] : memref<32x96xbf16, #tpu.memory_space<vmem>>, vector<32x96xbf16>
    %cst = arith.constant dense<0.000000e+00> : vector<16x96xf32>
    %5 = tpu.matmul %3, %4, %cst {dimension_numbers = #tpu.dot_dimension_numbers<[1], [0], [0], [1], [0, 0, 1, 1], [], []>} : vector<16x32xbf16>, vector<32x96xbf16>, vector<16x96xf32> -> vector<16x96xf32>
    %c0_4 = arith.constant 0 : index
    %c0_5 = arith.constant 0 : index
    %6 = vector.load %arg6[%c0_4, %c0_5] : memref<1x96xf32, #tpu.memory_space<vmem>>, vector<1x96xf32>
    %7 = vector.broadcast %6 : vector<1x96xf32> to vector<16x96xf32>
    %8 = arith.addf %5, %7 : vector<16x96xf32>
    %9 = arith.truncf %8 : vector<16x96xf32> to vector<16x96xbf16>
    %c0_6 = arith.constant 0 : index
    %c0_7 = arith.constant 0 : index
    %10 = vector.load %arg7[%c0_6, %c0_7] : memref<16x96xbf16, #tpu.memory_space<vmem>>, vector<16x96xbf16>
    tpu.vector_store %arg7[%c0_6, %c0_7], %9 {strides = array<i32>} : memref<16x96xbf16, #tpu.memory_space<vmem>>, vector<16x96xbf16>,
    return
  }
  func.func @transform_0(%arg0: i32, %arg1: i32) -> (i32, i32) {
    %c0_i32 = arith.constant 0 : i32
    %c0_i32_0 = arith.constant 0 : i32
    return %arg0, %c0_i32 : i32, i32
  }
  func.func @transform_1(%arg0: i32, %arg1: i32) -> (i32, i32) {
    %c0_i32 = arith.constant 0 : i32
    %c0_i32_0 = arith.constant 0 : i32
    %c0_i32_1 = arith.constant 0 : i32
    return %c0_i32, %c0_i32_0 : i32, i32
  }
  func.func @transform_2(%arg0: i32, %arg1: i32) -> (i32, i32) {
    %c0_i32 = arith.constant 0 : i32
    %c0_i32_0 = arith.constant 0 : i32
    %c0_i32_1 = arith.constant 0 : i32
    return %c0_i32, %c0_i32_0 : i32, i32
  }
  func.func @transform_3(%arg0: i32, %arg1: i32) -> (i32, i32) {
    %c0_i32 = arith.constant 0 : i32
    %c0_i32_0 = arith.constant 0 : i32
    return %c0_i32, %arg1 : i32, i32
  }
  func.func @transform_4(%arg0: i32, %arg1: i32) -> (i32, i32) {
    %c0_i32 = arith.constant 0 : i32
    %c0_i32_0 = arith.constant 0 : i32
    return %c0_i32, %arg1 : i32, i32
  }
  func.func @transform_5(%arg0: i32, %arg1: i32) -> (i32, i32) {
    %c0_i32 = arith.constant 0 : i32
    return %arg0, %arg1 : i32, i32
  }
}

module attributes {stable_mosaic.version = 11 : i64} {
  func.func @kernel(%arg0: i32, %arg1: i32, %arg2: memref<16x32xbf16, #tpu.memory_space<vmem>>, %arg3: memref<1x32xf32, #tpu.memory_space<vmem>>, %arg4: memref<1x32xf32, #tpu.memory_space<vmem>>, %arg5: memref<32x128xbf16, #tpu.memory_space<vmem>>, %arg6: memref<1x128xf32, #tpu.memory_space<vmem>>, %arg7: memref<16x128xbf16, #tpu.memory_space<vmem>>, %arg8: memref<16x32xbf16, #tpu.memory_space<vmem>>) attributes {dimension_semantics = [#tpu.dimension_semantics<parallel>, #tpu.dimension_semantics<arbitrary>], iteration_bounds = array<i64: 1, 1>, scalar_prefetch = 0 : i64, scratch_operands = 1 : i64, tpu.core_type = #tpu.core_type<tc>, window_params = [{transform_indices = @transform_0, window_bounds = array<i64: 16, 32>}, {pipeline_mode = #tpu.pipeline_mode<synchronous>, transform_indices = @transform_1, window_bounds = array<i64: 1, 32>}, {pipeline_mode = #tpu.pipeline_mode<synchronous>, transform_indices = @transform_2, window_bounds = array<i64: 1, 32>}, {transform_indices = @transform_3, window_bounds = array<i64: 32, 128>}, {transform_indices = @transform_4, window_bounds = array<i64: 1, 128>}, {transform_indices = @transform_5, window_bounds = array<i64: 16, 128>}]} {
    %c0_i32 = arith.constant 0 : i32
    %0 = arith.cmpi eq, %arg1, %c0_i32 : i32
    %1 = arith.extui %0 : i1 to i32
    %c0_i32_0 = arith.constant 0 : i32
    %2 = arith.cmpi ne, %1, %c0_i32_0 : i32
    scf.if %2 {
      %c0_10 = arith.constant 0 : index
      %c0_11 = arith.constant 0 : index
      %19 = vector.load %arg2[%c0_10, %c0_11] : memref<16x32xbf16, #tpu.memory_space<vmem>>, vector<16x32xbf16>
      %20 = arith.extf %19 : vector<16x32xbf16> to vector<16x32xf32>
      %cst_12 = arith.constant dense<0.000000e+00> : vector<16xf32>
      %21 = vector.multi_reduction <add>, %20, %cst_12 [1] : vector<16x32xf32> to vector<16xf32>
      %22 = vector.shape_cast %21 : vector<16xf32> to vector<16x1xf32>
      %cst_13 = arith.constant 3.200000e+01 : f32
      %23 = vector.broadcast %cst_13 : f32 to vector<16x1xf32>
      %24 = arith.divf %22, %23 : vector<16x1xf32>
      %25 = vector.broadcast %24 : vector<16x1xf32> to vector<16x32xf32>
      %26 = arith.subf %20, %25 : vector<16x32xf32>
      %27 = vector.broadcast %24 : vector<16x1xf32> to vector<16x32xf32>
      %28 = arith.subf %20, %27 : vector<16x32xf32>
      %29 = arith.mulf %26, %28 : vector<16x32xf32>
      %cst_14 = arith.constant dense<0.000000e+00> : vector<16xf32>
      %30 = vector.multi_reduction <add>, %29, %cst_14 [1] : vector<16x32xf32> to vector<16xf32>
      %31 = vector.shape_cast %30 : vector<16xf32> to vector<16x1xf32>
      %cst_15 = arith.constant 3.200000e+01 : f32
      %32 = vector.broadcast %cst_15 : f32 to vector<16x1xf32>
      %33 = arith.divf %31, %32 : vector<16x1xf32>
      %34 = vector.broadcast %24 : vector<16x1xf32> to vector<16x32xf32>
      %35 = arith.subf %20, %34 : vector<16x32xf32>
      %cst_16 = arith.constant 9.99999974E-6 : f32
      %36 = vector.broadcast %cst_16 : f32 to vector<16x1xf32>
      %37 = arith.addf %33, %36 : vector<16x1xf32>
      %38 = math.rsqrt %37 : vector<16x1xf32>
      %39 = vector.broadcast %38 : vector<16x1xf32> to vector<16x32xf32>
      %40 = arith.mulf %35, %39 : vector<16x32xf32>
      %c0_17 = arith.constant 0 : index
      %c0_18 = arith.constant 0 : index
      %41 = vector.load %arg3[%c0_17, %c0_18] : memref<1x32xf32, #tpu.memory_space<vmem>>, vector<1x32xf32>
      %42 = vector.broadcast %41 : vector<1x32xf32> to vector<16x32xf32>
      %43 = arith.mulf %40, %42 : vector<16x32xf32>
      %c0_19 = arith.constant 0 : index
      %c0_20 = arith.constant 0 : index
      %44 = vector.load %arg4[%c0_19, %c0_20] : memref<1x32xf32, #tpu.memory_space<vmem>>, vector<1x32xf32>
      %45 = vector.broadcast %44 : vector<1x32xf32> to vector<16x32xf32>
      %46 = arith.addf %43, %45 : vector<16x32xf32>
      %47 = arith.truncf %46 : vector<16x32xf32> to vector<16x32xbf16>
      %c0_21 = arith.constant 0 : index
      %c0_22 = arith.constant 0 : index
      %48 = vector.load %arg8[%c0_21, %c0_22] : memref<16x32xbf16, #tpu.memory_space<vmem>>, vector<16x32xbf16>
      tpu.vector_store %arg8[%c0_21, %c0_22], %47 {strides = array<i32>} : memref<16x32xbf16, #tpu.memory_space<vmem>>, vector<16x32xbf16>,
    } else {
    }
    %c0 = arith.constant 0 : index
    %c0_1 = arith.constant 0 : index
    %3 = vector.load %arg8[%c0, %c0_1] : memref<16x32xbf16, #tpu.memory_space<vmem>>, vector<16x32xbf16>
    %c0_2 = arith.constant 0 : index
    %c0_3 = arith.constant 0 : index
    %4 = vector.load %arg5[%c0_2, %c0_3] : memref<32x128xbf16, #tpu.memory_space<vmem>>, vector<32x128xbf16>
    %cst = arith.constant dense<0.000000e+00> : vector<16x128xf32>
    %5 = tpu.matmul %3, %4, %cst {dimension_numbers = #tpu.dot_dimension_numbers<[1], [0], [0], [1], [0, 0, 1, 1], [], []>} : vector<16x32xbf16>, vector<32x128xbf16>, vector<16x128xf32> -> vector<16x128xf32>
    %c0_4 = arith.constant 0 : index
    %c0_5 = arith.constant 0 : index
    %6 = vector.load %arg6[%c0_4, %c0_5] : memref<1x128xf32, #tpu.memory_space<vmem>>, vector<1x128xf32>
    %7 = vector.broadcast %6 : vector<1x128xf32> to vector<16x128xf32>
    %8 = arith.addf %5, %7 : vector<16x128xf32>
    %cst_6 = arith.constant 1.702000e+00 : f32
    %9 = vector.broadcast %cst_6 : f32 to vector<16x128xf32>
    %10 = arith.mulf %9, %8 : vector<16x128xf32>
    %11 = arith.negf %10 : vector<16x128xf32>
    %12 = math.exp %11 : vector<16x128xf32>
    %cst_7 = arith.constant 1.000000e+00 : f32
    %13 = vector.broadcast %cst_7 : f32 to vector<16x128xf32>
    %14 = arith.addf %13, %12 : vector<16x128xf32>
    %15 = arith.divf %13, %14 : vector<16x128xf32>
    %16 = arith.mulf %8, %15 : vector<16x128xf32>
    %17 = arith.truncf %16 : vector<16x128xf32> to vector<16x128xbf16>
    %c0_8 = arith.constant 0 : index
    %c0_9 = arith.constant 0 : index
    %18 = vector.load %arg7[%c0_8, %c0_9] : memref<16x128xbf16, #tpu.memory_space<vmem>>, vector<16x128xbf16>
    tpu.vector_store %arg7[%c0_8, %c0_9], %17 {strides = array<i32>} : memref<16x128xbf16, #tpu.memory_space<vmem>>, vector<16x128xbf16>,
    return
  }
  func.func @transform_0(%arg0: i32, %arg1: i32) -> (i32, i32) {
    %c0_i32 = arith.constant 0 : i32
    %c0_i32_0 = arith.constant 0 : i32
    return %arg0, %c0_i32 : i32, i32
  }
  func.func @transform_1(%arg0: i32, %arg1: i32) -> (i32, i32) {
    %c0_i32 = arith.constant 0 : i32
    %c0_i32_0 = arith.constant 0 : i32
    %c0_i32_1 = arith.constant 0 : i32
    return %c0_i32, %c0_i32_0 : i32, i32
  }
  func.func @transform_2(%arg0: i32, %arg1: i32) -> (i32, i32) {
    %c0_i32 = arith.constant 0 : i32
    %c0_i32_0 = arith.constant 0 : i32
    %c0_i32_1 = arith.constant 0 : i32
    return %c0_i32, %c0_i32_0 : i32, i32
  }
  func.func @transform_3(%arg0: i32, %arg1: i32) -> (i32, i32) {
    %c0_i32 = arith.constant 0 : i32
    %c0_i32_0 = arith.constant 0 : i32
    return %c0_i32, %arg1 : i32, i32
  }
  func.func @transform_4(%arg0: i32, %arg1: i32) -> (i32, i32) {
    %c0_i32 = arith.constant 0 : i32
    %c0_i32_0 = arith.constant 0 : i32
    return %c0_i32, %arg1 : i32, i32
  }
  func.func @transform_5(%arg0: i32, %arg1: i32) -> (i32, i32) {
    %c0_i32 = arith.constant 0 : i32
    return %arg0, %arg1 : i32, i32
  }
}

module attributes {stable_mosaic.version = 11 : i64} {
  func.func @kernel(%arg0: i32, %arg1: i32, %arg2: memref<16x128xbf16, #tpu.memory_space<vmem>>, %arg3: memref<128x32xbf16, #tpu.memory_space<vmem>>, %arg4: memref<1x32xf32, #tpu.memory_space<vmem>>, %arg5: memref<16x32xbf16, #tpu.memory_space<vmem>>, %arg6: memref<16x32xbf16, #tpu.memory_space<vmem>>, %arg7: memref<16x128xbf16, #tpu.memory_space<vmem>>) attributes {dimension_semantics = [#tpu.dimension_semantics<parallel>, #tpu.dimension_semantics<arbitrary>], iteration_bounds = array<i64: 1, 1>, scalar_prefetch = 0 : i64, scratch_operands = 1 : i64, tpu.core_type = #tpu.core_type<tc>, window_params = [{transform_indices = @transform_0, window_bounds = array<i64: 16, 128>}, {transform_indices = @transform_1, window_bounds = array<i64: 128, 32>}, {transform_indices = @transform_2, window_bounds = array<i64: 1, 32>}, {transform_indices = @transform_3, window_bounds = array<i64: 16, 32>}, {transform_indices = @transform_4, window_bounds = array<i64: 16, 32>}]} {
    %c0_i32 = arith.constant 0 : i32
    %0 = arith.cmpi eq, %arg1, %c0_i32 : i32
    %1 = arith.extui %0 : i1 to i32
    %c0_i32_0 = arith.constant 0 : i32
    %2 = arith.cmpi ne, %1, %c0_i32_0 : i32
    scf.if %2 {
      %c0_10 = arith.constant 0 : index
      %c0_11 = arith.constant 0 : index
      %14 = vector.load %arg2[%c0_10, %c0_11] : memref<16x128xbf16, #tpu.memory_space<vmem>>, vector<16x128xbf16>
      %c0_12 = arith.constant 0 : index
      %c0_13 = arith.constant 0 : index
      %15 = vector.load %arg7[%c0_12, %c0_13] : memref<16x128xbf16, #tpu.memory_space<vmem>>, vector<16x128xbf16>
      tpu.vector_store %arg7[%c0_12, %c0_13], %14 {strides = array<i32>} : memref<16x128xbf16, #tpu.memory_space<vmem>>, vector<16x128xbf16>,
    } else {
    }
    %c0 = arith.constant 0 : index
    %c0_1 = arith.constant 0 : index
    %3 = vector.load %arg7[%c0, %c0_1] : memref<16x128xbf16, #tpu.memory_space<vmem>>, vector<16x128xbf16>
    %c0_2 = arith.constant 0 : index
    %c0_3 = arith.constant 0 : index
    %4 = vector.load %arg3[%c0_2, %c0_3] : memref<128x32xbf16, #tpu.memory_space<vmem>>, vector<128x32xbf16>
    %cst = arith.constant dense<0.000000e+00> : vector<16x32xf32>
    %5 = tpu.matmul %3, %4, %cst {dimension_numbers = #tpu.dot_dimension_numbers<[1], [0], [0], [1], [0, 0, 1, 1], [], []>} : vector<16x128xbf16>, vector<128x32xbf16>, vector<16x32xf32> -> vector<16x32xf32>
    %c0_4 = arith.constant 0 : index
    %c0_5 = arith.constant 0 : index
    %6 = vector.load %arg4[%c0_4, %c0_5] : memref<1x32xf32, #tpu.memory_space<vmem>>, vector<1x32xf32>
    %7 = vector.broadcast %6 : vector<1x32xf32> to vector<16x32xf32>
    %8 = arith.addf %5, %7 : vector<16x32xf32>
    %c0_6 = arith.constant 0 : index
    %c0_7 = arith.constant 0 : index
    %9 = vector.load %arg5[%c0_6, %c0_7] : memref<16x32xbf16, #tpu.memory_space<vmem>>, vector<16x32xbf16>
    %10 = arith.extf %9 : vector<16x32xbf16> to vector<16x32xf32>
    %11 = arith.addf %8, %10 : vector<16x32xf32>
    %12 = arith.truncf %11 : vector<16x32xf32> to vector<16x32xbf16>
    %c0_8 = arith.constant 0 : index
    %c0_9 = arith.constant 0 : index
    %13 = vector.load %arg6[%c0_8, %c0_9] : memref<16x32xbf16, #tpu.memory_space<vmem>>, vector<16x32xbf16>
    tpu.vector_store %arg6[%c0_8, %c0_9], %12 {strides = array<i32>} : memref<16x32xbf16, #tpu.memory_space<vmem>>, vector<16x32xbf16>,
    return
  }
  func.func @transform_0(%arg0: i32, %arg1: i32) -> (i32, i32) {
    %c0_i32 = arith.constant 0 : i32
    %c0_i32_0 = arith.constant 0 : i32
    return %arg0, %c0_i32 : i32, i32
  }
  func.func @transform_1(%arg0: i32, %arg1: i32) -> (i32, i32) {
    %c0_i32 = arith.constant 0 : i32
    %c0_i32_0 = arith.constant 0 : i32
    return %c0_i32, %arg1 : i32, i32
  }
  func.func @transform_2(%arg0: i32, %arg1: i32) -> (i32, i32) {
    %c0_i32 = arith.constant 0 : i32
    %c0_i32_0 = arith.constant 0 : i32
    return %c0_i32, %arg1 : i32, i32
  }
  func.func @transform_3(%arg0: i32, %arg1: i32) -> (i32, i32) {
    %c0_i32 = arith.constant 0 : i32
    return %arg0, %arg1 : i32, i32
  }
  func.func @transform_4(%arg0: i32, %arg1: i32) -> (i32, i32) {
    %c0_i32 = arith.constant 0 : i32
    return %arg0, %arg1 : i32, i32
  }
}

module attributes {stable_mosaic.version = 11 : i64} {
  func.func @kernel(%arg0: i32, %arg1: i32, %arg2: memref<8x32xbf16, #tpu.memory_space<vmem>>, %arg3: memref<1x32xf32, #tpu.memory_space<vmem>>, %arg4: memref<1x32xf32, #tpu.memory_space<vmem>>, %arg5: memref<32x32xbf16, #tpu.memory_space<vmem>>, %arg6: memref<8x32xf32, #tpu.memory_space<vmem>>, %arg7: memref<8x32xbf16, #tpu.memory_space<vmem>>) attributes {dimension_semantics = [#tpu.dimension_semantics<parallel>, #tpu.dimension_semantics<arbitrary>], iteration_bounds = array<i64: 1, 1>, scalar_prefetch = 0 : i64, scratch_operands = 1 : i64, tpu.core_type = #tpu.core_type<tc>, window_params = [{transform_indices = @transform_0, window_bounds = array<i64: 8, 32>}, {pipeline_mode = #tpu.pipeline_mode<synchronous>, transform_indices = @transform_1, window_bounds = array<i64: 1, 32>}, {pipeline_mode = #tpu.pipeline_mode<synchronous>, transform_indices = @transform_2, window_bounds = array<i64: 1, 32>}, {transform_indices = @transform_3, window_bounds = array<i64: 32, 32>}, {transform_indices = @transform_4, window_bounds = array<i64: 8, 32>}]} {
    %c0_i32 = arith.constant 0 : i32
    %0 = arith.cmpi eq, %arg1, %c0_i32 : i32
    %1 = arith.extui %0 : i1 to i32
    %c0_i32_0 = arith.constant 0 : i32
    %2 = arith.cmpi ne, %1, %c0_i32_0 : i32
    scf.if %2 {
      %c0_6 = arith.constant 0 : index
      %c0_7 = arith.constant 0 : index
      %7 = vector.load %arg2[%c0_6, %c0_7] : memref<8x32xbf16, #tpu.memory_space<vmem>>, vector<8x32xbf16>
      %8 = arith.extf %7 : vector<8x32xbf16> to vector<8x32xf32>
      %cst_8 = arith.constant dense<0.000000e+00> : vector<8xf32>
      %9 = vector.multi_reduction <add>, %8, %cst_8 [1] : vector<8x32xf32> to vector<8xf32>
      %10 = vector.shape_cast %9 : vector<8xf32> to vector<8x1xf32>
      %cst_9 = arith.constant 3.200000e+01 : f32
      %11 = vector.broadcast %cst_9 : f32 to vector<8x1xf32>
      %12 = arith.divf %10, %11 : vector<8x1xf32>
      %13 = vector.broadcast %12 : vector<8x1xf32> to vector<8x32xf32>
      %14 = arith.subf %8, %13 : vector<8x32xf32>
      %15 = vector.broadcast %12 : vector<8x1xf32> to vector<8x32xf32>
      %16 = arith.subf %8, %15 : vector<8x32xf32>
      %17 = arith.mulf %14, %16 : vector<8x32xf32>
      %cst_10 = arith.constant dense<0.000000e+00> : vector<8xf32>
      %18 = vector.multi_reduction <add>, %17, %cst_10 [1] : vector<8x32xf32> to vector<8xf32>
      %19 = vector.shape_cast %18 : vector<8xf32> to vector<8x1xf32>
      %cst_11 = arith.constant 3.200000e+01 : f32
      %20 = vector.broadcast %cst_11 : f32 to vector<8x1xf32>
      %21 = arith.divf %19, %20 : vector<8x1xf32>
      %22 = vector.broadcast %12 : vector<8x1xf32> to vector<8x32xf32>
      %23 = arith.subf %8, %22 : vector<8x32xf32>
      %cst_12 = arith.constant 9.99999974E-6 : f32
      %24 = vector.broadcast %cst_12 : f32 to vector<8x1xf32>
      %25 = arith.addf %21, %24 : vector<8x1xf32>
      %26 = math.rsqrt %25 : vector<8x1xf32>
      %27 = vector.broadcast %26 : vector<8x1xf32> to vector<8x32xf32>
      %28 = arith.mulf %23, %27 : vector<8x32xf32>
      %c0_13 = arith.constant 0 : index
      %c0_14 = arith.constant 0 : index
      %29 = vector.load %arg3[%c0_13, %c0_14] : memref<1x32xf32, #tpu.memory_space<vmem>>, vector<1x32xf32>
      %30 = vector.broadcast %29 : vector<1x32xf32> to vector<8x32xf32>
      %31 = arith.mulf %28, %30 : vector<8x32xf32>
      %c0_15 = arith.constant 0 : index
      %c0_16 = arith.constant 0 : index
      %32 = vector.load %arg4[%c0_15, %c0_16] : memref<1x32xf32, #tpu.memory_space<vmem>>, vector<1x32xf32>
      %33 = vector.broadcast %32 : vector<1x32xf32> to vector<8x32xf32>
      %34 = arith.addf %31, %33 : vector<8x32xf32>
      %35 = arith.truncf %34 : vector<8x32xf32> to vector<8x32xbf16>
      %c0_17 = arith.constant 0 : index
      %c0_18 = arith.constant 0 : index
      %36 = vector.load %arg7[%c0_17, %c0_18] : memref<8x32xbf16, #tpu.memory_space<vmem>>, vector<8x32xbf16>
      tpu.vector_store %arg7[%c0_17, %c0_18], %35 {strides = array<i32>} : memref<8x32xbf16, #tpu.memory_space<vmem>>, vector<8x32xbf16>,
    } else {
    }
    %c0 = arith.constant 0 : index
    %c0_1 = arith.constant 0 : index
    %3 = vector.load %arg7[%c0, %c0_1] : memref<8x32xbf16, #tpu.memory_space<vmem>>, vector<8x32xbf16>
    %c0_2 = arith.constant 0 : index
    %c0_3 = arith.constant 0 : index
    %4 = vector.load %arg5[%c0_2, %c0_3] : memref<32x32xbf16, #tpu.memory_space<vmem>>, vector<32x32xbf16>
    %cst = arith.constant dense<0.000000e+00> : vector<8x32xf32>
    %5 = tpu.matmul %3, %4, %cst {dimension_numbers = #tpu.dot_dimension_numbers<[1], [0], [0], [1], [0, 0, 1, 1], [], []>} : vector<8x32xbf16>, vector<32x32xbf16>, vector<8x32xf32> -> vector<8x32xf32>
    %c0_4 = arith.constant 0 : index
    %c0_5 = arith.constant 0 : index
    %6 = vector.load %arg6[%c0_4, %c0_5] : memref<8x32xf32, #tpu.memory_space<vmem>>, vector<8x32xf32>
    tpu.vector_store %arg6[%c0_4, %c0_5], %5 {strides = array<i32>} : memref<8x32xf32, #tpu.memory_space<vmem>>, vector<8x32xf32>,
    return
  }
  func.func @transform_0(%arg0: i32, %arg1: i32) -> (i32, i32) {
    %c0_i32 = arith.constant 0 : i32
    %c0_i32_0 = arith.constant 0 : i32
    return %arg0, %c0_i32 : i32, i32
  }
  func.func @transform_1(%arg0: i32, %arg1: i32) -> (i32, i32) {
    %c0_i32 = arith.constant 0 : i32
    %c0_i32_0 = arith.constant 0 : i32
    %c0_i32_1 = arith.constant 0 : i32
    return %c0_i32, %c0_i32_0 : i32, i32
  }
  func.func @transform_2(%arg0: i32, %arg1: i32) -> (i32, i32) {
    %c0_i32 = arith.constant 0 : i32
    %c0_i32_0 = arith.constant 0 : i32
    %c0_i32_1 = arith.constant 0 : i32
    return %c0_i32, %c0_i32_0 : i32, i32
  }
  func.func @transform_3(%arg0: i32, %arg1: i32) -> (i32, i32) {
    %c0_i32 = arith.constant 0 : i32
    %c0_i32_0 = arith.constant 0 : i32
    return %c0_i32, %arg1 : i32, i32
  }
  func.func @transform_4(%arg0: i32, %arg1: i32) -> (i32, i32) {
    %c0_i32 = arith.constant 0 : i32
    return %arg0, %arg1 : i32, i32
  }
}

module attributes {stable_mosaic.version = 11 : i64} {
  func.func @_logits_kernel(%arg0: memref<1xf32, #tpu.memory_space<smem>>, %arg1: memref<2x32xf32, #tpu.memory_space<vmem>>, %arg2: memref<2x32xf32, #tpu.memory_space<vmem>>, %arg3: memref<2x2xf32, #tpu.memory_space<vmem>>) attributes {dimension_semantics = [], scalar_prefetch = 0 : i64, scratch_operands = 0 : i64, tpu.core_type = #tpu.core_type<tc>} {
    %c0 = arith.constant 0 : index
    %c0_0 = arith.constant 0 : index
    %0 = vector.load %arg1[%c0, %c0_0] : memref<2x32xf32, #tpu.memory_space<vmem>>, vector<2x32xf32>
    %c0_1 = arith.constant 0 : index
    %c0_2 = arith.constant 0 : index
    %1 = vector.load %arg2[%c0_1, %c0_2] : memref<2x32xf32, #tpu.memory_space<vmem>>, vector<2x32xf32>
    %2 = arith.mulf %0, %0 : vector<2x32xf32>
    %cst = arith.constant dense<0.000000e+00> : vector<2xf32>
    %3 = vector.multi_reduction <add>, %2, %cst [1] : vector<2x32xf32> to vector<2xf32>
    %4 = vector.shape_cast %3 : vector<2xf32> to vector<2x1xf32>
    %5 = math.rsqrt %4 : vector<2x1xf32>
    %6 = vector.broadcast %5 : vector<2x1xf32> to vector<2x32xf32>
    %7 = arith.mulf %0, %6 : vector<2x32xf32>
    %8 = arith.mulf %1, %1 : vector<2x32xf32>
    %cst_3 = arith.constant dense<0.000000e+00> : vector<2xf32>
    %9 = vector.multi_reduction <add>, %8, %cst_3 [1] : vector<2x32xf32> to vector<2xf32>
    %10 = vector.shape_cast %9 : vector<2xf32> to vector<2x1xf32>
    %11 = math.rsqrt %10 : vector<2x1xf32>
    %12 = vector.broadcast %11 : vector<2x1xf32> to vector<2x32xf32>
    %13 = arith.mulf %1, %12 : vector<2x32xf32>
    %14 = arith.truncf %7 : vector<2x32xf32> to vector<2x32xbf16>
    %15 = arith.truncf %13 : vector<2x32xf32> to vector<2x32xbf16>
    %cst_4 = arith.constant dense<0.000000e+00> : vector<2x2xf32>
    %16 = tpu.matmul %14, %15, %cst_4 {dimension_numbers = #tpu.dot_dimension_numbers<[1], [1], [0], [0], [0, 0, 1, 0], [], []>} : vector<2x32xbf16>, vector<2x32xbf16>, vector<2x2xf32> -> vector<2x2xf32>
    %c0_5 = arith.constant 0 : index
    %17 = memref.load %arg0[%c0_5] : memref<1xf32, #tpu.memory_space<smem>>
    %18 = vector.broadcast %17 : f32 to vector<2x2xf32>
    %19 = arith.mulf %18, %16 : vector<2x2xf32>
    %c0_6 = arith.constant 0 : index
    %c0_7 = arith.constant 0 : index
    %20 = vector.load %arg3[%c0_6, %c0_7] : memref<2x2xf32, #tpu.memory_space<vmem>>, vector<2x2xf32>
    tpu.vector_store %arg3[%c0_6, %c0_7], %19 {strides = array<i32>} : memref<2x2xf32, #tpu.memory_space<vmem>>, vector<2x2xf32>,
    return
  }
}

</mosaic_0001>

<bundles_post_ra>
// kernel: _lambda_.25
= control target key start
LH: loop header
LB: loop body
LE: loop exit
PB: predicated region body
PF: predicated region fallthrough
CT: control target
= control target key end

     0   :  { %v216_v0 = vmov 0   ;;  %vm26_vm0 = vcmask 1043456   ;;  %vm27_vm1 = vcmask 523268   ;;  %vm133_vm3 = vcmask 523264   ;;  %s277_s1 = inlined_call_operand.vmem [shape: bf16[192,64], index: 1, kind: input, shape index: {}]   ;;  %s278_s0 = inlined_call_operand.vmem [shape: f32[8,192], index: 0, kind: input, shape index: {}]   ;;  %s279_s2 = inlined_call_operand.vmem [shape: bf16[8,64], index: 2, kind: output, shape index: {}]  }
   0x1   :  { %137 = vmatprep.subr.bf16.mxu0 %v216_v0  ;;  %v202_v1 = vld [vmem:[%s277_s1] sm:$0xff]   ;;  %v203_v2 = vld [vmem:[%s277_s1 + $0x8] sm:$0xff]   ;;  %v204_v3 = vld [vmem:[%s277_s1 + $0x10] sm:$0xff]   ;;  %vm178_vm4 = vcmask 519168  }
   0x2   :  { %138 = vmatpush1.bf16.msra.mxu0 %v202_v1  ;;  %v205_v4 = vld [vmem:[%s277_s1 + $0x18] sm:$0xff]   ;;  %v16_v5 = vld [vmem:[%s278_s0] sm:$0xff]  ;;  %v17_v6 = vld [vmem:[%s278_s0 + $0x8] sm:$0xff] }
   0x3   :  { %139 = vmatprep.subr.bf16.mxu0 %v216_v0  ;;  %vm28_vm2 = vmor %vm27_vm1, %vm26_vm0  ;;  %v200_v7 = vpack.c.bf16 %v17_v6, %v16_v5  ;;  %v206_v8 = vld [vmem:[%s277_s1 + $0x20] sm:$0xff]   ;;  %v207_v9 = vld [vmem:[%s277_s1 + $0x28] sm:$0xff]  }
   0x4   :  { %v208_v10 = vld [vmem:[%s277_s1 + $0x30] sm:$0xff]   ;;  %v209_v13 = vld [vmem:[%s277_s1 + $0x38] sm:$0xff]   ;;  %v210_v14 = vld [vmem:[%s277_s1 + $0x40] sm:$0xff]  }
   0x5   :  { %29 = vst.msk [vmem:[#allocation2] sm:$0xff] %vm28_vm2, %v200_v7  ;;  %v211_v15 = vld [vmem:[%s277_s1 + $0x48] sm:$0xff]   ;;  %v212_v16 = vld [vmem:[%s277_s1 + $0x50] sm:$0xff]   ;;  %v213_v17 = vld [vmem:[%s277_s1 + $0x58] sm:$0xff]  }
   0x6   :  { %140 = vmatpush1.bf16.msra.mxu0 %v203_v2 }
   0x7   :  { %141 = vmatprep.subr.bf16.mxu0 %v216_v0 }
   0xa   :  { %142 = vmatpush1.bf16.msra.mxu0 %v204_v3 }
   0xb   :  { %143 = vmatprep.subr.bf16.mxu0 %v216_v0 }
   0xc   :  { %v30_v11 = vld [vmem:[#allocation2] sm:$0xff] }
   0xd   :  { %v186_v12 = vcombine.high %v30_v11, %v30_v11  ;;  %v185_v18 = vcombine.low %v30_v11, %v30_v11 }
   0xe   :  { %144 = vmatpush1.bf16.msra.mxu0 %v205_v4 }
   0xf   :  { %145 = vmatprep.subr.bf16.mxu0 %v216_v0  ;;  %199 = vmatprep.mubr.msk.bf16.mxu0 %vm133_vm3, %v186_v12 }
  0x12   :  { %146 = vmatpush1.bf16.msra.mxu0 %v206_v8 }
  0x13   :  { %147 = vmatprep.subr.bf16.mxu0 %v216_v0 }
  0x16   :  { %148 = vmatpush1.bf16.msra.mxu0 %v207_v9 }
  0x17   :  { %149 = vmatprep.subr.bf16.mxu0 %v216_v0 }
  0x1a   :  { %150 = vmatpush1.bf16.msra.mxu0 %v208_v10 }
  0x1b   :  { %151 = vmatprep.subr.bf16.mxu0 %v216_v0 }
  0x1e   :  { %152 = vmatpush1.bf16.msra.mxu0 %v209_v13 }
  0x1f   :  { %153 = vmatprep.subr.bf16.mxu0 %v216_v0 }
  0x22   :  { %154 = vmatpush1.bf16.msra.mxu0 %v210_v14 }
  0x23   :  { %155 = vmatprep.subr.bf16.mxu0 %v216_v0 }
  0x26   :  { %156 = vmatpush1.bf16.msra.mxu0 %v211_v15 }
  0x27   :  { %157 = vmatprep.subr.bf16.mxu0 %v216_v0 }
  0x2a   :  { %158 = vmatpush1.bf16.msra.mxu0 %v212_v16 }
  0x2b   :  { %159 = vmatprep.subr.bf16.mxu0 %v216_v0 }
  0x2e   :  { %160 = vmatpush1.bf16.msra.mxu0 %v213_v17 }
  0x31   :  { %170 = vmatmul.mubr.bf16.vlgmr.msra.gmra.mrb[0].mxu0 %v185_v18 }
 0x104   :  { %v171_v19 = vpop.f32.mrb[0].mxu0 }
 0x105   :  { %v177_v20 = vpack.c.bf16 %v171_v19, %v171_v19  ;;  %v173_v21 = vpop.f32.mrb[1].mxu0 }
 0x106   :  { %v174_v22 = vpop.f32.mrb[2].mxu0 }
 0x107   :  { %179 = vst.msk [vmem:[%s279_s2] sm:$0xf] %vm178_vm4, %v177_v20  ;;  %v175_v23 = vpop.f32.mrb[3].mxu0 }

// kernel: _lambda_.26
= control target key start
LH: loop header
LB: loop body
LE: loop exit
PB: predicated region body
PF: predicated region fallthrough
CT: control target
= control target key end

     0   :  { %s380_s18 = smov 0   ;;  %s413_s0 = inlined_call_operand.vmem [shape: bf16[2,4,64], index: 0, kind: input, shape index: {}]   ;;  %s414_s1 = inlined_call_operand.vmem [shape: f32[1,64], index: 1, kind: input, shape index: {}]   ;;  %s415_s2 = inlined_call_operand.vmem [shape: f32[5,64], index: 2, kind: input, shape index: {}]   ;;  %s416_s3 = inlined_call_operand.vmem [shape: f32[1,64], index: 3, kind: input, shape index: {}]   ;;  %s417_s4 = inlined_call_operand.vmem [shape: f32[1,64], index: 4, kind: input, shape index: {}]   ;;  %s418_s5 = inlined_call_operand.vmem [shape: bf16[2,5,64], index: 5, kind: output, shape index: {}]  }
   0x1 LB: > { %s321_s19 = sadd.s32 4294967295, %s348_s18   ;;  %p325_p0 = scmp.ge.s32.totalorder %s348_s18, 1  ;;  %s348_s18 = sphi %s380_s18, %s15_s18  }
   0x2   : > { %p186_p1 = scmp.lt.s32.totalorder %s348_s18, 3 }
   0x4   : > { %p187_p2 = pnand %p325_p0, %p186_p1 }
   0x5   : > { %p212_p3 = scmp.lt.s32.totalorder (!%p187_p2), %s321_s19, 1  ;;  %v222_v2 = vld [vmem:[%s414_s1] sm:$0x1] (!%p187_p2)  ;;  %vm227_vm0 = vcmask (!%p187_p2), 1040384   ;;  %vm230_vm1 = vcmask (!%p187_p2), 520192   ;;  %vm262_vm2 = vcmask (!%p187_p2), 518144  }
   0x6   : > { %190 = sbr.rel (%p187_p2) target bundleno = 341 (0x155), region = 40  ;;  %v223_v3 = vld [vmem:[%s415_s2] sm:$0x1f] (!%p187_p2)  ;;  %vm263_vm3 = vsmask.f32 (!%p187_p2), 2304 }
   0x7   : > { %v328_v17 = vld [vmem:[%s416_s3] ss:$0 sm:$0xff] (!%p187_p2)  ;;  %vm264_vm4 = vmand (!%p187_p2), %vm262_vm2, %vm263_vm3 }
   0x8   : > { %v329_v19 = vld [vmem:[%s417_s4] ss:$0 sm:$0xff] (!%p187_p2) }
   0xd   : > { %s420_s19 = smov (!%p212_p3, %s321_s19), 1 }
   0xe   : > { %s326_s20 = sshll.u32 %s420_s19, 1  ;;  %s327_s28 = sshll.u32 %s420_s19, 2 }
   0xf   : > { %s215_s23 = scalar_lea.vmem %s413_s0, %s326_s20  ;;  %s219_s10 = scalar_lea.vmem %s418_s5, %s327_s28 }
  0x10   : > { %v220_v0 = vld [vmem:[%s215_s23] sm:$0x3] }
  0x11   : > { %v221_v1 = vunpack.c.l.bf16 %v220_v0  ;;  %v265_v22 = vld [vmem:[%s219_s10] sm:$0x7] }
  0x13   : > { %v225_v4 = vrot.slane %v221_v1, 7 }
  0x15   : > { %v228_v5 = vsel %vm227_vm0, %v222_v2, %v225_v4 }
  0x16   : > { %v229_v6 = vadd.f32 %v228_v5, %v223_v3 }
  0x18   : > { %v231_v7 = vsel %vm230_vm1, %v229_v6, 0.0 }
  0x19   : > { %232 = vadd.xlane.f32.xlu0 %v231_v7 }
  0xa6   : > { %v233_v8 = vpop.xlane.xlu0 %232 }
  0xa7   : > { %v235_v9 = vmul.f32 0.015625, %v233_v8 }
  0xa9   : > { %v236_v10 = vsub.f32 %v229_v6, %v235_v9 }
  0xab   : > { %v237_v11 = vmul.f32 %v236_v10, %v236_v10 }
  0xad   : > { %v238_v12 = vsel %vm230_vm1, %v237_v11, 0.0 }
  0xae   : > { %239 = vadd.xlane.f32.xlu0 %v238_v12 }
 0x13b   : > { %v240_v13 = vpop.xlane.xlu0 %239 }
 0x13c   : > { %v241_v14 = vmul.f32 0.015625, %v240_v13 }
 0x13e   : > { %v242_v15 = vadd.f32 1e-05, %v241_v14 }
 0x140   : > { %340 = vrsqrt.f32 %v242_v15 }
 0x14a   : > { %v341_v16 = vpop.eup %340 }
 0x14b   : > { %v244_v18 = vmul.f32 %v341_v16, %v236_v10 }
 0x14d   : > { %v252_v20 = vmul.f32 %v328_v17, %v244_v18 }
 0x14f   : > { %v260_v21 = vadd.f32 %v329_v19, %v252_v20 }
 0x151   : > { %v261_v23 = vpack.c.bf16 %v260_v21, %v260_v21 }
 0x153   : > { %v266_v24 = vsel %vm264_vm4, %v261_v23, %v265_v22 }
 0x154   : > { %267 = vst [vmem:[%s219_s10] sm:$0x7] %v266_v24 }
 0x155 PF: > { %s15_s18 = sadd.s32 1, %s348_s18  }
 0x156   : > { %p12_p4 = scmp.ge.s32.totalorder %s15_s18, 4  }
 0x158   :  { %14 = sbr.rel (!%p12_p4) target bundleno = 1 (0x1), region = 70 }

// kernel: _lambda_.27
= control target key start
LH: loop header
LB: loop body
LE: loop exit
PB: predicated region body
PF: predicated region fallthrough
CT: control target
= control target key end

     0   :  { %vm29_vm0 = vcmask 523264   ;;  %v242_v23 = vmov 0   ;;  %v88_v42 = vlaneseq  ;;  %vm197_vm1 = vcmask 1043456   ;;  %s321_s0 = inlined_call_operand.vmem [shape: bf16[10,64], index: 0, kind: input, shape index: {}]   ;;  %s322_s3 = inlined_call_operand.vmem [shape: bf16[64,192], index: 3, kind: input, shape index: {}]   ;;  %s323_s1 = inlined_call_operand.vmem [shape: f32[1,64], index: 1, kind: input, shape index: {}]   ;;  %s324_s2 = inlined_call_operand.vmem [shape: f32[1,64], index: 2, kind: input, shape index: {}]   ;;  %s325_s4 = inlined_call_operand.vmem [shape: f32[1,192], index: 4, kind: input, shape index: {}]   ;;  %s326_s5 = inlined_call_operand.vmem [shape: bf16[10,192], index: 5, kind: output, shape index: {}]  }
   0x1   :  { %v222_v0 = vld [vmem:[%s321_s0] sm:$0xff]   ;;  %v229_v17 = vld [vmem:[%s322_s3 + $0x14] ss:$8 sps:$4 sm:$0xff]   ;;  %v231_v18 = vld [vmem:[%s322_s3 + $0x10] ss:$8 sps:$4 sm:$0xff]   ;;  %174 = vmatprep.mubr.bf16.mxu0 %v242_v23  ;;  %vm198_vm2 = vcmask 523268  }
   0x2   :  { %v223_v1 = vunpack.c.l.bf16 %v222_v0  ;;  %v224_v2 = vunpack.c.h.bf16 %v222_v0  ;;  %v226_v15 = vld [vmem:[%s322_s3 + $0x4] ss:$8 sps:$4 sm:$0xff]   ;;  %v228_v16 = vld [vmem:[%s322_s3] ss:$8 sps:$4 sm:$0xff]   ;;  %v235_v21 = vld [vmem:[%s322_s3 + $0x34] ss:$8 sps:$4 sm:$0xff]  }
   0x3   :  { %142 = vmatprep.subr.bf16.mxu0 %v226_v15  ;;  %v232_v19 = vld [vmem:[%s322_s3 + $0x24] ss:$8 sps:$4 sm:$0xff]   ;;  %v234_v20 = vld [vmem:[%s322_s3 + $0x20] ss:$8 sps:$4 sm:$0xff]   ;;  %v237_v22 = vld [vmem:[%s322_s3 + $0x30] ss:$8 sps:$4 sm:$0xff]  }
   0x4   :  { %v30_v3 = vsel %vm29_vm0, %v223_v1, 0.0  ;;  %v33_v4 = vsel %vm29_vm0, %v224_v2, 0.0  ;;  %143 = vmatpush1.bf16.msra.mxu0 %v228_v16  ;;  %v206_v32 = vld [vmem:[%s323_s1] ss:$0 sm:$0xff]  ;;  %v89_v43 = vshrl.u32 %v88_v42, 7  ;;  %vm199_vm3 = vmor %vm198_vm2, %vm197_vm1 }
   0x5   :  { %31 = vadd.xlane.f32.xlu0 %v30_v3  ;;  %144 = vmatprep.subr.bf16.mxu0 %v229_v17  ;;  %v207_v36 = vld [vmem:[%s324_s2] ss:$0 sm:$0xff] }
   0x6   :  { %v90_v44 = vsub.s32 0, %v89_v43  ;;  %v86_v45 = vld [vmem:[%s325_s4] sm:$0x3]  ;;  %v94_v46 = vsub.s32 1, %v89_v43 }
   0x8   :  { %145 = vmatpush1.bf16.msra.mxu0 %v231_v18  ;;  %v91_v47 = vrot.slane %v86_v45, %v90_v44  ;;  %v95_v48 = vrot.slane %v86_v45, %v94_v46 }
   0x9   :  { %34 = vadd.xlane.f32.xlu0 %v33_v4  ;;  %146 = vmatprep.subr.bf16.mxu0 %v232_v19 }
   0xc   :  { %147 = vmatpush1.bf16.msra.mxu0 %v234_v20 }
   0xd   :  { %148 = vmatprep.subr.bf16.mxu0 %v235_v21 }
  0x10   :  { %149 = vmatpush1.bf16.msra.mxu0 %v237_v22 }
  0x92   :  { %v32_v5 = vpop.xlane.xlu0 %31 }
  0x93   :  { %v37_v6 = vmul.f32 0.015625, %v32_v5 }
  0x95   :  { %v39_v7 = vsub.f32 %v223_v1, %v37_v6 }
  0x96   :  { %v35_v8 = vpop.xlane.xlu0 %34 }
  0x97   :  { %v38_v9 = vmul.f32 0.015625, %v35_v8  ;;  %v41_v10 = vmul.f32 %v39_v7, %v39_v7 }
  0x99   :  { %v40_v11 = vsub.f32 %v224_v2, %v38_v9  ;;  %v43_v12 = vsel %vm29_vm0, %v41_v10, 0.0 }
  0x9a   :  { %44 = vadd.xlane.f32.xlu1 %v43_v12 }
  0x9b   :  { %v42_v13 = vmul.f32 %v40_v11, %v40_v11 }
  0x9d   :  { %v46_v14 = vsel %vm29_vm0, %v42_v13, 0.0 }
  0x9e   :  { %47 = vadd.xlane.f32.xlu1 %v46_v14 }
 0x127   :  { %v45_v24 = vpop.xlane.xlu1 %44 }
 0x128   :  { %v49_v25 = vmul.f32 0.015625, %v45_v24 }
 0x12a   :  { %v51_v26 = vadd.f32 1e-05, %v49_v25 }
 0x12b   :  { %v48_v27 = vpop.xlane.xlu1 %47 }
 0x12c   :  { %238 = vrsqrt.f32 %v51_v26  ;;  %v50_v28 = vmul.f32 0.015625, %v48_v27 }
 0x12e   :  { %v52_v29 = vadd.f32 1e-05, %v50_v28 }
 0x130   :  { %240 = vrsqrt.f32 %v52_v29 }
 0x136   :  { %v239_v30 = vpop.eup %238 }
 0x137   :  { %v55_v31 = vmul.f32 %v239_v30, %v39_v7 }
 0x139   :  { %v64_v34 = vmul.f32 %v206_v32, %v55_v31 }
 0x13a   :  { %v241_v33 = vpop.eup %240 }
 0x13b   :  { %v56_v35 = vmul.f32 %v241_v33, %v40_v11  ;;  %v73_v38 = vadd.f32 %v207_v36, %v64_v34 }
 0x13d   :  { %v65_v37 = vmul.f32 %v206_v32, %v56_v35 }
 0x13f   :  { %v74_v39 = vadd.f32 %v207_v36, %v65_v37 }
 0x141   :  { %v75_v40 = vpack.c.bf16 %v74_v39, %v73_v38 }
 0x143   :  { %76 = vst.msk [vmem:[#allocation2] sm:$0xff] %vm29_vm0, %v75_v40 }
 0x14a   :  { %v77_v41 = vld [vmem:[#allocation2] sm:$0xff] }
 0x14b   :  { %216 = vmatmul.mubr.msk.bf16.vlgmr.msra.gmra.mrb[0].mxu0 %vm29_vm0, %v77_v41 }
 0x21e   :  { %v176_v49 = vpop.f32.mrb[0].mxu0 }
 0x21f   :  { %v177_v50 = vadd.f32 %v176_v49, %v91_v47  ;;  %v178_v51 = vpop.f32.mrb[1].mxu0 }
 0x220   :  { %v179_v52 = vadd.f32 %v178_v51, %v95_v48  ;;  %v180_v53 = vpop.f32.mrb[2].mxu0 }
 0x221   :  { %v181_v54 = vadd.f32 %v180_v53, %v91_v47  ;;  %v182_v55 = vpop.f32.mrb[3].mxu0 }
 0x222   :  { %v219_v56 = vpack.c.bf16 %v179_v52, %v177_v50  ;;  %v183_v57 = vadd.f32 %v182_v55, %v95_v48 }
 0x224   :  { %200 = vst.msk [vmem:[%s326_s5] sm:$0xff] %vm199_vm3, %v219_v56  ;;  %v220_v58 = vpack.c.bf16 %v183_v57, %v181_v54 }
 0x226   :  { %201 = vst.msk [vmem:[%s326_s5 + $0x8] sm:$0xff] %vm199_vm3, %v220_v58 }

// kernel: _lambda_.28
= control target key start
LH: loop header
LB: loop body
LE: loop exit
PB: predicated region body
PF: predicated region fallthrough
CT: control target
= control target key end

     0   :  { %s366_s6 = smov 0   ;;  %s387_s0 = inlined_call_operand.vmem [shape: bf16[2,5,192], index: 0, kind: input, shape index: {}]   ;;  %s388_s1 = inlined_call_operand.vmem [shape: bf16[2,5,64], index: 1, kind: output, shape index: {}]  }
   0x1 LB: > { %s295_s7 = sadd.s32 4294967295, %s350_s6   ;;  %p299_p0 = scmp.ge.s32.totalorder %s350_s6, 1  ;;  %s350_s6 = sphi %s366_s6, %s11_s6  }
   0x2   : > { %p87_p1 = scmp.lt.s32.totalorder %s350_s6, 3 }
   0x4   : > { %p88_p2 = pnand %p299_p0, %p87_p1 }
   0x5   : > { %p106_p3 = scmp.lt.s32.totalorder (!%p88_p2), %s295_s7, 1  ;;  %v352_v0 = vmov (!%p88_p2), 0.0   ;;  %vm353_vm0 = vmmov (!%p88_p2), 0   ;;  %s354_s12 = smov (!%p88_p2), 64   ;;  %vm122_vm1 = vcmask (!%p88_p2), 523264   ;;  %vm169_vm2 = vcmask (!%p88_p2), 36864  }
   0x6   : > { %91 = sbr.rel (%p88_p2) target bundleno = 886 (0x376), region = 24  ;;  %314 = vmatprep.subr.bf16.mxu0 (!%p88_p2), %v352_v0  ;;  %316 = vmatprep.mubr.msk.bf16.mxu0 (!%p88_p2), %vm353_vm0, %v352_v0  ;;  %vm188_vm3 = vcmask (!%p88_p2), 1041408   ;;  %vm189_vm4 = vcmask (!%p88_p2), 1042432   ;;  %v355_v16 = vmov (!%p88_p2), 65535   ;;  %vm184_vm5 = vcmask (!%p88_p2), 39936  }
   0x7   : > { %320 = vmatprep.subr.bf16.mxu1 (!%p88_p2), %v352_v0  ;;  %322 = vmatprep.mubr.msk.bf16.mxu1 (!%p88_p2), %vm353_vm0, %v352_v0  ;;  %v190_v17 = vsel (!%p88_p2), %vm188_vm3, 4294967295, %v355_v16  ;;  %vm236_vm6 = vcmask (!%p88_p2), 518144   ;;  %vm237_vm7 = vsmask.f32 (!%p88_p2), 2304 }
   0x8   : > { %v191_v18 = vsel (!%p88_p2), %vm189_vm4, %v190_v17, 0  ;;  %vm238_vm8 = vmand (!%p88_p2), %vm236_vm6, %vm237_vm7 }
   0xd   : > { %s390_s7 = smov (!%p106_p3, %s295_s7), 1 }
   0xe   : > { %s309_s8 = sshll.u32 %s390_s7, 3  ;;  %s302_s13 = sshll.u32 %s390_s7, 2 }
   0xf   : > { %s110_s11 = scalar_lea.vmem %s387_s0, %s309_s8  ;;  %s114_s16 = scalar_lea.vmem %s388_s1, %s302_s13 }
  0x10   : > { %v116_v1 = vld [vmem:[%s110_s11] sm:$0x77] }
  0x11   : > { %v303_v2 = vcombine.low %v116_v1, %v116_v1  ;;  %v305_v15 = vcombine.high %v116_v1, %v116_v1  ;;  %v239_v25 = vld [vmem:[%s114_s16] sm:$0x7] }
  0x13   : > { %120 = vrot.lane.b32.xlu0 %v303_v2, %s354_s12  ;;  %v193_v19 = vand.u32 %v305_v15, %v191_v18 }
  0x15   : > { %321 = vmatpush3.bf16.msra.mxu1 %v193_v19 }
  0x85   : > { %v121_v3 = vpop.permute.xlu0 %120 }
  0x86   : > { %v127_v4 = vsel %vm122_vm1, %v121_v3, 0 }
  0x87   : > { %315 = vmatpush3.bf16.xpose.msra.mxu0 %v127_v4 }
  0x8e   : > { %317 = vmatmul.mubr.msk.bf16.vlgmr.msra.gmra.mrb[0].mxu0 %vm122_vm1, %v116_v1 }
 0x161   : > { %v163_v5 = vpop.f32.mrb[0].mxu0 }
 0x162   : > { %v318_v6 = vpop.f32.mrb[1].mxu0  ;;  %v170_v7 = vsel %vm169_vm2, %v163_v5, -inf }
 0x163   : > { %171 = vmax.xlane.f32.xlu0 %v170_v7  ;;  %v166_v8 = vpop.f32.mrb[2].mxu0 }
 0x164   : > { %v319_v9 = vpop.f32.mrb[3].mxu0 }
 0x1f0   : > { %v172_v10 = vpop.xlane.xlu0 %171 }
 0x1f1   : > { %v173_v11 = vsub.f32 %v163_v5, %v172_v10 }
 0x1f3   : > { %v174_v12 = vmul.f32 1.442695, %v173_v11 }
 0x1f5   : > { %340 = vpow2.f32 %v174_v12 }
 0x1ff   : > { %v341_v13 = vpop.eup %340 }
 0x200   : > { %v176_v14 = vsel %vm169_vm2, %v341_v13, 0.0 }
 0x201   : > { %177 = vadd.xlane.f32.xlu1 %v176_v14 }
 0x28e   : > { %v178_v20 = vpop.xlane.xlu1 %177 }
 0x28f   : > { %342 = vrcp.f32 %v178_v20 }
 0x299   : > { %v343_v21 = vpop.eup %342 }
 0x29a   : > { %v180_v22 = vmul.f32 %v343_v21, %v341_v13 }
 0x29c   : > { %v181_v23 = vpack.c.bf16 %v180_v22, %v180_v22 }
 0x29e   : > { %323 = vmatmul.mubr.msk.bf16.vlgmr.msra.gmra.mrb[0].mxu1 %vm184_vm5, %v181_v23 }
 0x371   : > { %v229_v24 = vpop.f32.mrb[0].mxu1 }
 0x372   : > { %v235_v26 = vpack.c.bf16 %v229_v24, %v229_v24  ;;  %v324_v27 = vpop.f32.mrb[1].mxu1 }
 0x373   : > { %v232_v28 = vpop.f32.mrb[2].mxu1 }
 0x374   : > { %v240_v29 = vsel %vm238_vm8, %v235_v26, %v239_v25  ;;  %v325_v30 = vpop.f32.mrb[3].mxu1 }
 0x375   : > { %241 = vst [vmem:[%s114_s16] sm:$0x7] %v240_v29 }
 0x376 PF: > { %s11_s6 = sadd.s32 1, %s350_s6  }
 0x377   : > { %p8_p4 = scmp.ge.s32.totalorder %s11_s6, 4  }
 0x379   :  { %10 = sbr.rel (!%p8_p4) target bundleno = 1 (0x1), region = 54 }

// kernel: _lambda_.29
= control target key start
LH: loop header
LB: loop body
LE: loop exit
PB: predicated region body
PF: predicated region fallthrough
CT: control target
= control target key end

     0   :  { %v177_v0 = vmov 0.0   ;;  %vm178_vm0 = vmmov 0   ;;  %vm30_vm1 = vcmask 523264   ;;  %vm131_vm2 = vcmask 519168   ;;  %s231_s1 = inlined_call_operand.vmem [shape: bf16[64,64], index: 1, kind: input, shape index: {}]   ;;  %s232_s0 = inlined_call_operand.vmem [shape: bf16[10,64], index: 0, kind: input, shape index: {}]   ;;  %s233_s3 = inlined_call_operand.vmem [shape: bf16[10,64], index: 3, kind: input, shape index: {}]   ;;  %s234_s2 = inlined_call_operand.vmem [shape: f32[1,64], index: 2, kind: input, shape index: {}]   ;;  %s235_s4 = inlined_call_operand.vmem [shape: bf16[10,64], index: 4, kind: output, shape index: {}]  }
   0x1   :  { %158 = vmatprep.subr.bf16.mxu0 %v177_v0  ;;  %v172_v1 = vld [vmem:[%s231_s1] sm:$0xff]   ;;  %166 = vmatprep.mubr.msk.bf16.mxu0 %vm178_vm0, %v177_v0  ;;  %v173_v2 = vld [vmem:[%s231_s1 + $0x8] sm:$0xff]   ;;  %v174_v4 = vld [vmem:[%s231_s1 + $0x10] sm:$0xff]  }
   0x2   :  { %159 = vmatpush3.bf16.msra.mxu0 %v172_v1  ;;  %v176_v3 = vld [vmem:[%s232_s0] sm:$0xff]   ;;  %v175_v5 = vld [vmem:[%s231_s1 + $0x18] sm:$0xff]  }
   0x3   :  { %160 = vmatprep.subr.bf16.mxu0 %v177_v0  ;;  %31 = vst.msk [vmem:[#allocation2] sm:$0xff] %vm30_vm1, %v176_v3  ;;  %v150_v7 = vld [vmem:[%s233_s3] sm:$0xff]  }
   0x4   :  { %v139_v8 = vld [vmem:[%s234_s2] ss:$0 sm:$0xff]  ;;  %v151_v9 = vunpack.c.l.bf16 %v150_v7  ;;  %v152_v13 = vunpack.c.h.bf16 %v150_v7 }
   0x6   :  { %161 = vmatpush3.bf16.msra.mxu0 %v173_v2 }
   0x7   :  { %162 = vmatprep.subr.bf16.mxu0 %v177_v0 }
   0xa   :  { %163 = vmatpush3.bf16.msra.mxu0 %v174_v4  ;;  %v32_v6 = vld [vmem:[#allocation2] sm:$0xff] }
   0xb   :  { %164 = vmatprep.subr.bf16.mxu0 %v177_v0 }
   0xe   :  { %165 = vmatpush3.bf16.msra.mxu0 %v175_v5 }
  0x11   :  { %167 = vmatmul.mubr.msk.bf16.vlgmr.msra.gmra.mrb[0].mxu0 %vm30_vm1, %v32_v6 }
  0xe4   :  { %v110_v10 = vpop.f32.mrb[0].mxu0 }
  0xe5   :  { %v111_v11 = vadd.f32 %v139_v8, %v110_v10  ;;  %v168_v12 = vpop.f32.mrb[1].mxu0 }
  0xe6   :  { %v113_v14 = vpop.f32.mrb[2].mxu0 }
  0xe7   :  { %v121_v15 = vadd.f32 %v151_v9, %v111_v11  ;;  %v114_v16 = vadd.f32 %v139_v8, %v113_v14  ;;  %v169_v17 = vpop.f32.mrb[3].mxu0 }
  0xe9   :  { %v147_v18 = vpack.c.bf16 %v121_v15, %v121_v15  ;;  %v122_v19 = vadd.f32 %v152_v13, %v114_v16 }
  0xeb   :  { %132 = vst.msk [vmem:[%s235_s4] sm:$0xf] %vm131_vm2, %v147_v18  ;;  %v148_v20 = vpack.c.bf16 %v122_v19, %v122_v19 }
  0xed   :  { %133 = vst.msk [vmem:[%s235_s4 + $0x4] sm:$0xf] %vm131_vm2, %v148_v20 }

// kernel: _lambda_.30
= control target key start
LH: loop header
LB: loop body
LE: loop exit
PB: predicated region body
PF: predicated region fallthrough
CT: control target
= control target key end

     0   :  { %vm29_vm0 = vcmask 523264   ;;  %v291_v23 = vmov 0   ;;  %v88_v42 = vlaneseq  ;;  %s370_s0 = inlined_call_operand.vmem [shape: bf16[10,64], index: 0, kind: input, shape index: {}]   ;;  %s371_s3 = inlined_call_operand.vmem [shape: bf16[64,256], index: 3, kind: input, shape index: {}]   ;;  %s372_s1 = inlined_call_operand.vmem [shape: f32[1,64], index: 1, kind: input, shape index: {}]   ;;  %s373_s2 = inlined_call_operand.vmem [shape: f32[1,64], index: 2, kind: input, shape index: {}]   ;;  %s374_s4 = inlined_call_operand.vmem [shape: f32[1,256], index: 4, kind: input, shape index: {}]   ;;  %s375_s5 = inlined_call_operand.vmem [shape: bf16[10,256], index: 5, kind: output, shape index: {}]  }
   0x1   :  { %v255_v0 = vld [vmem:[%s370_s0] sm:$0xff]   ;;  %v262_v17 = vld [vmem:[%s371_s3 + $0x14] ss:$8 sps:$4 sm:$0xff]   ;;  %v264_v18 = vld [vmem:[%s371_s3 + $0x10] ss:$8 sps:$4 sm:$0xff]   ;;  %174 = vmatprep.mubr.bf16.mxu0 %v291_v23 }
   0x2   :  { %v256_v1 = vunpack.c.l.bf16 %v255_v0  ;;  %v257_v2 = vunpack.c.h.bf16 %v255_v0  ;;  %v259_v15 = vld [vmem:[%s371_s3 + $0x4] ss:$8 sps:$4 sm:$0xff]   ;;  %v261_v16 = vld [vmem:[%s371_s3] ss:$8 sps:$4 sm:$0xff]   ;;  %v268_v21 = vld [vmem:[%s371_s3 + $0x34] ss:$8 sps:$4 sm:$0xff]  }
   0x3   :  { %142 = vmatprep.subr.bf16.mxu0 %v259_v15  ;;  %v265_v19 = vld [vmem:[%s371_s3 + $0x24] ss:$8 sps:$4 sm:$0xff]   ;;  %v267_v20 = vld [vmem:[%s371_s3 + $0x20] ss:$8 sps:$4 sm:$0xff]   ;;  %v270_v22 = vld [vmem:[%s371_s3 + $0x30] ss:$8 sps:$4 sm:$0xff]  }
   0x4   :  { %v30_v3 = vsel %vm29_vm0, %v256_v1, 0.0  ;;  %v33_v4 = vsel %vm29_vm0, %v257_v2, 0.0  ;;  %143 = vmatpush1.bf16.msra.mxu0 %v261_v16  ;;  %v235_v32 = vld [vmem:[%s372_s1] ss:$0 sm:$0xff]  ;;  %v89_v43 = vshrl.u32 %v88_v42, 7 }
   0x5   :  { %31 = vadd.xlane.f32.xlu0 %v30_v3  ;;  %144 = vmatprep.subr.bf16.mxu0 %v262_v17  ;;  %v236_v36 = vld [vmem:[%s373_s2] ss:$0 sm:$0xff] }
   0x6   :  { %v90_v44 = vsub.s32 0, %v89_v43  ;;  %v86_v45 = vld [vmem:[%s374_s4] sm:$0x3]  ;;  %v94_v46 = vsub.s32 1, %v89_v43 }
   0x8   :  { %145 = vmatpush1.bf16.msra.mxu0 %v264_v18  ;;  %v91_v47 = vrot.slane %v86_v45, %v90_v44  ;;  %v95_v48 = vrot.slane %v86_v45, %v94_v46 }
   0x9   :  { %34 = vadd.xlane.f32.xlu0 %v33_v4  ;;  %146 = vmatprep.subr.bf16.mxu0 %v265_v19 }
   0xc   :  { %147 = vmatpush1.bf16.msra.mxu0 %v267_v20 }
   0xd   :  { %148 = vmatprep.subr.bf16.mxu0 %v268_v21 }
  0x10   :  { %149 = vmatpush1.bf16.msra.mxu0 %v270_v22 }
  0x92   :  { %v32_v5 = vpop.xlane.xlu0 %31 }
  0x93   :  { %v37_v6 = vmul.f32 0.015625, %v32_v5 }
  0x95   :  { %v39_v7 = vsub.f32 %v256_v1, %v37_v6 }
  0x96   :  { %v35_v8 = vpop.xlane.xlu0 %34 }
  0x97   :  { %v38_v9 = vmul.f32 0.015625, %v35_v8  ;;  %v41_v10 = vmul.f32 %v39_v7, %v39_v7 }
  0x99   :  { %v40_v11 = vsub.f32 %v257_v2, %v38_v9  ;;  %v43_v12 = vsel %vm29_vm0, %v41_v10, 0.0 }
  0x9a   :  { %44 = vadd.xlane.f32.xlu1 %v43_v12 }
  0x9b   :  { %v42_v13 = vmul.f32 %v40_v11, %v40_v11 }
  0x9d   :  { %v46_v14 = vsel %vm29_vm0, %v42_v13, 0.0 }
  0x9e   :  { %47 = vadd.xlane.f32.xlu1 %v46_v14 }
 0x127   :  { %v45_v24 = vpop.xlane.xlu1 %44 }
 0x128   :  { %v49_v25 = vmul.f32 0.015625, %v45_v24 }
 0x12a   :  { %v51_v26 = vadd.f32 1e-05, %v49_v25 }
 0x12b   :  { %v48_v27 = vpop.xlane.xlu1 %47 }
 0x12c   :  { %271 = vrsqrt.f32 %v51_v26  ;;  %v50_v28 = vmul.f32 0.015625, %v48_v27 }
 0x12e   :  { %v52_v29 = vadd.f32 1e-05, %v50_v28 }
 0x130   :  { %273 = vrsqrt.f32 %v52_v29 }
 0x136   :  { %v272_v30 = vpop.eup %271 }
 0x137   :  { %v55_v31 = vmul.f32 %v272_v30, %v39_v7 }
 0x139   :  { %v64_v34 = vmul.f32 %v235_v32, %v55_v31 }
 0x13a   :  { %v274_v33 = vpop.eup %273 }
 0x13b   :  { %v56_v35 = vmul.f32 %v274_v33, %v40_v11  ;;  %v73_v38 = vadd.f32 %v236_v36, %v64_v34 }
 0x13d   :  { %v65_v37 = vmul.f32 %v235_v32, %v56_v35 }
 0x13f   :  { %v74_v39 = vadd.f32 %v236_v36, %v65_v37 }
 0x141   :  { %v75_v40 = vpack.c.bf16 %v74_v39, %v73_v38 }
 0x143   :  { %76 = vst.msk [vmem:[#allocation2] sm:$0xff] %vm29_vm0, %v75_v40 }
 0x14a   :  { %v77_v41 = vld [vmem:[#allocation2] sm:$0xff] }
 0x14b   :  { %245 = vmatmul.mubr.msk.bf16.vlgmr.msra.gmra.mrb[0].mxu0 %vm29_vm0, %v77_v41 }
 0x21e   :  { %v176_v49 = vpop.f32.mrb[0].mxu0 }
 0x21f   :  { %v177_v50 = vadd.f32 %v176_v49, %v91_v47  ;;  %v178_v51 = vpop.f32.mrb[1].mxu0 }
 0x220   :  { %v179_v52 = vadd.f32 %v178_v51, %v95_v48  ;;  %v180_v53 = vpop.f32.mrb[2].mxu0 }
 0x221   :  { %v246_v54 = vmul.f32 -1.702, %v177_v50  ;;  %v181_v55 = vadd.f32 %v180_v53, %v91_v47  ;;  %v182_v56 = vpop.f32.mrb[3].mxu0 }
 0x222   :  { %v247_v57 = vmul.f32 -1.702, %v179_v52  ;;  %v183_v58 = vadd.f32 %v182_v56, %v95_v48 }
 0x223   :  { %v193_v59 = vmul.f32 1.442695, %v246_v54  ;;  %v248_v60 = vmul.f32 -1.702, %v181_v55 }
 0x224   :  { %v195_v61 = vmul.f32 1.442695, %v247_v57  ;;  %v249_v62 = vmul.f32 -1.702, %v183_v58 }
 0x225   :  { %275 = vpow2.f32 %v193_v59  ;;  %v197_v63 = vmul.f32 1.442695, %v248_v60 }
 0x226   :  { %277 = vpow2.f32 %v195_v61  ;;  %v199_v0 = vmul.f32 1.442695, %v249_v62 }
 0x227   :  { %279 = vpow2.f32 %v197_v63 }
 0x228   :  { %281 = vpow2.f32 %v199_v0 }
 0x22f   :  { %v276_v1 = vpop.eup %275 }
 0x230   :  { %v278_v2 = vpop.eup %277  ;;  %v201_v3 = vadd.f32 1.0, %v276_v1 }
 0x231   :  { %v280_v4 = vpop.eup %279  ;;  %v202_v5 = vadd.f32 1.0, %v278_v2 }
 0x232   :  { %v282_v6 = vpop.eup %281  ;;  %283 = vrcp.f32 %v201_v3  ;;  %v203_v7 = vadd.f32 1.0, %v280_v4 }
 0x233   :  { %285 = vrcp.f32 %v202_v5  ;;  %v204_v8 = vadd.f32 1.0, %v282_v6 }
 0x234   :  { %287 = vrcp.f32 %v203_v7 }
 0x235   :  { %289 = vrcp.f32 %v204_v8 }
 0x23c   :  { %v284_v9 = vpop.eup %283 }
 0x23d   :  { %v286_v10 = vpop.eup %285  ;;  %v213_v11 = vmul.f32 %v284_v9, %v177_v50 }
 0x23e   :  { %v288_v12 = vpop.eup %287  ;;  %v214_v13 = vmul.f32 %v286_v10, %v179_v52 }
 0x23f   :  { %v290_v14 = vpop.eup %289  ;;  %v215_v15 = vmul.f32 %v288_v12, %v181_v55 }
 0x240   :  { %v252_v16 = vpack.c.bf16 %v214_v13, %v213_v11  ;;  %v216_v17 = vmul.f32 %v290_v14, %v183_v58 }
 0x242   :  { %229 = vst [vmem:[%s375_s5] sm:$0xff] %v252_v16  ;;  %v253_v18 = vpack.c.bf16 %v216_v17, %v215_v15 }
 0x244   :  { %230 = vst [vmem:[%s375_s5 + $0x8] sm:$0xff] %v253_v18 }

// kernel: _lambda_.31
= control target key start
LH: loop header
LB: loop body
LE: loop exit
PB: predicated region body
PF: predicated region fallthrough
CT: control target
= control target key end

     0   :  { %vm228_vm0 = vcmask 519168   ;;  %s394_s1 = inlined_call_operand.vmem [shape: bf16[256,64], index: 1, kind: input, shape index: {}]   ;;  %s395_s0 = inlined_call_operand.vmem [shape: bf16[10,256], index: 0, kind: input, shape index: {}]   ;;  %s396_s3 = inlined_call_operand.vmem [shape: bf16[10,64], index: 3, kind: input, shape index: {}]   ;;  %s397_s2 = inlined_call_operand.vmem [shape: f32[1,64], index: 2, kind: input, shape index: {}]   ;;  %s398_s4 = inlined_call_operand.vmem [shape: bf16[10,64], index: 4, kind: output, shape index: {}]  }
   0x1   :  { %v284_v0 = vld [vmem:[%s394_s1 + $0x40] sm:$0xff]   ;;  %v286_v2 = vld [vmem:[%s394_s1 + $0x48] sm:$0xff]   ;;  %v288_v4 = vld [vmem:[%s394_s1 + $0x50] sm:$0xff]  }
   0x2   :  { %v285_v1 = vld [vmem:[%s394_s1] sm:$0xff]   ;;  %262 = vmatprep.subr.bf16.mxu0 %v284_v0  ;;  %v287_v3 = vld [vmem:[%s394_s1 + $0x8] sm:$0xff]   ;;  %v289_v5 = vld [vmem:[%s394_s1 + $0x10] sm:$0xff]  }
   0x3   :  { %263 = vmatpush3.bf16.msra.mxu0 %v285_v1  ;;  %v290_v6 = vld [vmem:[%s394_s1 + $0x58] sm:$0xff]   ;;  %v292_v8 = vld [vmem:[%s394_s1 + $0x60] sm:$0xff]   ;;  %v294_v10 = vld [vmem:[%s394_s1 + $0x68] sm:$0xff]  }
   0x4   :  { %264 = vmatprep.subr.bf16.mxu0 %v286_v2  ;;  %v291_v7 = vld [vmem:[%s394_s1 + $0x18] sm:$0xff]   ;;  %v293_v9 = vld [vmem:[%s394_s1 + $0x20] sm:$0xff]   ;;  %v295_v12 = vld [vmem:[%s394_s1 + $0x28] sm:$0xff]  }
   0x5   :  { %v302_v11 = vld [vmem:[%s395_s0 + $0x4] ss:$8 sps:$4 sm:$0xff]   ;;  %v296_v13 = vld [vmem:[%s394_s1 + $0x70] sm:$0xff]   ;;  %v298_v15 = vld [vmem:[%s394_s1 + $0x78] sm:$0xff]  }
   0x6   :  { %205 = vmatprep.mubr.bf16.mxu0 %v302_v11  ;;  %v297_v14 = vld [vmem:[%s394_s1 + $0x30] sm:$0xff]   ;;  %v299_v16 = vld [vmem:[%s394_s1 + $0x38] sm:$0xff]   ;;  %v300_v17 = vld [vmem:[%s395_s0] ss:$8 sps:$4 sm:$0xff]  }
   0x7   :  { %265 = vmatpush3.bf16.msra.mxu0 %v287_v3  ;;  %v259_v18 = vld [vmem:[%s396_s3] sm:$0xff]  }
   0x8   :  { %266 = vmatprep.subr.bf16.mxu0 %v288_v4  ;;  %v237_v20 = vld [vmem:[%s397_s2] ss:$0 sm:$0xff]  ;;  %v260_v23 = vunpack.c.l.bf16 %v259_v18  ;;  %v261_v28 = vunpack.c.h.bf16 %v259_v18 }
   0xb   :  { %267 = vmatpush3.bf16.msra.mxu0 %v289_v5 }
   0xc   :  { %268 = vmatprep.subr.bf16.mxu0 %v290_v6 }
   0xf   :  { %269 = vmatpush3.bf16.msra.mxu0 %v291_v7 }
  0x10   :  { %270 = vmatprep.subr.bf16.mxu0 %v292_v8 }
  0x13   :  { %271 = vmatpush3.bf16.msra.mxu0 %v293_v9 }
  0x14   :  { %272 = vmatprep.subr.bf16.mxu0 %v294_v10 }
  0x17   :  { %273 = vmatpush3.bf16.msra.mxu0 %v295_v12 }
  0x18   :  { %274 = vmatprep.subr.bf16.mxu0 %v296_v13 }
  0x1b   :  { %275 = vmatpush3.bf16.msra.mxu0 %v297_v14 }
  0x1c   :  { %276 = vmatprep.subr.bf16.mxu0 %v298_v15 }
  0x1f   :  { %277 = vmatpush3.bf16.msra.mxu0 %v299_v16 }
  0x22   :  { %206 = vmatmul.mubr.bf16.vlgmr.msra.gmra.mrb[0].mxu0 %v300_v17 }
  0xf5   :  { %v278_v19 = vpop.f32.mrb[0].mxu0 }
  0xf6   :  { %v279_v21 = vpop.f32.mrb[1].mxu0 }
  0xf7   :  { %v280_v22 = vadd.f32 %v279_v21, %v278_v19  ;;  %v281_v24 = vpop.f32.mrb[2].mxu0 }
  0xf8   :  { %v282_v25 = vpop.f32.mrb[3].mxu0 }
  0xf9   :  { %v208_v26 = vadd.f32 %v280_v22, %v237_v20  ;;  %v283_v27 = vadd.f32 %v282_v25, %v281_v24 }
  0xfb   :  { %v218_v29 = vadd.f32 %v260_v23, %v208_v26  ;;  %v211_v30 = vadd.f32 %v283_v27, %v237_v20 }
  0xfd   :  { %v256_v31 = vpack.c.bf16 %v218_v29, %v218_v29  ;;  %v219_v32 = vadd.f32 %v261_v28, %v211_v30 }
  0xff   :  { %229 = vst.msk [vmem:[%s398_s4] sm:$0xf] %vm228_vm0, %v256_v31  ;;  %v257_v33 = vpack.c.bf16 %v219_v32, %v219_v32 }
 0x101   :  { %230 = vst.msk [vmem:[%s398_s4 + $0x4] sm:$0xf] %vm228_vm0, %v257_v33 }

// kernel: _lambda_.37
= control target key start
LH: loop header
LB: loop body
LE: loop exit
PB: predicated region body
PF: predicated region fallthrough
CT: control target
= control target key end

     0   :  { %v39_v3 = vlaneseq  ;;  %v406_v9 = vmov 1983009808   ;;  %vm52_vm0 = vcmask 523264   ;;  %v407_v20 = vmov 269488144   ;;  %s486_s0 = inlined_call_operand.vmem [shape: bf16[2,64], index: 0, kind: input, shape index: {}]   ;;  %s487_s1 = inlined_call_operand.vmem [shape: f32[1,64], index: 1, kind: input, shape index: {}]   ;;  %s488_s2 = inlined_call_operand.vmem [shape: f32[1,64], index: 2, kind: input, shape index: {}]   ;;  %s489_s3 = inlined_call_operand.vmem [shape: bf16[64,32], index: 3, kind: input, shape index: {}]   ;;  %s490_s4 = inlined_call_operand.vmem [shape: f32[2,32], index: 4, kind: output, shape index: {}]  }
   0x1   :  { %v22_v0 = vld [vmem:[%s486_s0] sm:$0x1]  ;;  %v23_v1 = vld [vmem:[%s486_s0 + $0x1] sm:$0x1]  ;;  %v24_v2 = vld [vmem:[%s486_s0 + $0x2] sm:$0x1]  ;;  %v37_v10 = vunpack.c.l.s4 %v406_v9  ;;  %v60_v21 = vunpack.c.l.s4 %v407_v20 }
   0x2   :  { %v25_v4 = vld [vmem:[%s486_s0 + $0x3] sm:$0x1]  ;;  %v26_v5 = vunpack.c.l.bf16 %v22_v0  ;;  %v27_v6 = vunpack.c.l.bf16 %v23_v1  ;;  %v28_v7 = vunpack.c.l.bf16 %v24_v2  ;;  %v40_v11 = vshrl.u32 %v39_v3, 7  ;;  %v401_v58 = vld [vmem:[%s489_s3 + $0x8] sm:$0xff]   ;;  %v402_v59 = vld [vmem:[%s489_s3 + $0x10] sm:$0xff]  }
   0x3   :  { %v29_v8 = vunpack.c.l.bf16 %v25_v4  ;;  %v38_v14 = vunpack.c.0.s8 %v37_v10  ;;  %v408_v22 = vmov 842150450   ;;  %v409_v24 = vmov 1414812756   ;;  %v400_v56 = vld [vmem:[%s489_s3] sm:$0xff]   ;;  %v403_v60 = vld [vmem:[%s489_s3 + $0x18] sm:$0xff]  }
   0x4   :  { %v34_v12 = vcombine.low %v26_v5, %v27_v6  ;;  %v67_v23 = vunpack.c.l.s4 %v408_v22  ;;  %v74_v25 = vunpack.c.l.s4 %v409_v24  ;;  %v410_v26 = vmov 1987475062   ;;  %v369_v0 = vld [vmem:[%s487_s1] ss:$0 sm:$0xff] }
   0x5   :  { %v35_v13 = vcombine.low %v28_v7, %v29_v8  ;;  %v450_v15 = vsub.s32 %v38_v14, %v40_v11  ;;  %v81_v27 = vunpack.c.l.s4 %v410_v26  ;;  %v61_v28 = vunpack.c.0.s8 %v60_v21  ;;  %v370_v1 = vld [vmem:[%s488_s2] ss:$0 sm:$0xff] }
   0x6   :  { %v68_v29 = vunpack.c.0.s8 %v67_v23  ;;  %v75_v30 = vunpack.c.0.s8 %v74_v25  ;;  %v411_v57 = vmov 0.0   ;;  %vm412_vm1 = vmmov 0  }
   0x7   :  { %v42_v16 = vrot.slane %v34_v12, %v450_v15  ;;  %v49_v17 = vrot.slane %v35_v13, %v450_v15  ;;  %v82_v31 = vunpack.c.0.s8 %v81_v27  ;;  %v64_v32 = vsub.s32 %v61_v28, %v40_v11  ;;  %381 = vmatprep.subr.bf16.mxu0 %v411_v57  ;;  %389 = vmatprep.mubr.msk.bf16.mxu0 %vm412_vm1, %v411_v57 }
   0x8   :  { %v71_v33 = vsub.s32 %v68_v29, %v40_v11  ;;  %v78_v34 = vsub.s32 %v75_v30, %v40_v11  ;;  %382 = vmatpush3.bf16.msra.mxu0 %v400_v56  ;;  %v170_v2 = vcombine.high %v369_v0, %v369_v0  ;;  %v201_v3 = vcombine.high %v370_v1, %v370_v1 }
   0x9   :  { %v50_v18 = vcombine.low %v42_v16, %v49_v17  ;;  %v85_v35 = vsub.s32 %v82_v31, %v40_v11  ;;  %383 = vmatprep.subr.bf16.mxu0 %v411_v57  ;;  %v177_v4 = vrot.slane %v369_v0, %v450_v15  ;;  %vm249_vm2 = vcmask 519168  }
   0xa   :  { %vm328_vm3 = vcmask 261120  }
   0xb   :  { %v53_v19 = vsel %vm52_vm0, %v50_v18, 0.0  ;;  %v185_v9 = vcombine.high %v177_v4, %v177_v4 }
   0xc   :  { %54 = vadd.xlane.f32.xlu0 %v53_v19  ;;  %384 = vmatpush3.bf16.msra.mxu0 %v401_v58 }
   0xd   :  { %385 = vmatprep.subr.bf16.mxu0 %v411_v57 }
  0x10   :  { %386 = vmatpush3.bf16.msra.mxu0 %v402_v59 }
  0x11   :  { %387 = vmatprep.subr.bf16.mxu0 %v411_v57 }
  0x14   :  { %388 = vmatpush3.bf16.msra.mxu0 %v403_v60 }
  0x99   :  { %v55_v36 = vpop.xlane.xlu0 %54 }
  0x9a   :  { %v57_v37 = vmul.f32 0.015625, %v55_v36 }
  0x9c   :  { %v65_v38 = vrot.slane %v57_v37, %v64_v32  ;;  %v72_v39 = vrot.slane %v57_v37, %v71_v33  ;;  %v79_v40 = vrot.slane %v57_v37, %v78_v34  ;;  %v86_v41 = vrot.slane %v57_v37, %v85_v35 }
  0x9e   :  { %v91_v42 = vsub.f32 %v26_v5, %v65_v38  ;;  %v92_v43 = vsub.f32 %v27_v6, %v72_v39  ;;  %v93_v44 = vsub.f32 %v28_v7, %v79_v40  ;;  %v94_v45 = vsub.f32 %v29_v8, %v86_v41 }
  0x9f   :  { %v184_v5 = vrot.slane %v170_v2, %v450_v15  ;;  %v208_v6 = vrot.slane %v370_v1, %v450_v15  ;;  %v215_v7 = vrot.slane %v201_v3, %v450_v15 }
  0xa0   :  { %v95_v46 = vmul.f32 %v91_v42, %v91_v42  ;;  %v96_v47 = vmul.f32 %v92_v43, %v92_v43  ;;  %v97_v48 = vmul.f32 %v93_v44, %v93_v44  ;;  %v98_v49 = vmul.f32 %v94_v45, %v94_v45 }
  0xa1   :  { %v186_v10 = vcombine.high %v184_v5, %v184_v5  ;;  %v216_v16 = vcombine.high %v208_v6, %v208_v6  ;;  %v217_v17 = vcombine.high %v215_v7, %v215_v7 }
  0xa2   :  { %v103_v50 = vcombine.low %v95_v46, %v96_v47  ;;  %v104_v51 = vcombine.low %v97_v48, %v98_v49 }
  0xa4   :  { %v111_v52 = vrot.slane %v103_v50, %v450_v15  ;;  %v118_v53 = vrot.slane %v104_v51, %v450_v15 }
  0xa6   :  { %v119_v54 = vcombine.low %v111_v52, %v118_v53 }
  0xa8   :  { %v121_v55 = vsel %vm52_vm0, %v119_v54, 0.0 }
  0xa9   :  { %122 = vadd.xlane.f32.xlu0 %v121_v55 }
 0x136   :  { %v123_v61 = vpop.xlane.xlu0 %122 }
 0x137   :  { %v124_v62 = vmul.f32 0.015625, %v123_v61 }
 0x139   :  { %v125_v63 = vadd.f32 1e-05, %v124_v62 }
 0x13b   :  { %404 = vrsqrt.f32 %v125_v63 }
 0x145   :  { %v405_v8 = vpop.eup %404 }
 0x146   :  { %v134_v11 = vrot.slane %v405_v8, %v64_v32  ;;  %v141_v12 = vrot.slane %v405_v8, %v71_v33  ;;  %v148_v13 = vrot.slane %v405_v8, %v78_v34  ;;  %v155_v14 = vrot.slane %v405_v8, %v85_v35 }
 0x148   :  { %v160_v18 = vmul.f32 %v134_v11, %v91_v42  ;;  %v161_v19 = vmul.f32 %v141_v12, %v92_v43  ;;  %v162_v20 = vmul.f32 %v148_v13, %v93_v44  ;;  %v163_v21 = vmul.f32 %v155_v14, %v94_v45 }
 0x14a   :  { %v191_v22 = vmul.f32 %v177_v4, %v160_v18  ;;  %v192_v23 = vmul.f32 %v185_v9, %v161_v19  ;;  %v193_v24 = vmul.f32 %v184_v5, %v162_v20  ;;  %v194_v25 = vmul.f32 %v186_v10, %v163_v21 }
 0x14c   :  { %v222_v26 = vadd.f32 %v208_v6, %v191_v22  ;;  %v223_v27 = vadd.f32 %v216_v16, %v192_v23  ;;  %v224_v28 = vadd.f32 %v215_v7, %v193_v24  ;;  %v225_v29 = vadd.f32 %v217_v17, %v194_v25 }
 0x14e   :  { %v230_v30 = vcombine.low %v222_v26, %v223_v27  ;;  %v231_v31 = vcombine.low %v224_v28, %v225_v29 }
 0x150   :  { %v238_v32 = vrot.slane %v230_v30, %v450_v15  ;;  %v245_v33 = vrot.slane %v231_v31, %v450_v15 }
 0x152   :  { %v246_v34 = vcombine.low %v238_v32, %v245_v33 }
 0x154   :  { %v248_v35 = vpack.c.bf16 %v246_v34, %v246_v34 }
 0x156   :  { %250 = vst.msk [vmem:[#allocation2] sm:$0xf] %vm249_vm2, %v248_v35 }
 0x15d   :  { %v251_v36 = vld [vmem:[#allocation2] sm:$0xf] }
 0x15e   :  { %390 = vmatmul.mubr.msk.bf16.vlgmr.msra.gmra.mrb[0].mxu0 %vm52_vm0, %v251_v36 }
 0x231   :  { %v322_v37 = vpop.f32.mrb[0].mxu0 }
 0x232   :  { %329 = vst.msk [vmem:[#allocation3] sm:$0xff] %vm328_vm3, %v322_v37  ;;  %v391_v38 = vpop.f32.mrb[1].mxu0 }
 0x233   :  { %v325_v39 = vpop.f32.mrb[2].mxu0 }
 0x234   :  { %v392_v40 = vpop.f32.mrb[3].mxu0 }
 0x239   :  { %v347_v41 = vld [vmem:[#allocation3] sm:$0x3] }
 0x23a   :  { %348 = vst [vmem:[%s490_s4] sm:$0x3] %v347_v41 }

// kernel: _lambda_.40
= control target key start
LH: loop header
LB: loop body
LE: loop exit
PB: predicated region body
PF: predicated region fallthrough
CT: control target
= control target key end

     0   :  { %v151_v0 = vmov 0.0   ;;  %vm152_vm0 = vmmov 0   ;;  %vm30_vm1 = vcmask 261120   ;;  %vm115_vm2 = vcmask 257024   ;;  %s199_s1 = inlined_call_operand.vmem [shape: bf16[32,32], index: 1, kind: input, shape index: {}]   ;;  %s200_s0 = inlined_call_operand.vmem [shape: bf16[16,32], index: 0, kind: input, shape index: {}]   ;;  %s201_s3 = inlined_call_operand.vmem [shape: bf16[16,32], index: 3, kind: input, shape index: {}]   ;;  %s202_s2 = inlined_call_operand.vmem [shape: f32[1,32], index: 2, kind: input, shape index: {}]   ;;  %s203_s4 = inlined_call_operand.vmem [shape: bf16[16,32], index: 4, kind: output, shape index: {}]  }
   0x1   :  { %138 = vmatprep.subr.bf16.mxu0 %v151_v0  ;;  %v148_v1 = vld [vmem:[%s199_s1] sm:$0xff]   ;;  %142 = vmatprep.mubr.msk.bf16.mxu0 %vm152_vm0, %v151_v0  ;;  %v149_v2 = vld [vmem:[%s199_s1 + $0x8] sm:$0xff]  }
   0x2   :  { %139 = vmatpush3.bf16.msra.mxu0 %v148_v1  ;;  %v150_v3 = vld [vmem:[%s200_s0] sm:$0xff]  }
   0x3   :  { %140 = vmatprep.subr.bf16.mxu0 %v151_v0  ;;  %31 = vst.msk [vmem:[#allocation2] sm:$0xff] %vm30_vm1, %v150_v3  ;;  %v132_v5 = vld [vmem:[%s201_s3] sm:$0xff]  }
   0x4   :  { %v123_v6 = vld [vmem:[%s202_s2] ss:$0 sm:$0xff]  ;;  %v133_v7 = vunpack.c.l.bf16 %v132_v5  ;;  %v134_v11 = vunpack.c.h.bf16 %v132_v5 }
   0x6   :  { %141 = vmatpush3.bf16.msra.mxu0 %v149_v2 }
   0xa   :  { %v32_v4 = vld [vmem:[#allocation2] sm:$0xff] }
   0xb   :  { %143 = vmatmul.mubr.msk.bf16.vlgmr.msra.gmra.mrb[0].mxu0 %vm30_vm1, %v32_v4 }
  0xde   :  { %v94_v8 = vpop.f32.mrb[0].mxu0 }
  0xdf   :  { %v95_v9 = vadd.f32 %v123_v6, %v94_v8  ;;  %v144_v10 = vpop.f32.mrb[1].mxu0 }
  0xe0   :  { %v97_v12 = vpop.f32.mrb[2].mxu0 }
  0xe1   :  { %v105_v13 = vadd.f32 %v133_v7, %v95_v9  ;;  %v98_v14 = vadd.f32 %v123_v6, %v97_v12  ;;  %v145_v15 = vpop.f32.mrb[3].mxu0 }
  0xe3   :  { %v129_v16 = vpack.c.bf16 %v105_v13, %v105_v13  ;;  %v106_v17 = vadd.f32 %v134_v11, %v98_v14 }
  0xe5   :  { %116 = vst.msk [vmem:[%s203_s4] sm:$0xf] %vm115_vm2, %v129_v16  ;;  %v130_v18 = vpack.c.bf16 %v106_v17, %v106_v17 }
  0xe7   :  { %117 = vst.msk [vmem:[%s203_s4 + $0x4] sm:$0xf] %vm115_vm2, %v130_v18 }

// kernel: _lambda_.39
= control target key start
LH: loop header
LB: loop body
LE: loop exit
PB: predicated region body
PF: predicated region fallthrough
CT: control target
= control target key end

     0   :  { %s798_s6 = smov 0   ;;  %s895_s0 = inlined_call_operand.vmem [shape: bf16[2,8,96], index: 0, kind: input, shape index: {}]   ;;  %s896_s1 = inlined_call_operand.vmem [shape: bf16[2,8,32], index: 1, kind: output, shape index: {}]  }
   0x1 LB: > { %s641_s7 = sadd.s32 4294967295, %s770_s6   ;;  %p645_p0 = scmp.ge.s32.totalorder %s770_s6, 1  ;;  %s770_s6 = sphi %s798_s6, %s11_s6  }
   0x2   : > { %p86_p1 = scmp.lt.s32.totalorder %s770_s6, 3 }
   0x4   : > { %p87_p2 = pnand %p645_p0, %p86_p1 }
   0x5   : > { %p104_p3 = scmp.lt.s32.totalorder (!%p87_p2), %s641_s7, 1  ;;  %v772_v0 = vmov (!%p87_p2), 0.0   ;;  %vm773_vm0 = vmmov (!%p87_p2), 0   ;;  %s774_s12 = smov (!%p87_p2), 96   ;;  %vm125_vm1 = vcmask (!%p87_p2), 64512   ;;  %v114_v5 = vlaneseq (!%p87_p2) }
   0x6   : > { %90 = sbr.rel (%p87_p2) target bundleno = 1602 (0x642), region = 24  ;;  %675 = vmatprep.subr.bf16.mxu0 (!%p87_p2), %v772_v0  ;;  %677 = vmatprep.mubr.msk.bf16.mxu0 (!%p87_p2), %vm773_vm0, %v772_v0  ;;  %s775_s13 = smov (!%p87_p2), 64   ;;  %vm189_vm3 = vcmask (!%p87_p2), 1043456   ;;  %vm579_vm4 = vcmask (!%p87_p2), 130048   ;;  %vm582_vm5 = vcmask (!%p87_p2), 195584   ;;  %vm586_vm6 = vcmask (!%p87_p2), 257024  }
   0x7   : > { %681 = vmatprep.subr.bf16.mxu1 (!%p87_p2), %v772_v0  ;;  %683 = vmatprep.mubr.msk.bf16.mxu1 (!%p87_p2), %vm773_vm0, %v772_v0  ;;  %s776_s14 = smov (!%p87_p2), 88   ;;  %v115_v6 = vshrl.u32 (!%p87_p2), %v114_v5, 7  ;;  %v117_v7 = vand.u32 (!%p87_p2), 127, %v114_v5  ;;  %s777_s15 = smov (!%p87_p2), 72  }
   0x8   : > { %s778_s16 = smov (!%p87_p2), 120   ;;  %s779_s17 = smov (!%p87_p2), 80  }
   0x9   : > { %vm118_vm2 = vcmp.gt.s32.totalorder (!%p87_p2), %v117_v7, %v115_v6  ;;  %s780_s18 = smov (!%p87_p2), 112   ;;  %s781_s19 = smov (!%p87_p2), 104  }
   0xa   : > { %v831_v8 = vsel (!%p87_p2), %vm118_vm2, -inf, %v772_v0  ;;  %s782_s20 = smov (!%p87_p2), 56   ;;  %s783_s21 = smov (!%p87_p2), 48  }
   0xb   : > { %s784_s22 = smov (!%p87_p2), 40   ;;  %s785_s23 = smov (!%p87_p2), 8  }
   0xc   : > { %s786_s24 = smov (!%p87_p2), 16   ;;  %s787_s25 = smov (!%p87_p2), 24  }
   0xd   : > { %s898_s7 = smov (!%p104_p3, %s641_s7), 1 }
   0xe   : > { %s646_s8 = sshll.u32 %s898_s7, 2 }
   0xf   : > { %s107_s11 = scalar_lea.vmem %s895_s0, %s646_s8  ;;  %s111_s28 = scalar_lea.vmem %s896_s1, %s646_s8 }
  0x10   : > { %v113_v1 = vld [vmem:[%s107_s11] sm:$0xf] }
  0x11   : > { %v820_v2 = vcombine.low %v113_v1, %v113_v1 }
  0x13   : > { %123 = vrot.lane.b32.xlu0 %v820_v2, %s774_s12  ;;  %184 = vrot.lane.b32.xlu1 %v820_v2, %s775_s13 }
  0x17   : > { %236 = vrot.lane.b32.xlu1 %v820_v2, %s776_s14 }
  0x85   : > { %v124_v3 = vpop.permute.xlu0 %123  ;;  %v185_v15 = vpop.permute.xlu1 %184 }
  0x86   : > { %v130_v4 = vsel %vm125_vm1, %v124_v3, 0  ;;  %v191_v16 = vsel %vm189_vm3, %v185_v15, 0 }
  0x87   : > { %676 = vmatpush3.bf16.xpose.msra.mxu0 %v130_v4  ;;  %682 = vmatpush3.bf16.msra.mxu1 %v191_v16 }
  0x88   : > { %693 = vmatprep.subr.bf16.mxu0 %v772_v0  ;;  %687 = vmatprep.subr.bf16.mxu1 %v772_v0 }
  0x89   : > { %v237_v22 = vpop.permute.xlu1 %236 }
  0x8a   : > { %v242_v28 = vsel %vm125_vm1, %v237_v22, 0 }
  0x8e   : > { %678 = vmatmul.mubr.msk.bf16.vlgmr.msra.gmra.mrb[0].mxu0 %vm125_vm1, %v113_v1 }
  0x8f   : > { %695 = vmatprep.mubr.msk.bf16.mxu0 %vm773_vm0, %v772_v0 }
 0x161   : > { %v166_v9 = vpop.f32.mrb[0].mxu0 }
 0x162   : > { %v167_v10 = vadd.f32 %v166_v9, %v831_v8  ;;  %v679_v11 = vpop.f32.mrb[1].mxu0 }
 0x163   : > { %v169_v12 = vpop.f32.mrb[2].mxu0 }
 0x164   : > { %v680_v13 = vpop.f32.mrb[3].mxu0  ;;  %v172_v14 = vsel %vm125_vm1, %v167_v10, -inf }
 0x165   : > { %173 = vmax.xlane.f32.xlu0 %v172_v14 }
 0x17b   : > { %458 = vrot.lane.b32.xlu0 %v820_v2, %s777_s15 }
 0x1f2   : > { %v174_v17 = vpop.xlane.xlu0 %173 }
 0x1f3   : > { %v175_v18 = vsub.f32 %v167_v10, %v174_v17 }
 0x1f5   : > { %v176_v19 = vmul.f32 1.442695, %v175_v18 }
 0x1f6   : > { %v459_v31 = vpop.permute.xlu0 %458 }
 0x1f7   : > { %748 = vpow2.f32 %v176_v19  ;;  %v464_v33 = vsel %vm125_vm1, %v459_v31, 0 }
 0x201   : > { %v749_v20 = vpop.eup %748 }
 0x202   : > { %v178_v21 = vsel %vm125_vm1, %v749_v20, 0.0 }
 0x203   : > { %179 = vadd.xlane.f32.xlu1 %v178_v21 }
 0x214   : > { %234 = vrot.lane.b32.xlu1 %v820_v2, %s778_s16 }
 0x218   : > { %347 = vrot.lane.b32.xlu1 %v820_v2, %s779_s17 }
 0x21c   : > { %345 = vrot.lane.b32.xlu1 %v820_v2, %s780_s18 }
 0x220   : > { %456 = vrot.lane.b32.xlu1 %v820_v2, %s781_s19 }
 0x290   : > { %v180_v23 = vpop.xlane.xlu1 %179 }
 0x291   : > { %750 = vrcp.f32 %v180_v23 }
 0x294   : > { %v235_v26 = vpop.permute.xlu1 %234 }
 0x298   : > { %v348_v29 = vpop.permute.xlu1 %347 }
 0x299   : > { %v353_v30 = vsel %vm125_vm1, %v348_v29, 0 }
 0x29b   : > { %v751_v24 = vpop.eup %750 }
 0x29c   : > { %v182_v25 = vmul.f32 %v751_v24, %v749_v20  ;;  %v346_v32 = vpop.permute.xlu1 %345 }
 0x29e   : > { %v183_v27 = vpack.c.bf16 %v182_v25, %v182_v25 }
 0x2a0   : > { %684 = vmatmul.mubr.msk.bf16.vlgmr.msra.gmra.mrb[0].mxu1 %vm125_vm1, %v183_v27  ;;  %v457_v34 = vpop.permute.xlu1 %456 }
 0x2a1   : > { %688 = vmatpush3.bf16.xpose.msra.mxu1 %v242_v28  ;;  %689 = vmatprep.mubr.msk.bf16.mxu1 %vm773_vm0, %v772_v0 }
 0x2a2   : > { %699 = vmatprep.subr.bf16.mxu1 %v772_v0 }
 0x2a8   : > { %690 = vmatmul.mubr.msk.bf16.vlgmr.msra.gmra.mrb[4].mxu1 %vm125_vm1, %v235_v26 }
 0x2a9   : > { %700 = vmatpush3.bf16.xpose.msra.mxu1 %v353_v30  ;;  %701 = vmatprep.mubr.msk.bf16.mxu1 %vm773_vm0, %v772_v0 }
 0x2aa   : > { %711 = vmatprep.subr.bf16.mxu1 %v772_v0 }
 0x2b0   : > { %702 = vmatmul.mubr.msk.bf16.vlgmr.msra.gmra.mrb[8].mxu1 %vm125_vm1, %v346_v32 }
 0x2b1   : > { %712 = vmatpush3.bf16.xpose.msra.mxu1 %v464_v33  ;;  %713 = vmatprep.mubr.msk.bf16.mxu1 %vm773_vm0, %v772_v0 }
 0x2b8   : > { %714 = vmatmul.mubr.msk.bf16.vlgmr.msra.gmra.mrb[12].mxu1 %vm125_vm1, %v457_v34 }
 0x373   : > { %v858_v35 = vpop.f32.mrb[0].mxu1 }
 0x374   : > { %v685_v36 = vpop.f32.mrb[1].mxu1 }
 0x375   : > { %v230_v37 = vpop.f32.mrb[2].mxu1 }
 0x376   : > { %v686_v38 = vpop.f32.mrb[3].mxu1 }
 0x37b   : > { %v278_v39 = vpop.f32.mrb[4].mxu1 }
 0x37c   : > { %v279_v40 = vadd.f32 %v278_v39, %v831_v8  ;;  %v691_v41 = vpop.f32.mrb[5].mxu1 }
 0x37d   : > { %v281_v42 = vpop.f32.mrb[6].mxu1 }
 0x37e   : > { %v692_v43 = vpop.f32.mrb[7].mxu1  ;;  %v284_v44 = vsel %vm125_vm1, %v279_v40, -inf }
 0x37f   : > { %285 = vmax.xlane.f32.xlu1 %v284_v44  ;;  %v233_v43 = vpack.c.bf16 %v858_v35, %v858_v35 }
 0x383   : > { %v389_v45 = vpop.f32.mrb[8].mxu1 }
 0x384   : > { %v390_v46 = vadd.f32 %v389_v45, %v831_v8  ;;  %v703_v47 = vpop.f32.mrb[9].mxu1 }
 0x385   : > { %v392_v48 = vpop.f32.mrb[10].mxu1 }
 0x386   : > { %v395_v49 = vsel %vm125_vm1, %v390_v46, -inf  ;;  %v704_v50 = vpop.f32.mrb[11].mxu1 }
 0x387   : > { %396 = vmax.xlane.f32.xlu0 %v395_v49 }
 0x38b   : > { %v500_v51 = vpop.f32.mrb[12].mxu1 }
 0x38c   : > { %v501_v52 = vadd.f32 %v500_v51, %v831_v8  ;;  %v715_v53 = vpop.f32.mrb[13].mxu1 }
 0x38d   : > { %v503_v54 = vpop.f32.mrb[14].mxu1 }
 0x38e   : > { %v506_v55 = vsel %vm125_vm1, %v501_v52, -inf  ;;  %v716_v56 = vpop.f32.mrb[15].mxu1 }
 0x38f   : > { %507 = vmax.xlane.f32.xlu1 %v506_v55 }
 0x40c   : > { %v286_v57 = vpop.xlane.xlu1 %285 }
 0x40d   : > { %v287_v58 = vsub.f32 %v279_v40, %v286_v57 }
 0x40f   : > { %v288_v59 = vmul.f32 1.442695, %v287_v58 }
 0x411   : > { %752 = vpow2.f32 %v288_v59 }
 0x414   : > { %v397_v5 = vpop.xlane.xlu0 %396 }
 0x415   : > { %v398_v6 = vsub.f32 %v390_v46, %v397_v5 }
 0x417   : > { %v399_v7 = vmul.f32 1.442695, %v398_v6 }
 0x41b   : > { %v753_v60 = vpop.eup %752 }
 0x41c   : > { %v508_v61 = vpop.xlane.xlu1 %507  ;;  %v290_v62 = vsel %vm125_vm1, %v753_v60, 0.0 }
 0x41d   : > { %v509_v63 = vsub.f32 %v501_v52, %v508_v61  ;;  %291 = vadd.xlane.f32.xlu1 %v290_v62 }
 0x41f   : > { %v510_v1 = vmul.f32 1.442695, %v509_v63 }
 0x421   : > { %754 = vpow2.f32 %v510_v1 }
 0x422   : > { %756 = vpow2.f32 %v399_v7 }
 0x42b   : > { %v755_v3 = vpop.eup %754 }
 0x42c   : > { %v512_v4 = vsel %vm125_vm1, %v755_v3, 0.0  ;;  %v757_v8 = vpop.eup %756 }
 0x42d   : > { %513 = vadd.xlane.f32.xlu0 %v512_v4  ;;  %v401_v9 = vsel %vm125_vm1, %v757_v8, 0.0 }
 0x42e   : > { %296 = vrot.lane.b32.xlu1 %v820_v2, %s782_s20 }
 0x443   : > { %407 = vrot.lane.b32.xlu0 %v820_v2, %s783_s21 }
 0x452   : > { %402 = vadd.xlane.f32.xlu1 %v401_v9 }
 0x463   : > { %518 = vrot.lane.b32.xlu1 %v820_v2, %s784_s22 }
 0x4aa   : > { %v292_v10 = vpop.xlane.xlu1 %291 }
 0x4ab   : > { %758 = vrcp.f32 %v292_v10 }
 0x4ae   : > { %v297_v11 = vpop.permute.xlu1 %296 }
 0x4af   : > { %v302_v12 = vsel %vm189_vm3, %v297_v11, 0 }
 0x4b0   : > { %694 = vmatpush3.bf16.msra.mxu0 %v302_v12 }
 0x4b1   : > { %705 = vmatprep.subr.bf16.mxu0 %v772_v0 }
 0x4b5   : > { %v759_v13 = vpop.eup %758 }
 0x4b6   : > { %v294_v14 = vmul.f32 %v759_v13, %v753_v60 }
 0x4b8   : > { %v295_v15 = vpack.c.bf16 %v294_v14, %v294_v14 }
 0x4ba   : > { %696 = vmatmul.mubr.msk.bf16.vlgmr.msra.gmra.mrb[4].mxu0 %vm125_vm1, %v295_v15  ;;  %v514_v16 = vpop.xlane.xlu0 %513 }
 0x4bb   : > { %707 = vmatprep.mubr.msk.bf16.mxu0 %vm773_vm0, %v772_v0 }
 0x4be   : > { %v408_v17 = vpop.permute.xlu0 %407 }
 0x4bf   : > { %v413_v2 = vsel %vm189_vm3, %v408_v17, 0 }
 0x4c0   : > { %706 = vmatpush3.bf16.msra.mxu0 %v413_v2 }
 0x4c1   : > { %717 = vmatprep.subr.bf16.mxu0 %v772_v0 }
 0x4df   : > { %v403_v18 = vpop.xlane.xlu1 %402 }
 0x4e0   : > { %760 = vrcp.f32 %v403_v18 }
 0x4e1   : > { %762 = vrcp.f32 %v514_v16 }
 0x4e3   : > { %v519_v20 = vpop.permute.xlu1 %518 }
 0x4e4   : > { %v524_v22 = vsel %vm189_vm3, %v519_v20, 0 }
 0x4ea   : > { %v761_v19 = vpop.eup %760 }
 0x4eb   : > { %v405_v21 = vmul.f32 %v761_v19, %v757_v8  ;;  %v763_v24 = vpop.eup %762 }
 0x4ec   : > { %v516_v25 = vmul.f32 %v763_v24, %v755_v3 }
 0x4ed   : > { %v406_v23 = vpack.c.bf16 %v405_v21, %v405_v21 }
 0x4ee   : > { %v517_v26 = vpack.c.bf16 %v516_v25, %v516_v25 }
 0x4ef   : > { %708 = vmatmul.mubr.msk.bf16.vlgmr.msra.gmra.mrb[8].mxu0 %vm125_vm1, %v406_v23 }
 0x4f0   : > { %718 = vmatpush3.bf16.msra.mxu0 %v524_v22  ;;  %719 = vmatprep.mubr.msk.bf16.mxu0 %vm773_vm0, %v772_v0 }
 0x4f7   : > { %720 = vmatmul.mubr.msk.bf16.vlgmr.msra.gmra.mrb[12].mxu0 %vm125_vm1, %v517_v26 }
 0x58d   : > { %v338_v27 = vpop.f32.mrb[4].mxu0 }
 0x58e   : > { %v344_v28 = vpack.c.bf16 %v338_v27, %v338_v27  ;;  %v697_v29 = vpop.f32.mrb[5].mxu0 }
 0x58f   : > { %v341_v30 = vpop.f32.mrb[6].mxu0 }
 0x590   : > { %568 = vrot.lane.b32.xlu1 %v344_v28, %s785_s23  ;;  %v698_v31 = vpop.f32.mrb[7].mxu0 }
 0x5c2   : > { %v449_v32 = vpop.f32.mrb[8].mxu0 }
 0x5c3   : > { %v455_v33 = vpack.c.bf16 %v449_v32, %v449_v32  ;;  %v709_v34 = vpop.f32.mrb[9].mxu0 }
 0x5c4   : > { %v452_v36 = vpop.f32.mrb[10].mxu0 }
 0x5c5   : > { %571 = vrot.lane.b32.xlu0 %v455_v33, %s786_s24  ;;  %v710_v37 = vpop.f32.mrb[11].mxu0 }
 0x5ca   : > { %v560_v0 = vpop.f32.mrb[12].mxu0 }
 0x5cb   : > { %v566_v38 = vpack.c.bf16 %v560_v0, %v560_v0  ;;  %v721_v39 = vpop.f32.mrb[13].mxu0 }
 0x5cc   : > { %v563_v40 = vpop.f32.mrb[14].mxu0 }
 0x5cd   : > { %574 = vrot.lane.b32.xlu1 %v566_v38, %s787_s25  ;;  %v722_v41 = vpop.f32.mrb[15].mxu0 }
 0x602   : > { %v569_v42 = vpop.permute.xlu1 %568 }
 0x603   : > { %v578_v45 = vsel %vm125_vm1, %v233_v43, %v569_v42 }
 0x637   : > { %v572_v44 = vpop.permute.xlu0 %571 }
 0x638   : > { %v581_v46 = vsel %vm579_vm4, %v578_v45, %v572_v44 }
 0x63f   : > { %v575_v47 = vpop.permute.xlu1 %574 }
 0x640   : > { %v584_v48 = vsel %vm582_vm5, %v581_v46, %v575_v47 }
 0x641   : > { %587 = vst.msk [vmem:[%s111_s28] sm:$0xf] %vm586_vm6, %v584_v48 }
 0x642 PF: > { %s11_s6 = sadd.s32 1, %s770_s6  }
 0x643   : > { %p8_p4 = scmp.ge.s32.totalorder %s11_s6, 4  }
 0x645   :  { %10 = sbr.rel (!%p8_p4) target bundleno = 1 (0x1), region = 54 }

// kernel: _lambda_.38
= control target key start
LH: loop header
LB: loop body
LE: loop exit
PB: predicated region body
PF: predicated region fallthrough
CT: control target
= control target key end

     0   :  { %vm29_vm0 = vcmask 261120   ;;  %v194_v16 = vmov 0.0   ;;  %vm195_vm1 = vmmov 0   ;;  %vm154_vm2 = vcmask 781312   ;;  %s256_s0 = inlined_call_operand.vmem [shape: bf16[16,32], index: 0, kind: input, shape index: {}]   ;;  %s257_s3 = inlined_call_operand.vmem [shape: bf16[32,96], index: 3, kind: input, shape index: {}]   ;;  %s258_s1 = inlined_call_operand.vmem [shape: f32[1,32], index: 1, kind: input, shape index: {}]   ;;  %s259_s2 = inlined_call_operand.vmem [shape: f32[1,32], index: 2, kind: input, shape index: {}]   ;;  %s260_s4 = inlined_call_operand.vmem [shape: f32[1,96], index: 4, kind: input, shape index: {}]   ;;  %s261_s5 = inlined_call_operand.vmem [shape: bf16[16,96], index: 5, kind: output, shape index: {}]  }
   0x1   :  { %v172_v0 = vld [vmem:[%s256_s0] sm:$0xff]   ;;  %178 = vmatprep.subr.bf16.mxu0 %v194_v16  ;;  %v189_v17 = vld [vmem:[%s257_s3 + $0x8] sm:$0xff]   ;;  %182 = vmatprep.mubr.msk.bf16.mxu0 %vm195_vm1, %v194_v16 }
   0x2   :  { %v173_v1 = vunpack.c.l.bf16 %v172_v0  ;;  %v174_v2 = vunpack.c.h.bf16 %v172_v0  ;;  %v188_v15 = vld [vmem:[%s257_s3] sm:$0xff]  }
   0x3   :  { %179 = vmatpush3.bf16.msra.mxu0 %v188_v15  ;;  %v161_v26 = vld [vmem:[%s258_s1] ss:$0 sm:$0xff] }
   0x4   :  { %v30_v3 = vsel %vm29_vm0, %v173_v1, 0.0  ;;  %v33_v4 = vsel %vm29_vm0, %v174_v2, 0.0  ;;  %180 = vmatprep.subr.bf16.mxu0 %v194_v16  ;;  %v162_v30 = vld [vmem:[%s259_s2] ss:$0 sm:$0xff] }
   0x5   :  { %31 = vadd.xlane.f32.xlu0 %v30_v3  ;;  %v163_v36 = vld [vmem:[%s260_s4] ss:$0 sm:$0xff] }
   0x7   :  { %181 = vmatpush3.bf16.msra.mxu0 %v189_v17 }
   0x9   :  { %34 = vadd.xlane.f32.xlu0 %v33_v4 }
  0x92   :  { %v32_v5 = vpop.xlane.xlu0 %31 }
  0x93   :  { %v37_v6 = vmul.f32 0.03125, %v32_v5 }
  0x95   :  { %v39_v7 = vsub.f32 %v173_v1, %v37_v6 }
  0x96   :  { %v35_v8 = vpop.xlane.xlu0 %34 }
  0x97   :  { %v38_v9 = vmul.f32 0.03125, %v35_v8  ;;  %v41_v10 = vmul.f32 %v39_v7, %v39_v7 }
  0x99   :  { %v40_v11 = vsub.f32 %v174_v2, %v38_v9  ;;  %v43_v12 = vsel %vm29_vm0, %v41_v10, 0.0 }
  0x9a   :  { %44 = vadd.xlane.f32.xlu1 %v43_v12 }
  0x9b   :  { %v42_v13 = vmul.f32 %v40_v11, %v40_v11 }
  0x9d   :  { %v46_v14 = vsel %vm29_vm0, %v42_v13, 0.0 }
  0x9e   :  { %47 = vadd.xlane.f32.xlu1 %v46_v14 }
 0x127   :  { %v45_v18 = vpop.xlane.xlu1 %44 }
 0x128   :  { %v49_v19 = vmul.f32 0.03125, %v45_v18 }
 0x12a   :  { %v51_v20 = vadd.f32 1e-05, %v49_v19 }
 0x12b   :  { %v48_v21 = vpop.xlane.xlu1 %47 }
 0x12c   :  { %190 = vrsqrt.f32 %v51_v20  ;;  %v50_v22 = vmul.f32 0.03125, %v48_v21 }
 0x12e   :  { %v52_v23 = vadd.f32 1e-05, %v50_v22 }
 0x130   :  { %192 = vrsqrt.f32 %v52_v23 }
 0x136   :  { %v191_v24 = vpop.eup %190 }
 0x137   :  { %v55_v25 = vmul.f32 %v191_v24, %v39_v7 }
 0x139   :  { %v64_v28 = vmul.f32 %v161_v26, %v55_v25 }
 0x13a   :  { %v193_v27 = vpop.eup %192 }
 0x13b   :  { %v56_v29 = vmul.f32 %v193_v27, %v40_v11  ;;  %v73_v32 = vadd.f32 %v162_v30, %v64_v28 }
 0x13d   :  { %v65_v31 = vmul.f32 %v161_v26, %v56_v29 }
 0x13f   :  { %v74_v33 = vadd.f32 %v162_v30, %v65_v31 }
 0x141   :  { %v75_v34 = vpack.c.bf16 %v74_v33, %v73_v32 }
 0x143   :  { %76 = vst.msk [vmem:[#allocation2] sm:$0xff] %vm29_vm0, %v75_v34 }
 0x14a   :  { %v77_v35 = vld [vmem:[#allocation2] sm:$0xff] }
 0x14b   :  { %183 = vmatmul.mubr.msk.bf16.vlgmr.msra.gmra.mrb[0].mxu0 %vm29_vm0, %v77_v35 }
 0x21e   :  { %v139_v37 = vpop.f32.mrb[0].mxu0 }
 0x21f   :  { %v140_v38 = vadd.f32 %v163_v36, %v139_v37  ;;  %v184_v39 = vpop.f32.mrb[1].mxu0 }
 0x220   :  { %v142_v40 = vpop.f32.mrb[2].mxu0 }
 0x221   :  { %v169_v41 = vpack.c.bf16 %v140_v38, %v140_v38  ;;  %v143_v42 = vadd.f32 %v163_v36, %v142_v40  ;;  %v185_v43 = vpop.f32.mrb[3].mxu0 }
 0x223   :  { %155 = vst.msk [vmem:[%s261_s5] sm:$0xf] %vm154_vm2, %v169_v41  ;;  %v170_v44 = vpack.c.bf16 %v143_v42, %v143_v42 }
 0x225   :  { %156 = vst.msk [vmem:[%s261_s5 + $0x4] sm:$0xf] %vm154_vm2, %v170_v44 }

// kernel: _lambda_.41
= control target key start
LH: loop header
LB: loop body
LE: loop exit
PB: predicated region body
PF: predicated region fallthrough
CT: control target
= control target key end

     0   :  { %vm29_vm0 = vcmask 261120   ;;  %v224_v16 = vmov 0.0   ;;  %vm225_vm1 = vmmov 0   ;;  %s283_s0 = inlined_call_operand.vmem [shape: bf16[16,32], index: 0, kind: input, shape index: {}]   ;;  %s284_s3 = inlined_call_operand.vmem [shape: bf16[32,128], index: 3, kind: input, shape index: {}]   ;;  %s285_s1 = inlined_call_operand.vmem [shape: f32[1,32], index: 1, kind: input, shape index: {}]   ;;  %s286_s2 = inlined_call_operand.vmem [shape: f32[1,32], index: 2, kind: input, shape index: {}]   ;;  %s287_s4 = inlined_call_operand.vmem [shape: f32[1,128], index: 4, kind: input, shape index: {}]   ;;  %s288_s5 = inlined_call_operand.vmem [shape: bf16[16,128], index: 5, kind: output, shape index: {}]  }
   0x1   :  { %v189_v0 = vld [vmem:[%s283_s0] sm:$0xff]   ;;  %200 = vmatprep.subr.bf16.mxu0 %v224_v16  ;;  %v211_v17 = vld [vmem:[%s284_s3 + $0x8] sm:$0xff]   ;;  %204 = vmatprep.mubr.msk.bf16.mxu0 %vm225_vm1, %v224_v16 }
   0x2   :  { %v190_v1 = vunpack.c.l.bf16 %v189_v0  ;;  %v191_v2 = vunpack.c.h.bf16 %v189_v0  ;;  %v210_v15 = vld [vmem:[%s284_s3] sm:$0xff]  }
   0x3   :  { %201 = vmatpush3.bf16.msra.mxu0 %v210_v15  ;;  %v176_v26 = vld [vmem:[%s285_s1] ss:$0 sm:$0xff] }
   0x4   :  { %v30_v3 = vsel %vm29_vm0, %v190_v1, 0.0  ;;  %v33_v4 = vsel %vm29_vm0, %v191_v2, 0.0  ;;  %202 = vmatprep.subr.bf16.mxu0 %v224_v16  ;;  %v177_v30 = vld [vmem:[%s286_s2] ss:$0 sm:$0xff] }
   0x5   :  { %31 = vadd.xlane.f32.xlu0 %v30_v3  ;;  %v178_v36 = vld [vmem:[%s287_s4] ss:$0 sm:$0xff] }
   0x7   :  { %203 = vmatpush3.bf16.msra.mxu0 %v211_v17 }
   0x9   :  { %34 = vadd.xlane.f32.xlu0 %v33_v4 }
  0x92   :  { %v32_v5 = vpop.xlane.xlu0 %31 }
  0x93   :  { %v37_v6 = vmul.f32 0.03125, %v32_v5 }
  0x95   :  { %v39_v7 = vsub.f32 %v190_v1, %v37_v6 }
  0x96   :  { %v35_v8 = vpop.xlane.xlu0 %34 }
  0x97   :  { %v38_v9 = vmul.f32 0.03125, %v35_v8  ;;  %v41_v10 = vmul.f32 %v39_v7, %v39_v7 }
  0x99   :  { %v40_v11 = vsub.f32 %v191_v2, %v38_v9  ;;  %v43_v12 = vsel %vm29_vm0, %v41_v10, 0.0 }
  0x9a   :  { %44 = vadd.xlane.f32.xlu1 %v43_v12 }
  0x9b   :  { %v42_v13 = vmul.f32 %v40_v11, %v40_v11 }
  0x9d   :  { %v46_v14 = vsel %vm29_vm0, %v42_v13, 0.0 }
  0x9e   :  { %47 = vadd.xlane.f32.xlu1 %v46_v14 }
 0x127   :  { %v45_v18 = vpop.xlane.xlu1 %44 }
 0x128   :  { %v49_v19 = vmul.f32 0.03125, %v45_v18 }
 0x12a   :  { %v51_v20 = vadd.f32 1e-05, %v49_v19 }
 0x12b   :  { %v48_v21 = vpop.xlane.xlu1 %47 }
 0x12c   :  { %212 = vrsqrt.f32 %v51_v20  ;;  %v50_v22 = vmul.f32 0.03125, %v48_v21 }
 0x12e   :  { %v52_v23 = vadd.f32 1e-05, %v50_v22 }
 0x130   :  { %214 = vrsqrt.f32 %v52_v23 }
 0x136   :  { %v213_v24 = vpop.eup %212 }
 0x137   :  { %v55_v25 = vmul.f32 %v213_v24, %v39_v7 }
 0x139   :  { %v64_v28 = vmul.f32 %v176_v26, %v55_v25 }
 0x13a   :  { %v215_v27 = vpop.eup %214 }
 0x13b   :  { %v56_v29 = vmul.f32 %v215_v27, %v40_v11  ;;  %v73_v32 = vadd.f32 %v177_v30, %v64_v28 }
 0x13d   :  { %v65_v31 = vmul.f32 %v176_v26, %v56_v29 }
 0x13f   :  { %v74_v33 = vadd.f32 %v177_v30, %v65_v31 }
 0x141   :  { %v75_v34 = vpack.c.bf16 %v74_v33, %v73_v32 }
 0x143   :  { %76 = vst.msk [vmem:[#allocation2] sm:$0xff] %vm29_vm0, %v75_v34 }
 0x14a   :  { %v77_v35 = vld [vmem:[#allocation2] sm:$0xff] }
 0x14b   :  { %205 = vmatmul.mubr.msk.bf16.vlgmr.msra.gmra.mrb[0].mxu0 %vm29_vm0, %v77_v35 }
 0x21e   :  { %v139_v37 = vpop.f32.mrb[0].mxu0 }
 0x21f   :  { %v140_v38 = vadd.f32 %v178_v36, %v139_v37  ;;  %v206_v39 = vpop.f32.mrb[1].mxu0 }
 0x220   :  { %v142_v40 = vpop.f32.mrb[2].mxu0 }
 0x221   :  { %v182_v41 = vmul.f32 -1.702, %v140_v38  ;;  %v143_v42 = vadd.f32 %v178_v36, %v142_v40  ;;  %v207_v43 = vpop.f32.mrb[3].mxu0 }
 0x223   :  { %v150_v44 = vmul.f32 1.442695, %v182_v41  ;;  %v183_v45 = vmul.f32 -1.702, %v143_v42 }
 0x225   :  { %216 = vpow2.f32 %v150_v44  ;;  %v152_v46 = vmul.f32 1.442695, %v183_v45 }
 0x227   :  { %218 = vpow2.f32 %v152_v46 }
 0x22f   :  { %v217_v47 = vpop.eup %216 }
 0x230   :  { %v154_v48 = vadd.f32 1.0, %v217_v47 }
 0x231   :  { %v219_v49 = vpop.eup %218 }
 0x232   :  { %220 = vrcp.f32 %v154_v48  ;;  %v155_v50 = vadd.f32 1.0, %v219_v49 }
 0x234   :  { %222 = vrcp.f32 %v155_v50 }
 0x23c   :  { %v221_v51 = vpop.eup %220 }
 0x23d   :  { %v160_v53 = vmul.f32 %v221_v51, %v140_v38 }
 0x23e   :  { %v223_v52 = vpop.eup %222 }
 0x23f   :  { %v161_v54 = vmul.f32 %v223_v52, %v143_v42 }
 0x241   :  { %v195_v55 = vpack.c.bf16 %v161_v54, %v160_v53 }
 0x243   :  { %196 = vst [vmem:[%s288_s5] sm:$0xff] %v195_v55  }

// kernel: _lambda_.42
= control target key start
LH: loop header
LB: loop body
LE: loop exit
PB: predicated region body
PF: predicated region fallthrough
CT: control target
= control target key end

     0   :  { %v223_v0 = vmov 0.0   ;;  %vm224_vm0 = vmmov 0   ;;  %vm158_vm1 = vcmask 257024   ;;  %s289_s1 = inlined_call_operand.vmem [shape: bf16[128,32], index: 1, kind: input, shape index: {}]   ;;  %s290_s0 = inlined_call_operand.vmem [shape: bf16[16,128], index: 0, kind: input, shape index: {}]   ;;  %s291_s3 = inlined_call_operand.vmem [shape: bf16[16,32], index: 3, kind: input, shape index: {}]   ;;  %s292_s2 = inlined_call_operand.vmem [shape: f32[1,32], index: 2, kind: input, shape index: {}]   ;;  %s293_s4 = inlined_call_operand.vmem [shape: bf16[16,32], index: 4, kind: output, shape index: {}]  }
   0x1   :  { %192 = vmatprep.subr.bf16.mxu0 %v223_v0  ;;  %v214_v1 = vld [vmem:[%s289_s1] sm:$0xff]   ;;  %208 = vmatprep.mubr.msk.bf16.mxu0 %vm224_vm0, %v223_v0  ;;  %v215_v2 = vld [vmem:[%s289_s1 + $0x8] sm:$0xff]   ;;  %v216_v3 = vld [vmem:[%s289_s1 + $0x10] sm:$0xff]  }
   0x2   :  { %193 = vmatpush3.bf16.msra.mxu0 %v214_v1  ;;  %v217_v4 = vld [vmem:[%s289_s1 + $0x18] sm:$0xff]   ;;  %v218_v5 = vld [vmem:[%s289_s1 + $0x20] sm:$0xff]   ;;  %v219_v6 = vld [vmem:[%s289_s1 + $0x28] sm:$0xff]  }
   0x3   :  { %194 = vmatprep.subr.bf16.mxu0 %v223_v0  ;;  %v220_v7 = vld [vmem:[%s289_s1 + $0x30] sm:$0xff]   ;;  %v221_v8 = vld [vmem:[%s289_s1 + $0x38] sm:$0xff]   ;;  %v222_v9 = vld [vmem:[%s290_s0] sm:$0xff]  }
   0x4   :  { %v180_v10 = vld [vmem:[%s291_s3] sm:$0xff]  }
   0x5   :  { %v166_v11 = vld [vmem:[%s292_s2] ss:$0 sm:$0xff]  ;;  %v181_v12 = vunpack.c.l.bf16 %v180_v10  ;;  %v182_v16 = vunpack.c.h.bf16 %v180_v10 }
   0x6   :  { %195 = vmatpush3.bf16.msra.mxu0 %v215_v2 }
   0x7   :  { %196 = vmatprep.subr.bf16.mxu0 %v223_v0 }
   0xa   :  { %197 = vmatpush3.bf16.msra.mxu0 %v216_v3 }
   0xb   :  { %198 = vmatprep.subr.bf16.mxu0 %v223_v0 }
   0xe   :  { %199 = vmatpush3.bf16.msra.mxu0 %v217_v4 }
   0xf   :  { %200 = vmatprep.subr.bf16.mxu0 %v223_v0 }
  0x12   :  { %201 = vmatpush3.bf16.msra.mxu0 %v218_v5 }
  0x13   :  { %202 = vmatprep.subr.bf16.mxu0 %v223_v0 }
  0x16   :  { %203 = vmatpush3.bf16.msra.mxu0 %v219_v6 }
  0x17   :  { %204 = vmatprep.subr.bf16.mxu0 %v223_v0 }
  0x1a   :  { %205 = vmatpush3.bf16.msra.mxu0 %v220_v7 }
  0x1b   :  { %206 = vmatprep.subr.bf16.mxu0 %v223_v0 }
  0x1e   :  { %207 = vmatpush3.bf16.msra.mxu0 %v221_v8 }
  0x21   :  { %209 = vmatmul.mubr.bf16.vlgmr.msra.gmra.mrb[0].mxu0 %v222_v9 }
  0xf4   :  { %v137_v13 = vpop.f32.mrb[0].mxu0 }
  0xf5   :  { %v138_v14 = vadd.f32 %v166_v11, %v137_v13  ;;  %v210_v15 = vpop.f32.mrb[1].mxu0 }
  0xf6   :  { %v140_v17 = vpop.f32.mrb[2].mxu0 }
  0xf7   :  { %v148_v18 = vadd.f32 %v181_v12, %v138_v14  ;;  %v141_v19 = vadd.f32 %v166_v11, %v140_v17  ;;  %v211_v20 = vpop.f32.mrb[3].mxu0 }
  0xf9   :  { %v177_v21 = vpack.c.bf16 %v148_v18, %v148_v18  ;;  %v149_v22 = vadd.f32 %v182_v16, %v141_v19 }
  0xfb   :  { %159 = vst.msk [vmem:[%s293_s4] sm:$0xf] %vm158_vm1, %v177_v21  ;;  %v178_v23 = vpack.c.bf16 %v149_v22, %v149_v22 }
  0xfd   :  { %160 = vst.msk [vmem:[%s293_s4 + $0x4] sm:$0xf] %vm158_vm1, %v178_v23 }

// kernel: _lambda_.48
= control target key start
LH: loop header
LB: loop body
LE: loop exit
PB: predicated region body
PF: predicated region fallthrough
CT: control target
= control target key end

     0   :  { %v39_v3 = vlaneseq  ;;  %v379_v9 = vmov 1983009808   ;;  %vm52_vm0 = vcmask 261120   ;;  %v380_v20 = vmov 269488144   ;;  %s454_s0 = inlined_call_operand.vmem [shape: bf16[2,32], index: 0, kind: input, shape index: {}]   ;;  %s455_s1 = inlined_call_operand.vmem [shape: f32[1,32], index: 1, kind: input, shape index: {}]   ;;  %s456_s2 = inlined_call_operand.vmem [shape: f32[1,32], index: 2, kind: input, shape index: {}]   ;;  %s457_s3 = inlined_call_operand.vmem [shape: bf16[32,32], index: 3, kind: input, shape index: {}]   ;;  %s458_s4 = inlined_call_operand.vmem [shape: f32[2,32], index: 4, kind: output, shape index: {}]  }
   0x1   :  { %v22_v0 = vld [vmem:[%s454_s0] sm:$0x1]  ;;  %v23_v1 = vld [vmem:[%s454_s0 + $0x1] sm:$0x1]  ;;  %v24_v2 = vld [vmem:[%s454_s0 + $0x2] sm:$0x1]  ;;  %v37_v10 = vunpack.c.l.s4 %v379_v9  ;;  %v60_v21 = vunpack.c.l.s4 %v380_v20 }
   0x2   :  { %v25_v4 = vld [vmem:[%s454_s0 + $0x3] sm:$0x1]  ;;  %v26_v5 = vunpack.c.l.bf16 %v22_v0  ;;  %v27_v6 = vunpack.c.l.bf16 %v23_v1  ;;  %v28_v7 = vunpack.c.l.bf16 %v24_v2  ;;  %v40_v11 = vshrl.u32 %v39_v3, 7  ;;  %v376_v58 = vld [vmem:[%s457_s3 + $0x8] sm:$0xff]   ;;  %v352_v62 = vld [vmem:[%s455_s1] ss:$0 sm:$0xff] }
   0x3   :  { %v29_v8 = vunpack.c.l.bf16 %v25_v4  ;;  %v38_v14 = vunpack.c.0.s8 %v37_v10  ;;  %v381_v22 = vmov 842150450   ;;  %v382_v24 = vmov 1414812756   ;;  %v375_v56 = vld [vmem:[%s457_s3] sm:$0xff]  }
   0x4   :  { %v34_v12 = vcombine.low %v26_v5, %v27_v6  ;;  %v67_v23 = vunpack.c.l.s4 %v381_v22  ;;  %v74_v25 = vunpack.c.l.s4 %v382_v24  ;;  %v383_v26 = vmov 1987475062   ;;  %v353_v63 = vld [vmem:[%s456_s2] ss:$0 sm:$0xff] }
   0x5   :  { %v35_v13 = vcombine.low %v28_v7, %v29_v8  ;;  %v423_v15 = vsub.s32 %v38_v14, %v40_v11  ;;  %v81_v27 = vunpack.c.l.s4 %v383_v26  ;;  %v61_v28 = vunpack.c.0.s8 %v60_v21 }
   0x6   :  { %v68_v29 = vunpack.c.0.s8 %v67_v23  ;;  %v75_v30 = vunpack.c.0.s8 %v74_v25  ;;  %v384_v57 = vmov 0.0   ;;  %vm385_vm1 = vmmov 0  }
   0x7   :  { %v42_v16 = vrot.slane %v34_v12, %v423_v15  ;;  %v49_v17 = vrot.slane %v35_v13, %v423_v15  ;;  %v82_v31 = vunpack.c.0.s8 %v81_v27  ;;  %v64_v32 = vsub.s32 %v61_v28, %v40_v11  ;;  %360 = vmatprep.subr.bf16.mxu0 %v384_v57  ;;  %364 = vmatprep.mubr.msk.bf16.mxu0 %vm385_vm1, %v384_v57 }
   0x8   :  { %v71_v33 = vsub.s32 %v68_v29, %v40_v11  ;;  %v78_v34 = vsub.s32 %v75_v30, %v40_v11  ;;  %361 = vmatpush3.bf16.msra.mxu0 %v375_v56  ;;  %v170_v0 = vcombine.high %v352_v62, %v352_v62  ;;  %v201_v1 = vcombine.high %v353_v63, %v353_v63 }
   0x9   :  { %v50_v18 = vcombine.low %v42_v16, %v49_v17  ;;  %v85_v35 = vsub.s32 %v82_v31, %v40_v11  ;;  %362 = vmatprep.subr.bf16.mxu0 %v384_v57  ;;  %v177_v2 = vrot.slane %v352_v62, %v423_v15  ;;  %v208_v4 = vrot.slane %v353_v63, %v423_v15 }
   0xa   :  { %v184_v3 = vrot.slane %v170_v0, %v423_v15  ;;  %vm249_vm2 = vcmask 257024  }
   0xb   :  { %v53_v19 = vsel %vm52_vm0, %v50_v18, 0.0  ;;  %v216_v13 = vcombine.high %v208_v4, %v208_v4 }
   0xc   :  { %54 = vadd.xlane.f32.xlu0 %v53_v19  ;;  %363 = vmatpush3.bf16.msra.mxu0 %v376_v58 }
  0x99   :  { %v55_v36 = vpop.xlane.xlu0 %54 }
  0x9a   :  { %v57_v37 = vmul.f32 0.03125, %v55_v36 }
  0x9c   :  { %v65_v38 = vrot.slane %v57_v37, %v64_v32  ;;  %v72_v39 = vrot.slane %v57_v37, %v71_v33  ;;  %v79_v40 = vrot.slane %v57_v37, %v78_v34  ;;  %v86_v41 = vrot.slane %v57_v37, %v85_v35 }
  0x9e   :  { %v91_v42 = vsub.f32 %v26_v5, %v65_v38  ;;  %v92_v43 = vsub.f32 %v27_v6, %v72_v39  ;;  %v93_v44 = vsub.f32 %v28_v7, %v79_v40  ;;  %v94_v45 = vsub.f32 %v29_v8, %v86_v41 }
  0x9f   :  { %v215_v5 = vrot.slane %v201_v1, %v423_v15  ;;  %v185_v7 = vcombine.high %v177_v2, %v177_v2  ;;  %v186_v8 = vcombine.high %v184_v3, %v184_v3 }
  0xa0   :  { %v95_v46 = vmul.f32 %v91_v42, %v91_v42  ;;  %v96_v47 = vmul.f32 %v92_v43, %v92_v43  ;;  %v97_v48 = vmul.f32 %v93_v44, %v93_v44  ;;  %v98_v49 = vmul.f32 %v94_v45, %v94_v45 }
  0xa1   :  { %v217_v14 = vcombine.high %v215_v5, %v215_v5 }
  0xa2   :  { %v103_v50 = vcombine.low %v95_v46, %v96_v47  ;;  %v104_v51 = vcombine.low %v97_v48, %v98_v49 }
  0xa4   :  { %v111_v52 = vrot.slane %v103_v50, %v423_v15  ;;  %v118_v53 = vrot.slane %v104_v51, %v423_v15 }
  0xa6   :  { %v119_v54 = vcombine.low %v111_v52, %v118_v53 }
  0xa8   :  { %v121_v55 = vsel %vm52_vm0, %v119_v54, 0.0 }
  0xa9   :  { %122 = vadd.xlane.f32.xlu0 %v121_v55 }
 0x136   :  { %v123_v59 = vpop.xlane.xlu0 %122 }
 0x137   :  { %v124_v60 = vmul.f32 0.03125, %v123_v59 }
 0x139   :  { %v125_v61 = vadd.f32 1e-05, %v124_v60 }
 0x13b   :  { %377 = vrsqrt.f32 %v125_v61 }
 0x145   :  { %v378_v6 = vpop.eup %377 }
 0x146   :  { %v134_v9 = vrot.slane %v378_v6, %v64_v32  ;;  %v141_v10 = vrot.slane %v378_v6, %v71_v33  ;;  %v148_v11 = vrot.slane %v378_v6, %v78_v34  ;;  %v155_v12 = vrot.slane %v378_v6, %v85_v35 }
 0x148   :  { %v160_v16 = vmul.f32 %v134_v9, %v91_v42  ;;  %v161_v17 = vmul.f32 %v141_v10, %v92_v43  ;;  %v162_v18 = vmul.f32 %v148_v11, %v93_v44  ;;  %v163_v19 = vmul.f32 %v155_v12, %v94_v45 }
 0x14a   :  { %v191_v20 = vmul.f32 %v177_v2, %v160_v16  ;;  %v192_v21 = vmul.f32 %v185_v7, %v161_v17  ;;  %v193_v22 = vmul.f32 %v184_v3, %v162_v18  ;;  %v194_v23 = vmul.f32 %v186_v8, %v163_v19 }
 0x14c   :  { %v222_v24 = vadd.f32 %v208_v4, %v191_v20  ;;  %v223_v25 = vadd.f32 %v216_v13, %v192_v21  ;;  %v224_v26 = vadd.f32 %v215_v5, %v193_v22  ;;  %v225_v27 = vadd.f32 %v217_v14, %v194_v23 }
 0x14e   :  { %v230_v28 = vcombine.low %v222_v24, %v223_v25  ;;  %v231_v29 = vcombine.low %v224_v26, %v225_v27 }
 0x150   :  { %v238_v30 = vrot.slane %v230_v28, %v423_v15  ;;  %v245_v31 = vrot.slane %v231_v29, %v423_v15 }
 0x152   :  { %v246_v32 = vcombine.low %v238_v30, %v245_v31 }
 0x154   :  { %v248_v33 = vpack.c.bf16 %v246_v32, %v246_v32 }
 0x156   :  { %250 = vst.msk [vmem:[#allocation2] sm:$0xf] %vm249_vm2, %v248_v33 }
 0x15d   :  { %v251_v34 = vld [vmem:[#allocation2] sm:$0xf] }
 0x15e   :  { %365 = vmatmul.mubr.msk.bf16.vlgmr.msra.gmra.mrb[0].mxu0 %vm52_vm0, %v251_v34 }
 0x231   :  { %v306_v35 = vpop.f32.mrb[0].mxu0 }
 0x232   :  { %312 = vst.msk [vmem:[#allocation3] sm:$0xff] %vm52_vm0, %v306_v35  ;;  %v366_v36 = vpop.f32.mrb[1].mxu0 }
 0x233   :  { %v309_v37 = vpop.f32.mrb[2].mxu0 }
 0x234   :  { %v367_v38 = vpop.f32.mrb[3].mxu0 }
 0x239   :  { %v330_v39 = vld [vmem:[#allocation3] sm:$0x3] }
 0x23a   :  { %331 = vst [vmem:[%s458_s4] sm:$0x3] %v330_v39 }

// kernel: _lambda_.49
= control target key start
LH: loop header
LB: loop body
LE: loop exit
PB: predicated region body
PF: predicated region fallthrough
CT: control target
= control target key end

     0   :  { %vm19_vm0 = vcmask 254976   ;;  %v104_v6 = vmov 0.0   ;;  %vm105_vm1 = vmmov 0   ;;  %vm33_vm2 = vcmask 261120   ;;  %s138_s2 = inlined_call_operand.vmem [shape: f32[2,32], index: 2, kind: input, shape index: {}]   ;;  %s139_s1 = inlined_call_operand.vmem [shape: f32[2,32], index: 1, kind: input, shape index: {}]   ;;  %s140_s0 = inlined_call_operand.<no memory space> [shape: f32[1], index: 0, kind: input, shape index: {}]   ;;  %s141_s3 = inlined_call_operand.vmem [shape: f32[2,2], index: 3, kind: output, shape index: {}]  }
   0x1   :  { %v17_v0 = vld [vmem:[%s138_s2] sm:$0x3]  ;;  %92 = vmatprep.subr.bf16.mxu0 %v104_v6  ;;  %94 = vmatprep.mubr.msk.bf16.mxu0 %vm105_vm1, %v104_v6  ;;  %v81_v16 = vstv %s140_s0  ;;  %vm83_vm3 = vcmask 9216  }
   0x2   :  { %v16_v1 = vld [vmem:[%s139_s1] sm:$0x3]  ;;  %v25_v2 = vmul.f32 %v17_v0, %v17_v0 }
   0x3   :  { %v18_v3 = vmul.f32 %v16_v1, %v16_v1 }
   0x4   :  { %v26_v4 = vsel %vm19_vm0, %v25_v2, 0.0 }
   0x5   :  { %27 = vadd.xlane.f32.xlu0 %v26_v4  ;;  %v20_v5 = vsel %vm19_vm0, %v18_v3, 0.0 }
   0x9   :  { %21 = vadd.xlane.f32.xlu0 %v20_v5 }
  0x92   :  { %v28_v7 = vpop.xlane.xlu0 %27 }
  0x93   :  { %100 = vrsqrt.f32 %v28_v7 }
  0x96   :  { %v22_v8 = vpop.xlane.xlu0 %21 }
  0x97   :  { %102 = vrsqrt.f32 %v22_v8 }
  0x9d   :  { %v101_v9 = vpop.eup %100 }
  0x9e   :  { %v30_v10 = vmul.f32 %v101_v9, %v17_v0 }
  0xa0   :  { %v32_v11 = vpack.c.bf16 %v30_v10, %v30_v10 }
  0xa1   :  { %v103_v12 = vpop.eup %102 }
  0xa2   :  { %v38_v13 = vsel %vm33_vm2, %v32_v11, 0  ;;  %v24_v14 = vmul.f32 %v103_v12, %v16_v1 }
  0xa3   :  { %93 = vmatpush3.bf16.xpose.msra.mxu0 %v38_v13 }
  0xa4   :  { %v31_v15 = vpack.c.bf16 %v24_v14, %v24_v14 }
  0xaa   :  { %95 = vmatmul.mubr.msk.bf16.vlgmr.msra.gmra.mrb[0].mxu0 %vm33_vm2, %v31_v15 }
 0x17d   :  { %v74_v17 = vpop.f32.mrb[0].mxu0 }
 0x17e   :  { %v82_v18 = vmul.f32 %v81_v16, %v74_v17  ;;  %v96_v19 = vpop.f32.mrb[1].mxu0 }
 0x17f   :  { %v77_v20 = vpop.f32.mrb[2].mxu0 }
 0x180   :  { %84 = vst.msk [vmem:[%s141_s3] sm:$0x3] %vm83_vm3, %v82_v18  ;;  %v97_v21 = vpop.f32.mrb[3].mxu0 }

</bundles_post_ra>
